<compile_context>
chip_gen: v5e
topology: v5e:2x2
jax: 0.10.0
libtpu: 0.0.40
codegen_flags: <defaults>
</compile_context>

<pallas_src>
import functools

import jax
import jax.numpy as jnp
from jax import lax
from jax.experimental import pallas as pl
from jax.experimental.pallas import tpu as pltpu


def _round_up(x, m):
    return ((x + m - 1) // m) * m


def supervisor_kernel(t_ref, h_in_ref, w_ih_ref, w_hh_ref, b_gx_ref, b_hn_ref,
                      w_lin_ref, b_lin_ref, out_ref, ho_scr, gx_scr,
                      *, num_layers, padding_value):
    # Per batch block:
    #   t_ref    : (tB, 1) int32 sequence lengths
    #   h_in_ref : (T, tB, Dp)  layer-0 input
    #   w_ih_ref : (L, Dp, 3*Dp) fused-gate input weights (x @ W), gate order r,z,n
    #   w_hh_ref : (L, Dp, 3*Dp) fused-gate hidden weights (h @ W)
    #   b_gx_ref : (L, 1, 3*Dp)  b_ih (+ b_hh folded in for r,z); n gate: b_ih only
    #   b_hn_ref : (L, 1, Dp)    b_hh of the n gate (must stay inside r * (...))
    #   w_lin_ref: (Dp, Dp), b_lin_ref: (1, Dp)
    #   out_ref  : (T, tB, Dp)
    #   ho_scr   : (T, tB, Dp)   inter-layer activation buffer
    #   gx_scr   : (T, tB, 3*Dp) hoisted input-projection buffer
    T, tB, Dp = h_in_ref.shape

    tvec = t_ref[...]                                           # (tB, 1) int32

    for layer in range(num_layers):
        # ---- Hoisted input projection: one large-M matmul for all timesteps ----
        x_all = h_in_ref[...] if layer == 0 else ho_scr[...]    # (T, tB, Dp)
        gx = jnp.dot(x_all.reshape(T * tB, Dp), w_ih_ref[layer],
                     preferred_element_type=jnp.float32) + b_gx_ref[layer]
        gx_scr[...] = gx.reshape(T, tB, 3 * Dp)

        # Last layer writes directly into out_ref (epilogue rewrites it in place).
        dst = out_ref if layer == num_layers - 1 else ho_scr

        w_hh_l = w_hh_ref[layer]                                # (Dp, 3*Dp)
        b_hn_l = jnp.broadcast_to(b_hn_ref[layer], (tB, Dp))    # hoisted broadcast

        def step(s, h, dst=dst, w_hh_l=w_hh_l, b_hn_l=b_hn_l):
            gxs = gx_scr[s]                                     # (tB, 3*Dp)
            gh = jnp.dot(h, w_hh_l, preferred_element_type=jnp.float32)
            r = jax.nn.sigmoid(gxs[:, 0 * Dp:1 * Dp] + gh[:, 0 * Dp:1 * Dp])
            z = jax.nn.sigmoid(gxs[:, 1 * Dp:2 * Dp] + gh[:, 1 * Dp:2 * Dp])
            n = jnp.tanh(gxs[:, 2 * Dp:3 * Dp] + r * (gh[:, 2 * Dp:3 * Dp] + b_hn_l))
            h_new = (1.0 - z) * n + z * h
            valid = tvec > s                                    # packed-seq mask
            dst[s] = jnp.where(valid, h_new, 0.0)               # pad filled later
            return jnp.where(valid, h_new, h)                   # freeze past length

        h0 = jnp.zeros((tB, Dp), jnp.float32)
        lax.fori_loop(0, T, step, h0, unroll=True)

    # ---- pad_packed_sequence(padding_value) + Linear + Sigmoid ----
    ho = out_ref[...]                                           # (T, tB, Dp)
    time_idx = lax.broadcasted_iota(jnp.int32, (T, tB, 1), 0)   # small (T,tB,1) iota
    valid = time_idx < tvec.reshape(1, tB, 1)
    ho_pad = jnp.where(valid, ho, jnp.float32(padding_value))
    logits = jnp.dot(ho_pad.reshape(T * tB, Dp), w_lin_ref[...],
                     preferred_element_type=jnp.float32) + b_lin_ref[...]
    out_ref[...] = jax.nn.sigmoid(logits).reshape(T, tB, Dp)


def supervisor_forward(H, t, params, *, num_layers, padding_value, max_seq):
    B, T, D = H.shape
    assert T == max_seq
    Dp = params["w_lin"].shape[0]
    tB = 8                                       # batch block (sublane multiple)
    Bp = _round_up(max(B, tB), tB)
    L = num_layers

    # (B, T, D) -> (T, Bp, Dp), zero padded; padded lengths = 0 so they never run.
    h_tbd = jnp.transpose(H.astype(jnp.float32), (1, 0, 2))
    h_tbd = jnp.pad(h_tbd, ((0, 0), (0, Bp - B), (0, Dp - D)))
    t_pad = jnp.pad(t.astype(jnp.int32), (0, Bp - B)).reshape(Bp, 1)

    kernel = functools.partial(supervisor_kernel, num_layers=num_layers,
                               padding_value=float(padding_value))

    def full(shape):
        return pl.BlockSpec(shape, lambda b, _s=shape: (0,) * len(_s))

    out_tbd = pl.pallas_call(
        kernel,
        out_shape=jax.ShapeDtypeStruct((T, Bp, Dp), jnp.float32),
        grid=(Bp // tB,),
        in_specs=[
            pl.BlockSpec((tB, 1), lambda b: (b, 0)),            # t (lengths)
            pl.BlockSpec((T, tB, Dp), lambda b: (0, b, 0)),     # H
            full((L, Dp, 3 * Dp)),                              # w_ih (fused gates)
            full((L, Dp, 3 * Dp)),                              # w_hh (fused gates)
            full((L, 1, 3 * Dp)),                               # b_gx
            full((L, 1, Dp)),                                   # b_hn
            full((Dp, Dp)),                                     # w_lin
            full((1, Dp)),                                      # b_lin
        ],
        out_specs=pl.BlockSpec((T, tB, Dp), lambda b: (0, b, 0)),
        scratch_shapes=[pltpu.VMEM((T, tB, Dp), jnp.float32),       # ho_scr
                        pltpu.VMEM((T, tB, 3 * Dp), jnp.float32)],  # gx_scr
        compiler_params=pltpu.CompilerParams(
            dimension_semantics=("parallel",),
            vmem_limit_bytes=32 * 1024 * 1024),
    )(t_pad, h_tbd, params["w_ih"], params["w_hh"], params["b_gx"],
      params["b_hn"], params["w_lin"], params["b_lin"])

    out = jnp.transpose(out_tbd, (1, 0, 2))                     # (Bp, T, Dp)
    return out[:B, :, :D]


def init_params(key, hidden_dim, num_layers, d_pad=None):
    D = hidden_dim
    Dp = d_pad if d_pad is not None else _round_up(max(D, 128), 128)
    keys = jax.random.split(key, 2 * num_layers + 1)

    def xavier(k, shape):
        fan_out, fan_in = shape
        bound = (6.0 / (fan_in + fan_out)) ** 0.5
        return jax.random.uniform(k, shape, jnp.float32, -bound, bound)

    def pack_gates(W):
        # W: (3D, D) PyTorch layout (rows grouped r,z,n).  Returns (Dp, 3*Dp) so
        # x @ Wp = [x @ W_r^T | x @ W_z^T | x @ W_n^T], each gate padded to Dp lanes.
        Wt = W.T                                                # (D, 3D)
        out = jnp.zeros((Dp, 3 * Dp), jnp.float32)
        for g in range(3):
            out = out.at[:D, g * Dp:g * Dp + D].set(Wt[:, g * D:(g + 1) * D])
        return out

    def pad_bias_gates(b):                                      # (3D,) -> (1, 3*Dp)
        out = jnp.zeros((1, 3 * Dp), jnp.float32)
        for g in range(3):
            out = out.at[0, g * Dp:g * Dp + D].set(b[g * D:(g + 1) * D])
        return out

    w_ih, w_hh, b_gx, b_hn, raw_layers = [], [], [], [], []
    for l in range(num_layers):
        Wih = xavier(keys[2 * l], (3 * D, D))
        Whh = xavier(keys[2 * l + 1], (3 * D, D))
        bih = jnp.ones((3 * D,), jnp.float32)        # PyTorch reset(): bias_ih = 1
        bhh = jnp.zeros((3 * D,), jnp.float32)       # bias_hh = 0
        w_ih.append(pack_gates(Wih))
        w_hh.append(pack_gates(Whh))
        # Fold r/z biases (b_ih + b_hh); n gate keeps b_ih only here, its b_hh
        # stays separate because it must sit inside r * (h @ W_hn + b_hn).
        comb = jnp.concatenate([bih[:2 * D] + bhh[:2 * D], bih[2 * D:]])
        b_gx.append(pad_bias_gates(comb))
        b_hn.append(jnp.zeros((1, Dp), jnp.float32).at[0, :D].set(bhh[2 * D:]))
        raw_layers.append(dict(w_ih=Wih, w_hh=Whh, b_ih=bih, b_hh=bhh))

    W_lin = xavier(keys[-1], (D, D))
    b_lin_raw = jnp.zeros((D,), jnp.float32)                    # linear bias = 0
    w_lin = jnp.zeros((Dp, Dp), jnp.float32).at[:D, :D].set(W_lin.T)
    b_lin = jnp.zeros((1, Dp), jnp.float32).at[0, :D].set(b_lin_raw)

    params = dict(w_ih=jnp.stack(w_ih), w_hh=jnp.stack(w_hh),
                  b_gx=jnp.stack(b_gx), b_hn=jnp.stack(b_hn),
                  w_lin=w_lin, b_lin=b_lin)
    raw_params = dict(layers=raw_layers, w_lin=W_lin, b_lin=b_lin_raw)
    return params, raw_params


def reference_forward(H, t, raw, *, num_layers, padding_value):
    # Pure-JAX reference with identical semantics (correctness check only).
    B, T, D = H.shape
    x = H.astype(jnp.float32)
    for l in range(num_layers):
        p = raw["layers"][l]
        Wih, Whh, bih, bhh = p["w_ih"], p["w_hh"], p["b_ih"], p["b_hh"]
        h = jnp.zeros((B, D), jnp.float32)
        outs = []
        for s in range(T):
            xs = x[:, s, :]
            gx = xs @ Wih.T + bih
            gh = h @ Whh.T + bhh
            r = jax.nn.sigmoid(gx[:, :D] + gh[:, :D])
            z = jax.nn.sigmoid(gx[:, D:2 * D] + gh[:, D:2 * D])
            n = jnp.tanh(gx[:, 2 * D:] + r * gh[:, 2 * D:])
            h_new = (1.0 - z) * n + z * h
            valid = (t > s)[:, None]
            h = jnp.where(valid, h_new, h)
            outs.append(jnp.where(valid, h_new, 0.0))
        x = jnp.stack(outs, axis=1)
    mask = jnp.arange(T)[None, :, None] < t[:, None, None]
    ho = jnp.where(mask, x, jnp.float32(padding_value))
    logits = ho @ raw["w_lin"].T + raw["b_lin"]
    return jax.nn.sigmoid(logits)


if __name__ == "__main__":
    hidden_dim = 32
    num_layers = 2
    padding_value = 0.0
    max_seq = 8
    B = 2

    key = jax.random.PRNGKey(0)
    k_param, k_data = jax.random.split(key)
    params, raw = init_params(k_param, hidden_dim, num_layers)

    H = jax.random.normal(k_data, (B, max_seq, hidden_dim), jnp.float32)
    t = jnp.array([max_seq, 5], dtype=jnp.int32)   # variable sequence lengths

    out = supervisor_forward(H, t, params, num_layers=num_layers,
                             padding_value=padding_value, max_seq=max_seq)
    out = jax.block_until_ready(out)

    ref = reference_forward(H, t, raw, num_layers=num_layers,
                            padding_value=padding_value)
    max_err = float(jnp.max(jnp.abs(out - ref)))
    assert out.shape == (B, max_seq, hidden_dim)
    assert max_err < 1e-3, f"mismatch vs reference: {max_err}"
    print("KERNEL_OK")
</pallas_src>

<mosaic_0001>
module attributes {stable_mosaic.version = 11 : i64} {
  func.func @supervisor_kernel(%arg0: i32, %arg1: memref<8x1xi32, #tpu.memory_space<vmem>>, %arg2: memref<8x8x128xf32, #tpu.memory_space<vmem>>, %arg3: memref<2x128x384xf32, #tpu.memory_space<vmem>>, %arg4: memref<2x128x384xf32, #tpu.memory_space<vmem>>, %arg5: memref<2x1x384xf32, #tpu.memory_space<vmem>>, %arg6: memref<2x1x128xf32, #tpu.memory_space<vmem>>, %arg7: memref<128x128xf32, #tpu.memory_space<vmem>>, %arg8: memref<1x128xf32, #tpu.memory_space<vmem>>, %arg9: memref<8x8x128xf32, #tpu.memory_space<vmem>>, %arg10: memref<8x8x128xf32, #tpu.memory_space<vmem>>, %arg11: memref<8x8x384xf32, #tpu.memory_space<vmem>>) attributes {dimension_semantics = [#tpu.dimension_semantics<parallel>], iteration_bounds = array<i64: 1>, scalar_prefetch = 0 : i64, scratch_operands = 2 : i64, tpu.core_type = #tpu.core_type<tc>, window_params = [{transform_indices = @transform_0, window_bounds = array<i64: 8, 1>}, {transform_indices = @transform_1, window_bounds = array<i64: 8, 8, 128>}, {pipeline_mode = #tpu.pipeline_mode<synchronous>, transform_indices = @transform_2, window_bounds = array<i64: 2, 128, 384>}, {pipeline_mode = #tpu.pipeline_mode<synchronous>, transform_indices = @transform_3, window_bounds = array<i64: 2, 128, 384>}, {pipeline_mode = #tpu.pipeline_mode<synchronous>, transform_indices = @transform_4, window_bounds = array<i64: 2, 1, 384>}, {pipeline_mode = #tpu.pipeline_mode<synchronous>, transform_indices = @transform_5, window_bounds = array<i64: 2, 1, 128>}, {pipeline_mode = #tpu.pipeline_mode<synchronous>, transform_indices = @transform_6, window_bounds = array<i64: 128, 128>}, {pipeline_mode = #tpu.pipeline_mode<synchronous>, transform_indices = @transform_7, window_bounds = array<i64: 1, 128>}, {transform_indices = @transform_8, window_bounds = array<i64: 8, 8, 128>}]} {
    %c0 = arith.constant 0 : index
    %c0_0 = arith.constant 0 : index
    %0 = vector.load %arg1[%c0, %c0_0] : memref<8x1xi32, #tpu.memory_space<vmem>>, vector<8x1xi32>
    %c0_1 = arith.constant 0 : index
    %c0_2 = arith.constant 0 : index
    %c0_3 = arith.constant 0 : index
    %1 = vector.load %arg2[%c0_1, %c0_2, %c0_3] : memref<8x8x128xf32, #tpu.memory_space<vmem>>, vector<8x8x128xf32>
    %2 = vector.shape_cast %1 : vector<8x8x128xf32> to vector<64x128xf32>
    %c0_4 = arith.constant 0 : index
    %c0_5 = arith.constant 0 : index
    %c0_6 = arith.constant 0 : index
    %3 = vector.load %arg3[%c0_4, %c0_5, %c0_6] : memref<2x128x384xf32, #tpu.memory_space<vmem>>, vector<1x128x384xf32>
    %4 = vector.shape_cast %3 : vector<1x128x384xf32> to vector<128x384xf32>
    %cst = arith.constant dense<0.000000e+00> : vector<64x384xf32>
    %5 = tpu.matmul %2, %4, %cst {dimension_numbers = #tpu.dot_dimension_numbers<[1], [0], [0], [1], [0, 0, 1, 1], [], []>} : vector<64x128xf32>, vector<128x384xf32>, vector<64x384xf32> -> vector<64x384xf32>
    %c0_7 = arith.constant 0 : index
    %c0_8 = arith.constant 0 : index
    %c0_9 = arith.constant 0 : index
    %6 = vector.load %arg5[%c0_7, %c0_8, %c0_9] : memref<2x1x384xf32, #tpu.memory_space<vmem>>, vector<1x1x384xf32>
    %7 = vector.shape_cast %6 : vector<1x1x384xf32> to vector<1x384xf32>
    %8 = vector.broadcast %7 : vector<1x384xf32> to vector<64x384xf32>
    %9 = arith.addf %5, %8 : vector<64x384xf32>
    %10 = vector.shape_cast %9 : vector<64x384xf32> to vector<8x8x384xf32>
    %c0_10 = arith.constant 0 : index
    %c0_11 = arith.constant 0 : index
    %c0_12 = arith.constant 0 : index
    %11 = vector.load %arg11[%c0_10, %c0_11, %c0_12] : memref<8x8x384xf32, #tpu.memory_space<vmem>>, vector<8x8x384xf32>
    tpu.vector_store %arg11[%c0_10, %c0_11, %c0_12], %10 {strides = array<i32>} : memref<8x8x384xf32, #tpu.memory_space<vmem>>, vector<8x8x384xf32>,
    %c0_13 = arith.constant 0 : index
    %c0_14 = arith.constant 0 : index
    %c0_15 = arith.constant 0 : index
    %12 = vector.load %arg4[%c0_13, %c0_14, %c0_15] : memref<2x128x384xf32, #tpu.memory_space<vmem>>, vector<1x128x384xf32>
    %13 = vector.shape_cast %12 : vector<1x128x384xf32> to vector<128x384xf32>
    %c0_16 = arith.constant 0 : index
    %c0_17 = arith.constant 0 : index
    %c0_18 = arith.constant 0 : index
    %14 = vector.load %arg6[%c0_16, %c0_17, %c0_18] : memref<2x1x128xf32, #tpu.memory_space<vmem>>, vector<1x1x128xf32>
    %15 = vector.shape_cast %14 : vector<1x1x128xf32> to vector<1x128xf32>
    %16 = vector.shape_cast %15 : vector<1x128xf32> to vector<1x128xf32>
    %17 = vector.broadcast %16 : vector<1x128xf32> to vector<8x128xf32>
    %cst_19 = arith.constant 0.000000e+00 : f32
    %18 = vector.broadcast %cst_19 : f32 to vector<8x128xf32>
    %c0_i32 = arith.constant 0 : i32
    %19 = arith.index_cast %c0_i32 : i32 to index
    %c0_20 = arith.constant 0 : index
    %c0_21 = arith.constant 0 : index
    %20 = vector.load %arg11[%19, %c0_20, %c0_21] : memref<8x8x384xf32, #tpu.memory_space<vmem>>, vector<1x8x384xf32>
    %21 = vector.shape_cast %20 : vector<1x8x384xf32> to vector<8x384xf32>
    %cst_22 = arith.constant dense<0.000000e+00> : vector<8x384xf32>
    %22 = tpu.matmul %18, %13, %cst_22 {dimension_numbers = #tpu.dot_dimension_numbers<[1], [0], [0], [1], [0, 0, 1, 1], [], []>} : vector<8x128xf32>, vector<128x384xf32>, vector<8x384xf32> -> vector<8x384xf32>
    %23 = vector.extract_strided_slice %21 {offsets = [0, 0], sizes = [8, 128], strides = [1, 1]} : vector<8x384xf32> to vector<8x128xf32>
    %24 = vector.extract_strided_slice %22 {offsets = [0, 0], sizes = [8, 128], strides = [1, 1]} : vector<8x384xf32> to vector<8x128xf32>
    %25 = arith.addf %23, %24 : vector<8x128xf32>
    %26 = arith.negf %25 : vector<8x128xf32>
    %27 = math.exp %26 : vector<8x128xf32>
    %cst_23 = arith.constant 1.000000e+00 : f32
    %28 = vector.broadcast %cst_23 : f32 to vector<8x128xf32>
    %29 = arith.addf %28, %27 : vector<8x128xf32>
    %30 = arith.divf %28, %29 : vector<8x128xf32>
    %31 = vector.extract_strided_slice %21 {offsets = [0, 128], sizes = [8, 128], strides = [1, 1]} : vector<8x384xf32> to vector<8x128xf32>
    %32 = vector.extract_strided_slice %22 {offsets = [0, 128], sizes = [8, 128], strides = [1, 1]} : vector<8x384xf32> to vector<8x128xf32>
    %33 = arith.addf %31, %32 : vector<8x128xf32>
    %34 = arith.negf %33 : vector<8x128xf32>
    %35 = math.exp %34 : vector<8x128xf32>
    %cst_24 = arith.constant 1.000000e+00 : f32
    %36 = vector.broadcast %cst_24 : f32 to vector<8x128xf32>
    %37 = arith.addf %36, %35 : vector<8x128xf32>
    %38 = arith.divf %36, %37 : vector<8x128xf32>
    %39 = vector.extract_strided_slice %21 {offsets = [0, 256], sizes = [8, 128], strides = [1, 1]} : vector<8x384xf32> to vector<8x128xf32>
    %40 = vector.extract_strided_slice %22 {offsets = [0, 256], sizes = [8, 128], strides = [1, 1]} : vector<8x384xf32> to vector<8x128xf32>
    %41 = arith.addf %40, %17 : vector<8x128xf32>
    %42 = arith.mulf %30, %41 : vector<8x128xf32>
    %43 = arith.addf %39, %42 : vector<8x128xf32>
    %44 = math.tanh %43 : vector<8x128xf32>
    %cst_25 = arith.constant 1.000000e+00 : f32
    %45 = vector.broadcast %cst_25 : f32 to vector<8x128xf32>
    %46 = arith.subf %45, %38 : vector<8x128xf32>
    %47 = arith.mulf %46, %44 : vector<8x128xf32>
    %48 = arith.mulf %38, %18 : vector<8x128xf32>
    %49 = arith.addf %47, %48 : vector<8x128xf32>
    %50 = vector.broadcast %c0_i32 : i32 to vector<8x1xi32>
    %51 = arith.cmpi sgt, %0, %50 : vector<8x1xi32>
    %cst_26 = arith.constant 0.000000e+00 : f32
    %52 = vector.shape_cast %51 : vector<8x1xi1> to vector<8x1xi1>
    %53 = vector.broadcast %52 : vector<8x1xi1> to vector<8x128xi1>
    %54 = vector.broadcast %cst_26 : f32 to vector<8x128xf32>
    %55 = arith.select %53, %49, %54 : vector<8x128xi1>, vector<8x128xf32>
    %56 = arith.index_cast %c0_i32 : i32 to index
    %c0_27 = arith.constant 0 : index
    %c0_28 = arith.constant 0 : index
    %57 = vector.load %arg10[%56, %c0_27, %c0_28] : memref<8x8x128xf32, #tpu.memory_space<vmem>>, vector<1x8x128xf32>
    %58 = vector.shape_cast %57 : vector<1x8x128xf32> to vector<8x128xf32>
    %59 = vector.shape_cast %55 : vector<8x128xf32> to vector<1x8x128xf32>
    tpu.vector_store %arg10[%56, %c0_27, %c0_28], %59 {strides = array<i32>} : memref<8x8x128xf32, #tpu.memory_space<vmem>>, vector<1x8x128xf32>,
    %60 = vector.shape_cast %51 : vector<8x1xi1> to vector<8x1xi1>
    %61 = vector.broadcast %60 : vector<8x1xi1> to vector<8x128xi1>
    %62 = arith.select %61, %49, %18 : vector<8x128xi1>, vector<8x128xf32>
    %c1_i32 = arith.constant 1 : i32
    %63 = arith.index_cast %c1_i32 : i32 to index
    %c0_29 = arith.constant 0 : index
    %c0_30 = arith.constant 0 : index
    %64 = vector.load %arg11[%63, %c0_29, %c0_30] : memref<8x8x384xf32, #tpu.memory_space<vmem>>, vector<1x8x384xf32>
    %65 = vector.shape_cast %64 : vector<1x8x384xf32> to vector<8x384xf32>
    %cst_31 = arith.constant dense<0.000000e+00> : vector<8x384xf32>
    %66 = tpu.matmul %62, %13, %cst_31 {dimension_numbers = #tpu.dot_dimension_numbers<[1], [0], [0], [1], [0, 0, 1, 1], [], []>} : vector<8x128xf32>, vector<128x384xf32>, vector<8x384xf32> -> vector<8x384xf32>
    %67 = vector.extract_strided_slice %65 {offsets = [0, 0], sizes = [8, 128], strides = [1, 1]} : vector<8x384xf32> to vector<8x128xf32>
    %68 = vector.extract_strided_slice %66 {offsets = [0, 0], sizes = [8, 128], strides = [1, 1]} : vector<8x384xf32> to vector<8x128xf32>
    %69 = arith.addf %67, %68 : vector<8x128xf32>
    %70 = arith.negf %69 : vector<8x128xf32>
    %71 = math.exp %70 : vector<8x128xf32>
    %cst_32 = arith.constant 1.000000e+00 : f32
    %72 = vector.broadcast %cst_32 : f32 to vector<8x128xf32>
    %73 = arith.addf %72, %71 : vector<8x128xf32>
    %74 = arith.divf %72, %73 : vector<8x128xf32>
    %75 = vector.extract_strided_slice %65 {offsets = [0, 128], sizes = [8, 128], strides = [1, 1]} : vector<8x384xf32> to vector<8x128xf32>
    %76 = vector.extract_strided_slice %66 {offsets = [0, 128], sizes = [8, 128], strides = [1, 1]} : vector<8x384xf32> to vector<8x128xf32>
    %77 = arith.addf %75, %76 : vector<8x128xf32>
    %78 = arith.negf %77 : vector<8x128xf32>
    %79 = math.exp %78 : vector<8x128xf32>
    %cst_33 = arith.constant 1.000000e+00 : f32
    %80 = vector.broadcast %cst_33 : f32 to vector<8x128xf32>
    %81 = arith.addf %80, %79 : vector<8x128xf32>
    %82 = arith.divf %80, %81 : vector<8x128xf32>
    %83 = vector.extract_strided_slice %65 {offsets = [0, 256], sizes = [8, 128], strides = [1, 1]} : vector<8x384xf32> to vector<8x128xf32>
    %84 = vector.extract_strided_slice %66 {offsets = [0, 256], sizes = [8, 128], strides = [1, 1]} : vector<8x384xf32> to vector<8x128xf32>
    %85 = arith.addf %84, %17 : vector<8x128xf32>
    %86 = arith.mulf %74, %85 : vector<8x128xf32>
    %87 = arith.addf %83, %86 : vector<8x128xf32>
    %88 = math.tanh %87 : vector<8x128xf32>
    %cst_34 = arith.constant 1.000000e+00 : f32
    %89 = vector.broadcast %cst_34 : f32 to vector<8x128xf32>
    %90 = arith.subf %89, %82 : vector<8x128xf32>
    %91 = arith.mulf %90, %88 : vector<8x128xf32>
    %92 = arith.mulf %82, %62 : vector<8x128xf32>
    %93 = arith.addf %91, %92 : vector<8x128xf32>
    %94 = vector.broadcast %c1_i32 : i32 to vector<8x1xi32>
    %95 = arith.cmpi sgt, %0, %94 : vector<8x1xi32>
    %cst_35 = arith.constant 0.000000e+00 : f32
    %96 = vector.shape_cast %95 : vector<8x1xi1> to vector<8x1xi1>
    %97 = vector.broadcast %96 : vector<8x1xi1> to vector<8x128xi1>
    %98 = vector.broadcast %cst_35 : f32 to vector<8x128xf32>
    %99 = arith.select %97, %93, %98 : vector<8x128xi1>, vector<8x128xf32>
    %100 = arith.index_cast %c1_i32 : i32 to index
    %c0_36 = arith.constant 0 : index
    %c0_37 = arith.constant 0 : index
    %101 = vector.load %arg10[%100, %c0_36, %c0_37] : memref<8x8x128xf32, #tpu.memory_space<vmem>>, vector<1x8x128xf32>
    %102 = vector.shape_cast %101 : vector<1x8x128xf32> to vector<8x128xf32>
    %103 = vector.shape_cast %99 : vector<8x128xf32> to vector<1x8x128xf32>
    tpu.vector_store %arg10[%100, %c0_36, %c0_37], %103 {strides = array<i32>} : memref<8x8x128xf32, #tpu.memory_space<vmem>>, vector<1x8x128xf32>,
    %104 = vector.shape_cast %95 : vector<8x1xi1> to vector<8x1xi1>
    %105 = vector.broadcast %104 : vector<8x1xi1> to vector<8x128xi1>
    %106 = arith.select %105, %93, %62 : vector<8x128xi1>, vector<8x128xf32>
    %c2_i32 = arith.constant 2 : i32
    %107 = arith.index_cast %c2_i32 : i32 to index
    %c0_38 = arith.constant 0 : index
    %c0_39 = arith.constant 0 : index
    %108 = vector.load %arg11[%107, %c0_38, %c0_39] : memref<8x8x384xf32, #tpu.memory_space<vmem>>, vector<1x8x384xf32>
    %109 = vector.shape_cast %108 : vector<1x8x384xf32> to vector<8x384xf32>
    %cst_40 = arith.constant dense<0.000000e+00> : vector<8x384xf32>
    %110 = tpu.matmul %106, %13, %cst_40 {dimension_numbers = #tpu.dot_dimension_numbers<[1], [0], [0], [1], [0, 0, 1, 1], [], []>} : vector<8x128xf32>, vector<128x384xf32>, vector<8x384xf32> -> vector<8x384xf32>
    %111 = vector.extract_strided_slice %109 {offsets = [0, 0], sizes = [8, 128], strides = [1, 1]} : vector<8x384xf32> to vector<8x128xf32>
    %112 = vector.extract_strided_slice %110 {offsets = [0, 0], sizes = [8, 128], strides = [1, 1]} : vector<8x384xf32> to vector<8x128xf32>
    %113 = arith.addf %111, %112 : vector<8x128xf32>
    %114 = arith.negf %113 : vector<8x128xf32>
    %115 = math.exp %114 : vector<8x128xf32>
    %cst_41 = arith.constant 1.000000e+00 : f32
    %116 = vector.broadcast %cst_41 : f32 to vector<8x128xf32>
    %117 = arith.addf %116, %115 : vector<8x128xf32>
    %118 = arith.divf %116, %117 : vector<8x128xf32>
    %119 = vector.extract_strided_slice %109 {offsets = [0, 128], sizes = [8, 128], strides = [1, 1]} : vector<8x384xf32> to vector<8x128xf32>
    %120 = vector.extract_strided_slice %110 {offsets = [0, 128], sizes = [8, 128], strides = [1, 1]} : vector<8x384xf32> to vector<8x128xf32>
    %121 = arith.addf %119, %120 : vector<8x128xf32>
    %122 = arith.negf %121 : vector<8x128xf32>
    %123 = math.exp %122 : vector<8x128xf32>
    %cst_42 = arith.constant 1.000000e+00 : f32
    %124 = vector.broadcast %cst_42 : f32 to vector<8x128xf32>
    %125 = arith.addf %124, %123 : vector<8x128xf32>
    %126 = arith.divf %124, %125 : vector<8x128xf32>
    %127 = vector.extract_strided_slice %109 {offsets = [0, 256], sizes = [8, 128], strides = [1, 1]} : vector<8x384xf32> to vector<8x128xf32>
    %128 = vector.extract_strided_slice %110 {offsets = [0, 256], sizes = [8, 128], strides = [1, 1]} : vector<8x384xf32> to vector<8x128xf32>
    %129 = arith.addf %128, %17 : vector<8x128xf32>
    %130 = arith.mulf %118, %129 : vector<8x128xf32>
    %131 = arith.addf %127, %130 : vector<8x128xf32>
    %132 = math.tanh %131 : vector<8x128xf32>
    %cst_43 = arith.constant 1.000000e+00 : f32
    %133 = vector.broadcast %cst_43 : f32 to vector<8x128xf32>
    %134 = arith.subf %133, %126 : vector<8x128xf32>
    %135 = arith.mulf %134, %132 : vector<8x128xf32>
    %136 = arith.mulf %126, %106 : vector<8x128xf32>
    %137 = arith.addf %135, %136 : vector<8x128xf32>
    %138 = vector.broadcast %c2_i32 : i32 to vector<8x1xi32>
    %139 = arith.cmpi sgt, %0, %138 : vector<8x1xi32>
    %cst_44 = arith.constant 0.000000e+00 : f32
    %140 = vector.shape_cast %139 : vector<8x1xi1> to vector<8x1xi1>
    %141 = vector.broadcast %140 : vector<8x1xi1> to vector<8x128xi1>
    %142 = vector.broadcast %cst_44 : f32 to vector<8x128xf32>
    %143 = arith.select %141, %137, %142 : vector<8x128xi1>, vector<8x128xf32>
    %144 = arith.index_cast %c2_i32 : i32 to index
    %c0_45 = arith.constant 0 : index
    %c0_46 = arith.constant 0 : index
    %145 = vector.load %arg10[%144, %c0_45, %c0_46] : memref<8x8x128xf32, #tpu.memory_space<vmem>>, vector<1x8x128xf32>
    %146 = vector.shape_cast %145 : vector<1x8x128xf32> to vector<8x128xf32>
    %147 = vector.shape_cast %143 : vector<8x128xf32> to vector<1x8x128xf32>
    tpu.vector_store %arg10[%144, %c0_45, %c0_46], %147 {strides = array<i32>} : memref<8x8x128xf32, #tpu.memory_space<vmem>>, vector<1x8x128xf32>,
    %148 = vector.shape_cast %139 : vector<8x1xi1> to vector<8x1xi1>
    %149 = vector.broadcast %148 : vector<8x1xi1> to vector<8x128xi1>
    %150 = arith.select %149, %137, %106 : vector<8x128xi1>, vector<8x128xf32>
    %c3_i32 = arith.constant 3 : i32
    %151 = arith.index_cast %c3_i32 : i32 to index
    %c0_47 = arith.constant 0 : index
    %c0_48 = arith.constant 0 : index
    %152 = vector.load %arg11[%151, %c0_47, %c0_48] : memref<8x8x384xf32, #tpu.memory_space<vmem>>, vector<1x8x384xf32>
    %153 = vector.shape_cast %152 : vector<1x8x384xf32> to vector<8x384xf32>
    %cst_49 = arith.constant dense<0.000000e+00> : vector<8x384xf32>
    %154 = tpu.matmul %150, %13, %cst_49 {dimension_numbers = #tpu.dot_dimension_numbers<[1], [0], [0], [1], [0, 0, 1, 1], [], []>} : vector<8x128xf32>, vector<128x384xf32>, vector<8x384xf32> -> vector<8x384xf32>
    %155 = vector.extract_strided_slice %153 {offsets = [0, 0], sizes = [8, 128], strides = [1, 1]} : vector<8x384xf32> to vector<8x128xf32>
    %156 = vector.extract_strided_slice %154 {offsets = [0, 0], sizes = [8, 128], strides = [1, 1]} : vector<8x384xf32> to vector<8x128xf32>
    %157 = arith.addf %155, %156 : vector<8x128xf32>
    %158 = arith.negf %157 : vector<8x128xf32>
    %159 = math.exp %158 : vector<8x128xf32>
    %cst_50 = arith.constant 1.000000e+00 : f32
    %160 = vector.broadcast %cst_50 : f32 to vector<8x128xf32>
    %161 = arith.addf %160, %159 : vector<8x128xf32>
    %162 = arith.divf %160, %161 : vector<8x128xf32>
    %163 = vector.extract_strided_slice %153 {offsets = [0, 128], sizes = [8, 128], strides = [1, 1]} : vector<8x384xf32> to vector<8x128xf32>
    %164 = vector.extract_strided_slice %154 {offsets = [0, 128], sizes = [8, 128], strides = [1, 1]} : vector<8x384xf32> to vector<8x128xf32>
    %165 = arith.addf %163, %164 : vector<8x128xf32>
    %166 = arith.negf %165 : vector<8x128xf32>
    %167 = math.exp %166 : vector<8x128xf32>
    %cst_51 = arith.constant 1.000000e+00 : f32
    %168 = vector.broadcast %cst_51 : f32 to vector<8x128xf32>
    %169 = arith.addf %168, %167 : vector<8x128xf32>
    %170 = arith.divf %168, %169 : vector<8x128xf32>
    %171 = vector.extract_strided_slice %153 {offsets = [0, 256], sizes = [8, 128], strides = [1, 1]} : vector<8x384xf32> to vector<8x128xf32>
    %172 = vector.extract_strided_slice %154 {offsets = [0, 256], sizes = [8, 128], strides = [1, 1]} : vector<8x384xf32> to vector<8x128xf32>
    %173 = arith.addf %172, %17 : vector<8x128xf32>
    %174 = arith.mulf %162, %173 : vector<8x128xf32>
    %175 = arith.addf %171, %174 : vector<8x128xf32>
    %176 = math.tanh %175 : vector<8x128xf32>
    %cst_52 = arith.constant 1.000000e+00 : f32
    %177 = vector.broadcast %cst_52 : f32 to vector<8x128xf32>
    %178 = arith.subf %177, %170 : vector<8x128xf32>
    %179 = arith.mulf %178, %176 : vector<8x128xf32>
    %180 = arith.mulf %170, %150 : vector<8x128xf32>
    %181 = arith.addf %179, %180 : vector<8x128xf32>
    %182 = vector.broadcast %c3_i32 : i32 to vector<8x1xi32>
    %183 = arith.cmpi sgt, %0, %182 : vector<8x1xi32>
    %cst_53 = arith.constant 0.000000e+00 : f32
    %184 = vector.shape_cast %183 : vector<8x1xi1> to vector<8x1xi1>
    %185 = vector.broadcast %184 : vector<8x1xi1> to vector<8x128xi1>
    %186 = vector.broadcast %cst_53 : f32 to vector<8x128xf32>
    %187 = arith.select %185, %181, %186 : vector<8x128xi1>, vector<8x128xf32>
    %188 = arith.index_cast %c3_i32 : i32 to index
    %c0_54 = arith.constant 0 : index
    %c0_55 = arith.constant 0 : index
    %189 = vector.load %arg10[%188, %c0_54, %c0_55] : memref<8x8x128xf32, #tpu.memory_space<vmem>>, vector<1x8x128xf32>
    %190 = vector.shape_cast %189 : vector<1x8x128xf32> to vector<8x128xf32>
    %191 = vector.shape_cast %187 : vector<8x128xf32> to vector<1x8x128xf32>
    tpu.vector_store %arg10[%188, %c0_54, %c0_55], %191 {strides = array<i32>} : memref<8x8x128xf32, #tpu.memory_space<vmem>>, vector<1x8x128xf32>,
    %192 = vector.shape_cast %183 : vector<8x1xi1> to vector<8x1xi1>
    %193 = vector.broadcast %192 : vector<8x1xi1> to vector<8x128xi1>
    %194 = arith.select %193, %181, %150 : vector<8x128xi1>, vector<8x128xf32>
    %c4_i32 = arith.constant 4 : i32
    %195 = arith.index_cast %c4_i32 : i32 to index
    %c0_56 = arith.constant 0 : index
    %c0_57 = arith.constant 0 : index
    %196 = vector.load %arg11[%195, %c0_56, %c0_57] : memref<8x8x384xf32, #tpu.memory_space<vmem>>, vector<1x8x384xf32>
    %197 = vector.shape_cast %196 : vector<1x8x384xf32> to vector<8x384xf32>
    %cst_58 = arith.constant dense<0.000000e+00> : vector<8x384xf32>
    %198 = tpu.matmul %194, %13, %cst_58 {dimension_numbers = #tpu.dot_dimension_numbers<[1], [0], [0], [1], [0, 0, 1, 1], [], []>} : vector<8x128xf32>, vector<128x384xf32>, vector<8x384xf32> -> vector<8x384xf32>
    %199 = vector.extract_strided_slice %197 {offsets = [0, 0], sizes = [8, 128], strides = [1, 1]} : vector<8x384xf32> to vector<8x128xf32>
    %200 = vector.extract_strided_slice %198 {offsets = [0, 0], sizes = [8, 128], strides = [1, 1]} : vector<8x384xf32> to vector<8x128xf32>
    %201 = arith.addf %199, %200 : vector<8x128xf32>
    %202 = arith.negf %201 : vector<8x128xf32>
    %203 = math.exp %202 : vector<8x128xf32>
    %cst_59 = arith.constant 1.000000e+00 : f32
    %204 = vector.broadcast %cst_59 : f32 to vector<8x128xf32>
    %205 = arith.addf %204, %203 : vector<8x128xf32>
    %206 = arith.divf %204, %205 : vector<8x128xf32>
    %207 = vector.extract_strided_slice %197 {offsets = [0, 128], sizes = [8, 128], strides = [1, 1]} : vector<8x384xf32> to vector<8x128xf32>
    %208 = vector.extract_strided_slice %198 {offsets = [0, 128], sizes = [8, 128], strides = [1, 1]} : vector<8x384xf32> to vector<8x128xf32>
    %209 = arith.addf %207, %208 : vector<8x128xf32>
    %210 = arith.negf %209 : vector<8x128xf32>
    %211 = math.exp %210 : vector<8x128xf32>
    %cst_60 = arith.constant 1.000000e+00 : f32
    %212 = vector.broadcast %cst_60 : f32 to vector<8x128xf32>
    %213 = arith.addf %212, %211 : vector<8x128xf32>
    %214 = arith.divf %212, %213 : vector<8x128xf32>
    %215 = vector.extract_strided_slice %197 {offsets = [0, 256], sizes = [8, 128], strides = [1, 1]} : vector<8x384xf32> to vector<8x128xf32>
    %216 = vector.extract_strided_slice %198 {offsets = [0, 256], sizes = [8, 128], strides = [1, 1]} : vector<8x384xf32> to vector<8x128xf32>
    %217 = arith.addf %216, %17 : vector<8x128xf32>
    %218 = arith.mulf %206, %217 : vector<8x128xf32>
    %219 = arith.addf %215, %218 : vector<8x128xf32>
    %220 = math.tanh %219 : vector<8x128xf32>
    %cst_61 = arith.constant 1.000000e+00 : f32
    %221 = vector.broadcast %cst_61 : f32 to vector<8x128xf32>
    %222 = arith.subf %221, %214 : vector<8x128xf32>
    %223 = arith.mulf %222, %220 : vector<8x128xf32>
    %224 = arith.mulf %214, %194 : vector<8x128xf32>
    %225 = arith.addf %223, %224 : vector<8x128xf32>
    %226 = vector.broadcast %c4_i32 : i32 to vector<8x1xi32>
    %227 = arith.cmpi sgt, %0, %226 : vector<8x1xi32>
    %cst_62 = arith.constant 0.000000e+00 : f32
    %228 = vector.shape_cast %227 : vector<8x1xi1> to vector<8x1xi1>
    %229 = vector.broadcast %228 : vector<8x1xi1> to vector<8x128xi1>
    %230 = vector.broadcast %cst_62 : f32 to vector<8x128xf32>
    %231 = arith.select %229, %225, %230 : vector<8x128xi1>, vector<8x128xf32>
    %232 = arith.index_cast %c4_i32 : i32 to index
    %c0_63 = arith.constant 0 : index
    %c0_64 = arith.constant 0 : index
    %233 = vector.load %arg10[%232, %c0_63, %c0_64] : memref<8x8x128xf32, #tpu.memory_space<vmem>>, vector<1x8x128xf32>
    %234 = vector.shape_cast %233 : vector<1x8x128xf32> to vector<8x128xf32>
    %235 = vector.shape_cast %231 : vector<8x128xf32> to vector<1x8x128xf32>
    tpu.vector_store %arg10[%232, %c0_63, %c0_64], %235 {strides = array<i32>} : memref<8x8x128xf32, #tpu.memory_space<vmem>>, vector<1x8x128xf32>,
    %236 = vector.shape_cast %227 : vector<8x1xi1> to vector<8x1xi1>
    %237 = vector.broadcast %236 : vector<8x1xi1> to vector<8x128xi1>
    %238 = arith.select %237, %225, %194 : vector<8x128xi1>, vector<8x128xf32>
    %c5_i32 = arith.constant 5 : i32
    %239 = arith.index_cast %c5_i32 : i32 to index
    %c0_65 = arith.constant 0 : index
    %c0_66 = arith.constant 0 : index
    %240 = vector.load %arg11[%239, %c0_65, %c0_66] : memref<8x8x384xf32, #tpu.memory_space<vmem>>, vector<1x8x384xf32>
    %241 = vector.shape_cast %240 : vector<1x8x384xf32> to vector<8x384xf32>
    %cst_67 = arith.constant dense<0.000000e+00> : vector<8x384xf32>
    %242 = tpu.matmul %238, %13, %cst_67 {dimension_numbers = #tpu.dot_dimension_numbers<[1], [0], [0], [1], [0, 0, 1, 1], [], []>} : vector<8x128xf32>, vector<128x384xf32>, vector<8x384xf32> -> vector<8x384xf32>
    %243 = vector.extract_strided_slice %241 {offsets = [0, 0], sizes = [8, 128], strides = [1, 1]} : vector<8x384xf32> to vector<8x128xf32>
    %244 = vector.extract_strided_slice %242 {offsets = [0, 0], sizes = [8, 128], strides = [1, 1]} : vector<8x384xf32> to vector<8x128xf32>
    %245 = arith.addf %243, %244 : vector<8x128xf32>
    %246 = arith.negf %245 : vector<8x128xf32>
    %247 = math.exp %246 : vector<8x128xf32>
    %cst_68 = arith.constant 1.000000e+00 : f32
    %248 = vector.broadcast %cst_68 : f32 to vector<8x128xf32>
    %249 = arith.addf %248, %247 : vector<8x128xf32>
    %250 = arith.divf %248, %249 : vector<8x128xf32>
    %251 = vector.extract_strided_slice %241 {offsets = [0, 128], sizes = [8, 128], strides = [1, 1]} : vector<8x384xf32> to vector<8x128xf32>
    %252 = vector.extract_strided_slice %242 {offsets = [0, 128], sizes = [8, 128], strides = [1, 1]} : vector<8x384xf32> to vector<8x128xf32>
    %253 = arith.addf %251, %252 : vector<8x128xf32>
    %254 = arith.negf %253 : vector<8x128xf32>
    %255 = math.exp %254 : vector<8x128xf32>
    %cst_69 = arith.constant 1.000000e+00 : f32
    %256 = vector.broadcast %cst_69 : f32 to vector<8x128xf32>
    %257 = arith.addf %256, %255 : vector<8x128xf32>
    %258 = arith.divf %256, %257 : vector<8x128xf32>
    %259 = vector.extract_strided_slice %241 {offsets = [0, 256], sizes = [8, 128], strides = [1, 1]} : vector<8x384xf32> to vector<8x128xf32>
    %260 = vector.extract_strided_slice %242 {offsets = [0, 256], sizes = [8, 128], strides = [1, 1]} : vector<8x384xf32> to vector<8x128xf32>
    %261 = arith.addf %260, %17 : vector<8x128xf32>
    %262 = arith.mulf %250, %261 : vector<8x128xf32>
    %263 = arith.addf %259, %262 : vector<8x128xf32>
    %264 = math.tanh %263 : vector<8x128xf32>
    %cst_70 = arith.constant 1.000000e+00 : f32
    %265 = vector.broadcast %cst_70 : f32 to vector<8x128xf32>
    %266 = arith.subf %265, %258 : vector<8x128xf32>
    %267 = arith.mulf %266, %264 : vector<8x128xf32>
    %268 = arith.mulf %258, %238 : vector<8x128xf32>
    %269 = arith.addf %267, %268 : vector<8x128xf32>
    %270 = vector.broadcast %c5_i32 : i32 to vector<8x1xi32>
    %271 = arith.cmpi sgt, %0, %270 : vector<8x1xi32>
    %cst_71 = arith.constant 0.000000e+00 : f32
    %272 = vector.shape_cast %271 : vector<8x1xi1> to vector<8x1xi1>
    %273 = vector.broadcast %272 : vector<8x1xi1> to vector<8x128xi1>
    %274 = vector.broadcast %cst_71 : f32 to vector<8x128xf32>
    %275 = arith.select %273, %269, %274 : vector<8x128xi1>, vector<8x128xf32>
    %276 = arith.index_cast %c5_i32 : i32 to index
    %c0_72 = arith.constant 0 : index
    %c0_73 = arith.constant 0 : index
    %277 = vector.load %arg10[%276, %c0_72, %c0_73] : memref<8x8x128xf32, #tpu.memory_space<vmem>>, vector<1x8x128xf32>
    %278 = vector.shape_cast %277 : vector<1x8x128xf32> to vector<8x128xf32>
    %279 = vector.shape_cast %275 : vector<8x128xf32> to vector<1x8x128xf32>
    tpu.vector_store %arg10[%276, %c0_72, %c0_73], %279 {strides = array<i32>} : memref<8x8x128xf32, #tpu.memory_space<vmem>>, vector<1x8x128xf32>,
    %280 = vector.shape_cast %271 : vector<8x1xi1> to vector<8x1xi1>
    %281 = vector.broadcast %280 : vector<8x1xi1> to vector<8x128xi1>
    %282 = arith.select %281, %269, %238 : vector<8x128xi1>, vector<8x128xf32>
    %c6_i32 = arith.constant 6 : i32
    %283 = arith.index_cast %c6_i32 : i32 to index
    %c0_74 = arith.constant 0 : index
    %c0_75 = arith.constant 0 : index
    %284 = vector.load %arg11[%283, %c0_74, %c0_75] : memref<8x8x384xf32, #tpu.memory_space<vmem>>, vector<1x8x384xf32>
    %285 = vector.shape_cast %284 : vector<1x8x384xf32> to vector<8x384xf32>
    %cst_76 = arith.constant dense<0.000000e+00> : vector<8x384xf32>
    %286 = tpu.matmul %282, %13, %cst_76 {dimension_numbers = #tpu.dot_dimension_numbers<[1], [0], [0], [1], [0, 0, 1, 1], [], []>} : vector<8x128xf32>, vector<128x384xf32>, vector<8x384xf32> -> vector<8x384xf32>
    %287 = vector.extract_strided_slice %285 {offsets = [0, 0], sizes = [8, 128], strides = [1, 1]} : vector<8x384xf32> to vector<8x128xf32>
    %288 = vector.extract_strided_slice %286 {offsets = [0, 0], sizes = [8, 128], strides = [1, 1]} : vector<8x384xf32> to vector<8x128xf32>
    %289 = arith.addf %287, %288 : vector<8x128xf32>
    %290 = arith.negf %289 : vector<8x128xf32>
    %291 = math.exp %290 : vector<8x128xf32>
    %cst_77 = arith.constant 1.000000e+00 : f32
    %292 = vector.broadcast %cst_77 : f32 to vector<8x128xf32>
    %293 = arith.addf %292, %291 : vector<8x128xf32>
    %294 = arith.divf %292, %293 : vector<8x128xf32>
    %295 = vector.extract_strided_slice %285 {offsets = [0, 128], sizes = [8, 128], strides = [1, 1]} : vector<8x384xf32> to vector<8x128xf32>
    %296 = vector.extract_strided_slice %286 {offsets = [0, 128], sizes = [8, 128], strides = [1, 1]} : vector<8x384xf32> to vector<8x128xf32>
    %297 = arith.addf %295, %296 : vector<8x128xf32>
    %298 = arith.negf %297 : vector<8x128xf32>
    %299 = math.exp %298 : vector<8x128xf32>
    %cst_78 = arith.constant 1.000000e+00 : f32
    %300 = vector.broadcast %cst_78 : f32 to vector<8x128xf32>
    %301 = arith.addf %300, %299 : vector<8x128xf32>
    %302 = arith.divf %300, %301 : vector<8x128xf32>
    %303 = vector.extract_strided_slice %285 {offsets = [0, 256], sizes = [8, 128], strides = [1, 1]} : vector<8x384xf32> to vector<8x128xf32>
    %304 = vector.extract_strided_slice %286 {offsets = [0, 256], sizes = [8, 128], strides = [1, 1]} : vector<8x384xf32> to vector<8x128xf32>
    %305 = arith.addf %304, %17 : vector<8x128xf32>
    %306 = arith.mulf %294, %305 : vector<8x128xf32>
    %307 = arith.addf %303, %306 : vector<8x128xf32>
    %308 = math.tanh %307 : vector<8x128xf32>
    %cst_79 = arith.constant 1.000000e+00 : f32
    %309 = vector.broadcast %cst_79 : f32 to vector<8x128xf32>
    %310 = arith.subf %309, %302 : vector<8x128xf32>
    %311 = arith.mulf %310, %308 : vector<8x128xf32>
    %312 = arith.mulf %302, %282 : vector<8x128xf32>
    %313 = arith.addf %311, %312 : vector<8x128xf32>
    %314 = vector.broadcast %c6_i32 : i32 to vector<8x1xi32>
    %315 = arith.cmpi sgt, %0, %314 : vector<8x1xi32>
    %cst_80 = arith.constant 0.000000e+00 : f32
    %316 = vector.shape_cast %315 : vector<8x1xi1> to vector<8x1xi1>
    %317 = vector.broadcast %316 : vector<8x1xi1> to vector<8x128xi1>
    %318 = vector.broadcast %cst_80 : f32 to vector<8x128xf32>
    %319 = arith.select %317, %313, %318 : vector<8x128xi1>, vector<8x128xf32>
    %320 = arith.index_cast %c6_i32 : i32 to index
    %c0_81 = arith.constant 0 : index
    %c0_82 = arith.constant 0 : index
    %321 = vector.load %arg10[%320, %c0_81, %c0_82] : memref<8x8x128xf32, #tpu.memory_space<vmem>>, vector<1x8x128xf32>
    %322 = vector.shape_cast %321 : vector<1x8x128xf32> to vector<8x128xf32>
    %323 = vector.shape_cast %319 : vector<8x128xf32> to vector<1x8x128xf32>
    tpu.vector_store %arg10[%320, %c0_81, %c0_82], %323 {strides = array<i32>} : memref<8x8x128xf32, #tpu.memory_space<vmem>>, vector<1x8x128xf32>,
    %324 = vector.shape_cast %315 : vector<8x1xi1> to vector<8x1xi1>
    %325 = vector.broadcast %324 : vector<8x1xi1> to vector<8x128xi1>
    %326 = arith.select %325, %313, %282 : vector<8x128xi1>, vector<8x128xf32>
    %c7_i32 = arith.constant 7 : i32
    %327 = arith.index_cast %c7_i32 : i32 to index
    %c0_83 = arith.constant 0 : index
    %c0_84 = arith.constant 0 : index
    %328 = vector.load %arg11[%327, %c0_83, %c0_84] : memref<8x8x384xf32, #tpu.memory_space<vmem>>, vector<1x8x384xf32>
    %329 = vector.shape_cast %328 : vector<1x8x384xf32> to vector<8x384xf32>
    %cst_85 = arith.constant dense<0.000000e+00> : vector<8x384xf32>
    %330 = tpu.matmul %326, %13, %cst_85 {dimension_numbers = #tpu.dot_dimension_numbers<[1], [0], [0], [1], [0, 0, 1, 1], [], []>} : vector<8x128xf32>, vector<128x384xf32>, vector<8x384xf32> -> vector<8x384xf32>
    %331 = vector.extract_strided_slice %329 {offsets = [0, 0], sizes = [8, 128], strides = [1, 1]} : vector<8x384xf32> to vector<8x128xf32>
    %332 = vector.extract_strided_slice %330 {offsets = [0, 0], sizes = [8, 128], strides = [1, 1]} : vector<8x384xf32> to vector<8x128xf32>
    %333 = arith.addf %331, %332 : vector<8x128xf32>
    %334 = arith.negf %333 : vector<8x128xf32>
    %335 = math.exp %334 : vector<8x128xf32>
    %cst_86 = arith.constant 1.000000e+00 : f32
    %336 = vector.broadcast %cst_86 : f32 to vector<8x128xf32>
    %337 = arith.addf %336, %335 : vector<8x128xf32>
    %338 = arith.divf %336, %337 : vector<8x128xf32>
    %339 = vector.extract_strided_slice %329 {offsets = [0, 128], sizes = [8, 128], strides = [1, 1]} : vector<8x384xf32> to vector<8x128xf32>
    %340 = vector.extract_strided_slice %330 {offsets = [0, 128], sizes = [8, 128], strides = [1, 1]} : vector<8x384xf32> to vector<8x128xf32>
    %341 = arith.addf %339, %340 : vector<8x128xf32>
    %342 = arith.negf %341 : vector<8x128xf32>
    %343 = math.exp %342 : vector<8x128xf32>
    %cst_87 = arith.constant 1.000000e+00 : f32
    %344 = vector.broadcast %cst_87 : f32 to vector<8x128xf32>
    %345 = arith.addf %344, %343 : vector<8x128xf32>
    %346 = arith.divf %344, %345 : vector<8x128xf32>
    %347 = vector.extract_strided_slice %329 {offsets = [0, 256], sizes = [8, 128], strides = [1, 1]} : vector<8x384xf32> to vector<8x128xf32>
    %348 = vector.extract_strided_slice %330 {offsets = [0, 256], sizes = [8, 128], strides = [1, 1]} : vector<8x384xf32> to vector<8x128xf32>
    %349 = arith.addf %348, %17 : vector<8x128xf32>
    %350 = arith.mulf %338, %349 : vector<8x128xf32>
    %351 = arith.addf %347, %350 : vector<8x128xf32>
    %352 = math.tanh %351 : vector<8x128xf32>
    %cst_88 = arith.constant 1.000000e+00 : f32
    %353 = vector.broadcast %cst_88 : f32 to vector<8x128xf32>
    %354 = arith.subf %353, %346 : vector<8x128xf32>
    %355 = arith.mulf %354, %352 : vector<8x128xf32>
    %356 = arith.mulf %346, %326 : vector<8x128xf32>
    %357 = arith.addf %355, %356 : vector<8x128xf32>
    %358 = vector.broadcast %c7_i32 : i32 to vector<8x1xi32>
    %359 = arith.cmpi sgt, %0, %358 : vector<8x1xi32>
    %cst_89 = arith.constant 0.000000e+00 : f32
    %360 = vector.shape_cast %359 : vector<8x1xi1> to vector<8x1xi1>
    %361 = vector.broadcast %360 : vector<8x1xi1> to vector<8x128xi1>
    %362 = vector.broadcast %cst_89 : f32 to vector<8x128xf32>
    %363 = arith.select %361, %357, %362 : vector<8x128xi1>, vector<8x128xf32>
    %364 = arith.index_cast %c7_i32 : i32 to index
    %c0_90 = arith.constant 0 : index
    %c0_91 = arith.constant 0 : index
    %365 = vector.load %arg10[%364, %c0_90, %c0_91] : memref<8x8x128xf32, #tpu.memory_space<vmem>>, vector<1x8x128xf32>
    %366 = vector.shape_cast %365 : vector<1x8x128xf32> to vector<8x128xf32>
    %367 = vector.shape_cast %363 : vector<8x128xf32> to vector<1x8x128xf32>
    tpu.vector_store %arg10[%364, %c0_90, %c0_91], %367 {strides = array<i32>} : memref<8x8x128xf32, #tpu.memory_space<vmem>>, vector<1x8x128xf32>,
    %368 = vector.shape_cast %359 : vector<8x1xi1> to vector<8x1xi1>
    %369 = vector.broadcast %368 : vector<8x1xi1> to vector<8x128xi1>
    %370 = arith.select %369, %357, %326 : vector<8x128xi1>, vector<8x128xf32>
    %c8_i32 = arith.constant 8 : i32
    %c0_92 = arith.constant 0 : index
    %c0_93 = arith.constant 0 : index
    %c0_94 = arith.constant 0 : index
    %371 = vector.load %arg10[%c0_92, %c0_93, %c0_94] : memref<8x8x128xf32, #tpu.memory_space<vmem>>, vector<8x8x128xf32>
    %372 = vector.shape_cast %371 : vector<8x8x128xf32> to vector<64x128xf32>
    %c1 = arith.constant 1 : index
    %c0_95 = arith.constant 0 : index
    %c0_96 = arith.constant 0 : index
    %373 = vector.load %arg3[%c1, %c0_95, %c0_96] : memref<2x128x384xf32, #tpu.memory_space<vmem>>, vector<1x128x384xf32>
    %374 = vector.shape_cast %373 : vector<1x128x384xf32> to vector<128x384xf32>
    %cst_97 = arith.constant dense<0.000000e+00> : vector<64x384xf32>
    %375 = tpu.matmul %372, %374, %cst_97 {dimension_numbers = #tpu.dot_dimension_numbers<[1], [0], [0], [1], [0, 0, 1, 1], [], []>} : vector<64x128xf32>, vector<128x384xf32>, vector<64x384xf32> -> vector<64x384xf32>
    %c1_98 = arith.constant 1 : index
    %c0_99 = arith.constant 0 : index
    %c0_100 = arith.constant 0 : index
    %376 = vector.load %arg5[%c1_98, %c0_99, %c0_100] : memref<2x1x384xf32, #tpu.memory_space<vmem>>, vector<1x1x384xf32>
    %377 = vector.shape_cast %376 : vector<1x1x384xf32> to vector<1x384xf32>
    %378 = vector.broadcast %377 : vector<1x384xf32> to vector<64x384xf32>
    %379 = arith.addf %375, %378 : vector<64x384xf32>
    %380 = vector.shape_cast %379 : vector<64x384xf32> to vector<8x8x384xf32>
    %c0_101 = arith.constant 0 : index
    %c0_102 = arith.constant 0 : index
    %c0_103 = arith.constant 0 : index
    %381 = vector.load %arg11[%c0_101, %c0_102, %c0_103] : memref<8x8x384xf32, #tpu.memory_space<vmem>>, vector<8x8x384xf32>
    tpu.vector_store %arg11[%c0_101, %c0_102, %c0_103], %380 {strides = array<i32>} : memref<8x8x384xf32, #tpu.memory_space<vmem>>, vector<8x8x384xf32>,
    %c1_104 = arith.constant 1 : index
    %c0_105 = arith.constant 0 : index
    %c0_106 = arith.constant 0 : index
    %382 = vector.load %arg4[%c1_104, %c0_105, %c0_106] : memref<2x128x384xf32, #tpu.memory_space<vmem>>, vector<1x128x384xf32>
    %383 = vector.shape_cast %382 : vector<1x128x384xf32> to vector<128x384xf32>
    %c1_107 = arith.constant 1 : index
    %c0_108 = arith.constant 0 : index
    %c0_109 = arith.constant 0 : index
    %384 = vector.load %arg6[%c1_107, %c0_108, %c0_109] : memref<2x1x128xf32, #tpu.memory_space<vmem>>, vector<1x1x128xf32>
    %385 = vector.shape_cast %384 : vector<1x1x128xf32> to vector<1x128xf32>
    %386 = vector.shape_cast %385 : vector<1x128xf32> to vector<1x128xf32>
    %387 = vector.broadcast %386 : vector<1x128xf32> to vector<8x128xf32>
    %cst_110 = arith.constant 0.000000e+00 : f32
    %388 = vector.broadcast %cst_110 : f32 to vector<8x128xf32>
    %c0_i32_111 = arith.constant 0 : i32
    %389 = arith.index_cast %c0_i32_111 : i32 to index
    %c0_112 = arith.constant 0 : index
    %c0_113 = arith.constant 0 : index
    %390 = vector.load %arg11[%389, %c0_112, %c0_113] : memref<8x8x384xf32, #tpu.memory_space<vmem>>, vector<1x8x384xf32>
    %391 = vector.shape_cast %390 : vector<1x8x384xf32> to vector<8x384xf32>
    %cst_114 = arith.constant dense<0.000000e+00> : vector<8x384xf32>
    %392 = tpu.matmul %388, %383, %cst_114 {dimension_numbers = #tpu.dot_dimension_numbers<[1], [0], [0], [1], [0, 0, 1, 1], [], []>} : vector<8x128xf32>, vector<128x384xf32>, vector<8x384xf32> -> vector<8x384xf32>
    %393 = vector.extract_strided_slice %391 {offsets = [0, 0], sizes = [8, 128], strides = [1, 1]} : vector<8x384xf32> to vector<8x128xf32>
    %394 = vector.extract_strided_slice %392 {offsets = [0, 0], sizes = [8, 128], strides = [1, 1]} : vector<8x384xf32> to vector<8x128xf32>
    %395 = arith.addf %393, %394 : vector<8x128xf32>
    %396 = arith.negf %395 : vector<8x128xf32>
    %397 = math.exp %396 : vector<8x128xf32>
    %cst_115 = arith.constant 1.000000e+00 : f32
    %398 = vector.broadcast %cst_115 : f32 to vector<8x128xf32>
    %399 = arith.addf %398, %397 : vector<8x128xf32>
    %400 = arith.divf %398, %399 : vector<8x128xf32>
    %401 = vector.extract_strided_slice %391 {offsets = [0, 128], sizes = [8, 128], strides = [1, 1]} : vector<8x384xf32> to vector<8x128xf32>
    %402 = vector.extract_strided_slice %392 {offsets = [0, 128], sizes = [8, 128], strides = [1, 1]} : vector<8x384xf32> to vector<8x128xf32>
    %403 = arith.addf %401, %402 : vector<8x128xf32>
    %404 = arith.negf %403 : vector<8x128xf32>
    %405 = math.exp %404 : vector<8x128xf32>
    %cst_116 = arith.constant 1.000000e+00 : f32
    %406 = vector.broadcast %cst_116 : f32 to vector<8x128xf32>
    %407 = arith.addf %406, %405 : vector<8x128xf32>
    %408 = arith.divf %406, %407 : vector<8x128xf32>
    %409 = vector.extract_strided_slice %391 {offsets = [0, 256], sizes = [8, 128], strides = [1, 1]} : vector<8x384xf32> to vector<8x128xf32>
    %410 = vector.extract_strided_slice %392 {offsets = [0, 256], sizes = [8, 128], strides = [1, 1]} : vector<8x384xf32> to vector<8x128xf32>
    %411 = arith.addf %410, %387 : vector<8x128xf32>
    %412 = arith.mulf %400, %411 : vector<8x128xf32>
    %413 = arith.addf %409, %412 : vector<8x128xf32>
    %414 = math.tanh %413 : vector<8x128xf32>
    %cst_117 = arith.constant 1.000000e+00 : f32
    %415 = vector.broadcast %cst_117 : f32 to vector<8x128xf32>
    %416 = arith.subf %415, %408 : vector<8x128xf32>
    %417 = arith.mulf %416, %414 : vector<8x128xf32>
    %418 = arith.mulf %408, %388 : vector<8x128xf32>
    %419 = arith.addf %417, %418 : vector<8x128xf32>
    %420 = vector.broadcast %c0_i32_111 : i32 to vector<8x1xi32>
    %421 = arith.cmpi sgt, %0, %420 : vector<8x1xi32>
    %cst_118 = arith.constant 0.000000e+00 : f32
    %422 = vector.shape_cast %421 : vector<8x1xi1> to vector<8x1xi1>
    %423 = vector.broadcast %422 : vector<8x1xi1> to vector<8x128xi1>
    %424 = vector.broadcast %cst_118 : f32 to vector<8x128xf32>
    %425 = arith.select %423, %419, %424 : vector<8x128xi1>, vector<8x128xf32>
    %426 = arith.index_cast %c0_i32_111 : i32 to index
    %c0_119 = arith.constant 0 : index
    %c0_120 = arith.constant 0 : index
    %427 = vector.load %arg9[%426, %c0_119, %c0_120] : memref<8x8x128xf32, #tpu.memory_space<vmem>>, vector<1x8x128xf32>
    %428 = vector.shape_cast %427 : vector<1x8x128xf32> to vector<8x128xf32>
    %429 = vector.shape_cast %425 : vector<8x128xf32> to vector<1x8x128xf32>
    tpu.vector_store %arg9[%426, %c0_119, %c0_120], %429 {strides = array<i32>} : memref<8x8x128xf32, #tpu.memory_space<vmem>>, vector<1x8x128xf32>,
    %430 = vector.shape_cast %421 : vector<8x1xi1> to vector<8x1xi1>
    %431 = vector.broadcast %430 : vector<8x1xi1> to vector<8x128xi1>
    %432 = arith.select %431, %419, %388 : vector<8x128xi1>, vector<8x128xf32>
    %c1_i32_121 = arith.constant 1 : i32
    %433 = arith.index_cast %c1_i32_121 : i32 to index
    %c0_122 = arith.constant 0 : index
    %c0_123 = arith.constant 0 : index
    %434 = vector.load %arg11[%433, %c0_122, %c0_123] : memref<8x8x384xf32, #tpu.memory_space<vmem>>, vector<1x8x384xf32>
    %435 = vector.shape_cast %434 : vector<1x8x384xf32> to vector<8x384xf32>
    %cst_124 = arith.constant dense<0.000000e+00> : vector<8x384xf32>
    %436 = tpu.matmul %432, %383, %cst_124 {dimension_numbers = #tpu.dot_dimension_numbers<[1], [0], [0], [1], [0, 0, 1, 1], [], []>} : vector<8x128xf32>, vector<128x384xf32>, vector<8x384xf32> -> vector<8x384xf32>
    %437 = vector.extract_strided_slice %435 {offsets = [0, 0], sizes = [8, 128], strides = [1, 1]} : vector<8x384xf32> to vector<8x128xf32>
    %438 = vector.extract_strided_slice %436 {offsets = [0, 0], sizes = [8, 128], strides = [1, 1]} : vector<8x384xf32> to vector<8x128xf32>
    %439 = arith.addf %437, %438 : vector<8x128xf32>
    %440 = arith.negf %439 : vector<8x128xf32>
    %441 = math.exp %440 : vector<8x128xf32>
    %cst_125 = arith.constant 1.000000e+00 : f32
    %442 = vector.broadcast %cst_125 : f32 to vector<8x128xf32>
    %443 = arith.addf %442, %441 : vector<8x128xf32>
    %444 = arith.divf %442, %443 : vector<8x128xf32>
    %445 = vector.extract_strided_slice %435 {offsets = [0, 128], sizes = [8, 128], strides = [1, 1]} : vector<8x384xf32> to vector<8x128xf32>
    %446 = vector.extract_strided_slice %436 {offsets = [0, 128], sizes = [8, 128], strides = [1, 1]} : vector<8x384xf32> to vector<8x128xf32>
    %447 = arith.addf %445, %446 : vector<8x128xf32>
    %448 = arith.negf %447 : vector<8x128xf32>
    %449 = math.exp %448 : vector<8x128xf32>
    %cst_126 = arith.constant 1.000000e+00 : f32
    %450 = vector.broadcast %cst_126 : f32 to vector<8x128xf32>
    %451 = arith.addf %450, %449 : vector<8x128xf32>
    %452 = arith.divf %450, %451 : vector<8x128xf32>
    %453 = vector.extract_strided_slice %435 {offsets = [0, 256], sizes = [8, 128], strides = [1, 1]} : vector<8x384xf32> to vector<8x128xf32>
    %454 = vector.extract_strided_slice %436 {offsets = [0, 256], sizes = [8, 128], strides = [1, 1]} : vector<8x384xf32> to vector<8x128xf32>
    %455 = arith.addf %454, %387 : vector<8x128xf32>
    %456 = arith.mulf %444, %455 : vector<8x128xf32>
    %457 = arith.addf %453, %456 : vector<8x128xf32>
    %458 = math.tanh %457 : vector<8x128xf32>
    %cst_127 = arith.constant 1.000000e+00 : f32
    %459 = vector.broadcast %cst_127 : f32 to vector<8x128xf32>
    %460 = arith.subf %459, %452 : vector<8x128xf32>
    %461 = arith.mulf %460, %458 : vector<8x128xf32>
    %462 = arith.mulf %452, %432 : vector<8x128xf32>
    %463 = arith.addf %461, %462 : vector<8x128xf32>
    %464 = vector.broadcast %c1_i32_121 : i32 to vector<8x1xi32>
    %465 = arith.cmpi sgt, %0, %464 : vector<8x1xi32>
    %cst_128 = arith.constant 0.000000e+00 : f32
    %466 = vector.shape_cast %465 : vector<8x1xi1> to vector<8x1xi1>
    %467 = vector.broadcast %466 : vector<8x1xi1> to vector<8x128xi1>
    %468 = vector.broadcast %cst_128 : f32 to vector<8x128xf32>
    %469 = arith.select %467, %463, %468 : vector<8x128xi1>, vector<8x128xf32>
    %470 = arith.index_cast %c1_i32_121 : i32 to index
    %c0_129 = arith.constant 0 : index
    %c0_130 = arith.constant 0 : index
    %471 = vector.load %arg9[%470, %c0_129, %c0_130] : memref<8x8x128xf32, #tpu.memory_space<vmem>>, vector<1x8x128xf32>
    %472 = vector.shape_cast %471 : vector<1x8x128xf32> to vector<8x128xf32>
    %473 = vector.shape_cast %469 : vector<8x128xf32> to vector<1x8x128xf32>
    tpu.vector_store %arg9[%470, %c0_129, %c0_130], %473 {strides = array<i32>} : memref<8x8x128xf32, #tpu.memory_space<vmem>>, vector<1x8x128xf32>,
    %474 = vector.shape_cast %465 : vector<8x1xi1> to vector<8x1xi1>
    %475 = vector.broadcast %474 : vector<8x1xi1> to vector<8x128xi1>
    %476 = arith.select %475, %463, %432 : vector<8x128xi1>, vector<8x128xf32>
    %c2_i32_131 = arith.constant 2 : i32
    %477 = arith.index_cast %c2_i32_131 : i32 to index
    %c0_132 = arith.constant 0 : index
    %c0_133 = arith.constant 0 : index
    %478 = vector.load %arg11[%477, %c0_132, %c0_133] : memref<8x8x384xf32, #tpu.memory_space<vmem>>, vector<1x8x384xf32>
    %479 = vector.shape_cast %478 : vector<1x8x384xf32> to vector<8x384xf32>
    %cst_134 = arith.constant dense<0.000000e+00> : vector<8x384xf32>
    %480 = tpu.matmul %476, %383, %cst_134 {dimension_numbers = #tpu.dot_dimension_numbers<[1], [0], [0], [1], [0, 0, 1, 1], [], []>} : vector<8x128xf32>, vector<128x384xf32>, vector<8x384xf32> -> vector<8x384xf32>
    %481 = vector.extract_strided_slice %479 {offsets = [0, 0], sizes = [8, 128], strides = [1, 1]} : vector<8x384xf32> to vector<8x128xf32>
    %482 = vector.extract_strided_slice %480 {offsets = [0, 0], sizes = [8, 128], strides = [1, 1]} : vector<8x384xf32> to vector<8x128xf32>
    %483 = arith.addf %481, %482 : vector<8x128xf32>
    %484 = arith.negf %483 : vector<8x128xf32>
    %485 = math.exp %484 : vector<8x128xf32>
    %cst_135 = arith.constant 1.000000e+00 : f32
    %486 = vector.broadcast %cst_135 : f32 to vector<8x128xf32>
    %487 = arith.addf %486, %485 : vector<8x128xf32>
    %488 = arith.divf %486, %487 : vector<8x128xf32>
    %489 = vector.extract_strided_slice %479 {offsets = [0, 128], sizes = [8, 128], strides = [1, 1]} : vector<8x384xf32> to vector<8x128xf32>
    %490 = vector.extract_strided_slice %480 {offsets = [0, 128], sizes = [8, 128], strides = [1, 1]} : vector<8x384xf32> to vector<8x128xf32>
    %491 = arith.addf %489, %490 : vector<8x128xf32>
    %492 = arith.negf %491 : vector<8x128xf32>
    %493 = math.exp %492 : vector<8x128xf32>
    %cst_136 = arith.constant 1.000000e+00 : f32
    %494 = vector.broadcast %cst_136 : f32 to vector<8x128xf32>
    %495 = arith.addf %494, %493 : vector<8x128xf32>
    %496 = arith.divf %494, %495 : vector<8x128xf32>
    %497 = vector.extract_strided_slice %479 {offsets = [0, 256], sizes = [8, 128], strides = [1, 1]} : vector<8x384xf32> to vector<8x128xf32>
    %498 = vector.extract_strided_slice %480 {offsets = [0, 256], sizes = [8, 128], strides = [1, 1]} : vector<8x384xf32> to vector<8x128xf32>
    %499 = arith.addf %498, %387 : vector<8x128xf32>
    %500 = arith.mulf %488, %499 : vector<8x128xf32>
    %501 = arith.addf %497, %500 : vector<8x128xf32>
    %502 = math.tanh %501 : vector<8x128xf32>
    %cst_137 = arith.constant 1.000000e+00 : f32
    %503 = vector.broadcast %cst_137 : f32 to vector<8x128xf32>
    %504 = arith.subf %503, %496 : vector<8x128xf32>
    %505 = arith.mulf %504, %502 : vector<8x128xf32>
    %506 = arith.mulf %496, %476 : vector<8x128xf32>
    %507 = arith.addf %505, %506 : vector<8x128xf32>
    %508 = vector.broadcast %c2_i32_131 : i32 to vector<8x1xi32>
    %509 = arith.cmpi sgt, %0, %508 : vector<8x1xi32>
    %cst_138 = arith.constant 0.000000e+00 : f32
    %510 = vector.shape_cast %509 : vector<8x1xi1> to vector<8x1xi1>
    %511 = vector.broadcast %510 : vector<8x1xi1> to vector<8x128xi1>
    %512 = vector.broadcast %cst_138 : f32 to vector<8x128xf32>
    %513 = arith.select %511, %507, %512 : vector<8x128xi1>, vector<8x128xf32>
    %514 = arith.index_cast %c2_i32_131 : i32 to index
    %c0_139 = arith.constant 0 : index
    %c0_140 = arith.constant 0 : index
    %515 = vector.load %arg9[%514, %c0_139, %c0_140] : memref<8x8x128xf32, #tpu.memory_space<vmem>>, vector<1x8x128xf32>
    %516 = vector.shape_cast %515 : vector<1x8x128xf32> to vector<8x128xf32>
    %517 = vector.shape_cast %513 : vector<8x128xf32> to vector<1x8x128xf32>
    tpu.vector_store %arg9[%514, %c0_139, %c0_140], %517 {strides = array<i32>} : memref<8x8x128xf32, #tpu.memory_space<vmem>>, vector<1x8x128xf32>,
    %518 = vector.shape_cast %509 : vector<8x1xi1> to vector<8x1xi1>
    %519 = vector.broadcast %518 : vector<8x1xi1> to vector<8x128xi1>
    %520 = arith.select %519, %507, %476 : vector<8x128xi1>, vector<8x128xf32>
    %c3_i32_141 = arith.constant 3 : i32
    %521 = arith.index_cast %c3_i32_141 : i32 to index
    %c0_142 = arith.constant 0 : index
    %c0_143 = arith.constant 0 : index
    %522 = vector.load %arg11[%521, %c0_142, %c0_143] : memref<8x8x384xf32, #tpu.memory_space<vmem>>, vector<1x8x384xf32>
    %523 = vector.shape_cast %522 : vector<1x8x384xf32> to vector<8x384xf32>
    %cst_144 = arith.constant dense<0.000000e+00> : vector<8x384xf32>
    %524 = tpu.matmul %520, %383, %cst_144 {dimension_numbers = #tpu.dot_dimension_numbers<[1], [0], [0], [1], [0, 0, 1, 1], [], []>} : vector<8x128xf32>, vector<128x384xf32>, vector<8x384xf32> -> vector<8x384xf32>
    %525 = vector.extract_strided_slice %523 {offsets = [0, 0], sizes = [8, 128], strides = [1, 1]} : vector<8x384xf32> to vector<8x128xf32>
    %526 = vector.extract_strided_slice %524 {offsets = [0, 0], sizes = [8, 128], strides = [1, 1]} : vector<8x384xf32> to vector<8x128xf32>
    %527 = arith.addf %525, %526 : vector<8x128xf32>
    %528 = arith.negf %527 : vector<8x128xf32>
    %529 = math.exp %528 : vector<8x128xf32>
    %cst_145 = arith.constant 1.000000e+00 : f32
    %530 = vector.broadcast %cst_145 : f32 to vector<8x128xf32>
    %531 = arith.addf %530, %529 : vector<8x128xf32>
    %532 = arith.divf %530, %531 : vector<8x128xf32>
    %533 = vector.extract_strided_slice %523 {offsets = [0, 128], sizes = [8, 128], strides = [1, 1]} : vector<8x384xf32> to vector<8x128xf32>
    %534 = vector.extract_strided_slice %524 {offsets = [0, 128], sizes = [8, 128], strides = [1, 1]} : vector<8x384xf32> to vector<8x128xf32>
    %535 = arith.addf %533, %534 : vector<8x128xf32>
    %536 = arith.negf %535 : vector<8x128xf32>
    %537 = math.exp %536 : vector<8x128xf32>
    %cst_146 = arith.constant 1.000000e+00 : f32
    %538 = vector.broadcast %cst_146 : f32 to vector<8x128xf32>
    %539 = arith.addf %538, %537 : vector<8x128xf32>
    %540 = arith.divf %538, %539 : vector<8x128xf32>
    %541 = vector.extract_strided_slice %523 {offsets = [0, 256], sizes = [8, 128], strides = [1, 1]} : vector<8x384xf32> to vector<8x128xf32>
    %542 = vector.extract_strided_slice %524 {offsets = [0, 256], sizes = [8, 128], strides = [1, 1]} : vector<8x384xf32> to vector<8x128xf32>
    %543 = arith.addf %542, %387 : vector<8x128xf32>
    %544 = arith.mulf %532, %543 : vector<8x128xf32>
    %545 = arith.addf %541, %544 : vector<8x128xf32>
    %546 = math.tanh %545 : vector<8x128xf32>
    %cst_147 = arith.constant 1.000000e+00 : f32
    %547 = vector.broadcast %cst_147 : f32 to vector<8x128xf32>
    %548 = arith.subf %547, %540 : vector<8x128xf32>
    %549 = arith.mulf %548, %546 : vector<8x128xf32>
    %550 = arith.mulf %540, %520 : vector<8x128xf32>
    %551 = arith.addf %549, %550 : vector<8x128xf32>
    %552 = vector.broadcast %c3_i32_141 : i32 to vector<8x1xi32>
    %553 = arith.cmpi sgt, %0, %552 : vector<8x1xi32>
    %cst_148 = arith.constant 0.000000e+00 : f32
    %554 = vector.shape_cast %553 : vector<8x1xi1> to vector<8x1xi1>
    %555 = vector.broadcast %554 : vector<8x1xi1> to vector<8x128xi1>
    %556 = vector.broadcast %cst_148 : f32 to vector<8x128xf32>
    %557 = arith.select %555, %551, %556 : vector<8x128xi1>, vector<8x128xf32>
    %558 = arith.index_cast %c3_i32_141 : i32 to index
    %c0_149 = arith.constant 0 : index
    %c0_150 = arith.constant 0 : index
    %559 = vector.load %arg9[%558, %c0_149, %c0_150] : memref<8x8x128xf32, #tpu.memory_space<vmem>>, vector<1x8x128xf32>
    %560 = vector.shape_cast %559 : vector<1x8x128xf32> to vector<8x128xf32>
    %561 = vector.shape_cast %557 : vector<8x128xf32> to vector<1x8x128xf32>
    tpu.vector_store %arg9[%558, %c0_149, %c0_150], %561 {strides = array<i32>} : memref<8x8x128xf32, #tpu.memory_space<vmem>>, vector<1x8x128xf32>,
    %562 = vector.shape_cast %553 : vector<8x1xi1> to vector<8x1xi1>
    %563 = vector.broadcast %562 : vector<8x1xi1> to vector<8x128xi1>
    %564 = arith.select %563, %551, %520 : vector<8x128xi1>, vector<8x128xf32>
    %c4_i32_151 = arith.constant 4 : i32
    %565 = arith.index_cast %c4_i32_151 : i32 to index
    %c0_152 = arith.constant 0 : index
    %c0_153 = arith.constant 0 : index
    %566 = vector.load %arg11[%565, %c0_152, %c0_153] : memref<8x8x384xf32, #tpu.memory_space<vmem>>, vector<1x8x384xf32>
    %567 = vector.shape_cast %566 : vector<1x8x384xf32> to vector<8x384xf32>
    %cst_154 = arith.constant dense<0.000000e+00> : vector<8x384xf32>
    %568 = tpu.matmul %564, %383, %cst_154 {dimension_numbers = #tpu.dot_dimension_numbers<[1], [0], [0], [1], [0, 0, 1, 1], [], []>} : vector<8x128xf32>, vector<128x384xf32>, vector<8x384xf32> -> vector<8x384xf32>
    %569 = vector.extract_strided_slice %567 {offsets = [0, 0], sizes = [8, 128], strides = [1, 1]} : vector<8x384xf32> to vector<8x128xf32>
    %570 = vector.extract_strided_slice %568 {offsets = [0, 0], sizes = [8, 128], strides = [1, 1]} : vector<8x384xf32> to vector<8x128xf32>
    %571 = arith.addf %569, %570 : vector<8x128xf32>
    %572 = arith.negf %571 : vector<8x128xf32>
    %573 = math.exp %572 : vector<8x128xf32>
    %cst_155 = arith.constant 1.000000e+00 : f32
    %574 = vector.broadcast %cst_155 : f32 to vector<8x128xf32>
    %575 = arith.addf %574, %573 : vector<8x128xf32>
    %576 = arith.divf %574, %575 : vector<8x128xf32>
    %577 = vector.extract_strided_slice %567 {offsets = [0, 128], sizes = [8, 128], strides = [1, 1]} : vector<8x384xf32> to vector<8x128xf32>
    %578 = vector.extract_strided_slice %568 {offsets = [0, 128], sizes = [8, 128], strides = [1, 1]} : vector<8x384xf32> to vector<8x128xf32>
    %579 = arith.addf %577, %578 : vector<8x128xf32>
    %580 = arith.negf %579 : vector<8x128xf32>
    %581 = math.exp %580 : vector<8x128xf32>
    %cst_156 = arith.constant 1.000000e+00 : f32
    %582 = vector.broadcast %cst_156 : f32 to vector<8x128xf32>
    %583 = arith.addf %582, %581 : vector<8x128xf32>
    %584 = arith.divf %582, %583 : vector<8x128xf32>
    %585 = vector.extract_strided_slice %567 {offsets = [0, 256], sizes = [8, 128], strides = [1, 1]} : vector<8x384xf32> to vector<8x128xf32>
    %586 = vector.extract_strided_slice %568 {offsets = [0, 256], sizes = [8, 128], strides = [1, 1]} : vector<8x384xf32> to vector<8x128xf32>
    %587 = arith.addf %586, %387 : vector<8x128xf32>
    %588 = arith.mulf %576, %587 : vector<8x128xf32>
    %589 = arith.addf %585, %588 : vector<8x128xf32>
    %590 = math.tanh %589 : vector<8x128xf32>
    %cst_157 = arith.constant 1.000000e+00 : f32
    %591 = vector.broadcast %cst_157 : f32 to vector<8x128xf32>
    %592 = arith.subf %591, %584 : vector<8x128xf32>
    %593 = arith.mulf %592, %590 : vector<8x128xf32>
    %594 = arith.mulf %584, %564 : vector<8x128xf32>
    %595 = arith.addf %593, %594 : vector<8x128xf32>
    %596 = vector.broadcast %c4_i32_151 : i32 to vector<8x1xi32>
    %597 = arith.cmpi sgt, %0, %596 : vector<8x1xi32>
    %cst_158 = arith.constant 0.000000e+00 : f32
    %598 = vector.shape_cast %597 : vector<8x1xi1> to vector<8x1xi1>
    %599 = vector.broadcast %598 : vector<8x1xi1> to vector<8x128xi1>
    %600 = vector.broadcast %cst_158 : f32 to vector<8x128xf32>
    %601 = arith.select %599, %595, %600 : vector<8x128xi1>, vector<8x128xf32>
    %602 = arith.index_cast %c4_i32_151 : i32 to index
    %c0_159 = arith.constant 0 : index
    %c0_160 = arith.constant 0 : index
    %603 = vector.load %arg9[%602, %c0_159, %c0_160] : memref<8x8x128xf32, #tpu.memory_space<vmem>>, vector<1x8x128xf32>
    %604 = vector.shape_cast %603 : vector<1x8x128xf32> to vector<8x128xf32>
    %605 = vector.shape_cast %601 : vector<8x128xf32> to vector<1x8x128xf32>
    tpu.vector_store %arg9[%602, %c0_159, %c0_160], %605 {strides = array<i32>} : memref<8x8x128xf32, #tpu.memory_space<vmem>>, vector<1x8x128xf32>,
    %606 = vector.shape_cast %597 : vector<8x1xi1> to vector<8x1xi1>
    %607 = vector.broadcast %606 : vector<8x1xi1> to vector<8x128xi1>
    %608 = arith.select %607, %595, %564 : vector<8x128xi1>, vector<8x128xf32>
    %c5_i32_161 = arith.constant 5 : i32
    %609 = arith.index_cast %c5_i32_161 : i32 to index
    %c0_162 = arith.constant 0 : index
    %c0_163 = arith.constant 0 : index
    %610 = vector.load %arg11[%609, %c0_162, %c0_163] : memref<8x8x384xf32, #tpu.memory_space<vmem>>, vector<1x8x384xf32>
    %611 = vector.shape_cast %610 : vector<1x8x384xf32> to vector<8x384xf32>
    %cst_164 = arith.constant dense<0.000000e+00> : vector<8x384xf32>
    %612 = tpu.matmul %608, %383, %cst_164 {dimension_numbers = #tpu.dot_dimension_numbers<[1], [0], [0], [1], [0, 0, 1, 1], [], []>} : vector<8x128xf32>, vector<128x384xf32>, vector<8x384xf32> -> vector<8x384xf32>
    %613 = vector.extract_strided_slice %611 {offsets = [0, 0], sizes = [8, 128], strides = [1, 1]} : vector<8x384xf32> to vector<8x128xf32>
    %614 = vector.extract_strided_slice %612 {offsets = [0, 0], sizes = [8, 128], strides = [1, 1]} : vector<8x384xf32> to vector<8x128xf32>
    %615 = arith.addf %613, %614 : vector<8x128xf32>
    %616 = arith.negf %615 : vector<8x128xf32>
    %617 = math.exp %616 : vector<8x128xf32>
    %cst_165 = arith.constant 1.000000e+00 : f32
    %618 = vector.broadcast %cst_165 : f32 to vector<8x128xf32>
    %619 = arith.addf %618, %617 : vector<8x128xf32>
    %620 = arith.divf %618, %619 : vector<8x128xf32>
    %621 = vector.extract_strided_slice %611 {offsets = [0, 128], sizes = [8, 128], strides = [1, 1]} : vector<8x384xf32> to vector<8x128xf32>
    %622 = vector.extract_strided_slice %612 {offsets = [0, 128], sizes = [8, 128], strides = [1, 1]} : vector<8x384xf32> to vector<8x128xf32>
    %623 = arith.addf %621, %622 : vector<8x128xf32>
    %624 = arith.negf %623 : vector<8x128xf32>
    %625 = math.exp %624 : vector<8x128xf32>
    %cst_166 = arith.constant 1.000000e+00 : f32
    %626 = vector.broadcast %cst_166 : f32 to vector<8x128xf32>
    %627 = arith.addf %626, %625 : vector<8x128xf32>
    %628 = arith.divf %626, %627 : vector<8x128xf32>
    %629 = vector.extract_strided_slice %611 {offsets = [0, 256], sizes = [8, 128], strides = [1, 1]} : vector<8x384xf32> to vector<8x128xf32>
    %630 = vector.extract_strided_slice %612 {offsets = [0, 256], sizes = [8, 128], strides = [1, 1]} : vector<8x384xf32> to vector<8x128xf32>
    %631 = arith.addf %630, %387 : vector<8x128xf32>
    %632 = arith.mulf %620, %631 : vector<8x128xf32>
    %633 = arith.addf %629, %632 : vector<8x128xf32>
    %634 = math.tanh %633 : vector<8x128xf32>
    %cst_167 = arith.constant 1.000000e+00 : f32
    %635 = vector.broadcast %cst_167 : f32 to vector<8x128xf32>
    %636 = arith.subf %635, %628 : vector<8x128xf32>
    %637 = arith.mulf %636, %634 : vector<8x128xf32>
    %638 = arith.mulf %628, %608 : vector<8x128xf32>
    %639 = arith.addf %637, %638 : vector<8x128xf32>
    %640 = vector.broadcast %c5_i32_161 : i32 to vector<8x1xi32>
    %641 = arith.cmpi sgt, %0, %640 : vector<8x1xi32>
    %cst_168 = arith.constant 0.000000e+00 : f32
    %642 = vector.shape_cast %641 : vector<8x1xi1> to vector<8x1xi1>
    %643 = vector.broadcast %642 : vector<8x1xi1> to vector<8x128xi1>
    %644 = vector.broadcast %cst_168 : f32 to vector<8x128xf32>
    %645 = arith.select %643, %639, %644 : vector<8x128xi1>, vector<8x128xf32>
    %646 = arith.index_cast %c5_i32_161 : i32 to index
    %c0_169 = arith.constant 0 : index
    %c0_170 = arith.constant 0 : index
    %647 = vector.load %arg9[%646, %c0_169, %c0_170] : memref<8x8x128xf32, #tpu.memory_space<vmem>>, vector<1x8x128xf32>
    %648 = vector.shape_cast %647 : vector<1x8x128xf32> to vector<8x128xf32>
    %649 = vector.shape_cast %645 : vector<8x128xf32> to vector<1x8x128xf32>
    tpu.vector_store %arg9[%646, %c0_169, %c0_170], %649 {strides = array<i32>} : memref<8x8x128xf32, #tpu.memory_space<vmem>>, vector<1x8x128xf32>,
    %650 = vector.shape_cast %641 : vector<8x1xi1> to vector<8x1xi1>
    %651 = vector.broadcast %650 : vector<8x1xi1> to vector<8x128xi1>
    %652 = arith.select %651, %639, %608 : vector<8x128xi1>, vector<8x128xf32>
    %c6_i32_171 = arith.constant 6 : i32
    %653 = arith.index_cast %c6_i32_171 : i32 to index
    %c0_172 = arith.constant 0 : index
    %c0_173 = arith.constant 0 : index
    %654 = vector.load %arg11[%653, %c0_172, %c0_173] : memref<8x8x384xf32, #tpu.memory_space<vmem>>, vector<1x8x384xf32>
    %655 = vector.shape_cast %654 : vector<1x8x384xf32> to vector<8x384xf32>
    %cst_174 = arith.constant dense<0.000000e+00> : vector<8x384xf32>
    %656 = tpu.matmul %652, %383, %cst_174 {dimension_numbers = #tpu.dot_dimension_numbers<[1], [0], [0], [1], [0, 0, 1, 1], [], []>} : vector<8x128xf32>, vector<128x384xf32>, vector<8x384xf32> -> vector<8x384xf32>
    %657 = vector.extract_strided_slice %655 {offsets = [0, 0], sizes = [8, 128], strides = [1, 1]} : vector<8x384xf32> to vector<8x128xf32>
    %658 = vector.extract_strided_slice %656 {offsets = [0, 0], sizes = [8, 128], strides = [1, 1]} : vector<8x384xf32> to vector<8x128xf32>
    %659 = arith.addf %657, %658 : vector<8x128xf32>
    %660 = arith.negf %659 : vector<8x128xf32>
    %661 = math.exp %660 : vector<8x128xf32>
    %cst_175 = arith.constant 1.000000e+00 : f32
    %662 = vector.broadcast %cst_175 : f32 to vector<8x128xf32>
    %663 = arith.addf %662, %661 : vector<8x128xf32>
    %664 = arith.divf %662, %663 : vector<8x128xf32>
    %665 = vector.extract_strided_slice %655 {offsets = [0, 128], sizes = [8, 128], strides = [1, 1]} : vector<8x384xf32> to vector<8x128xf32>
    %666 = vector.extract_strided_slice %656 {offsets = [0, 128], sizes = [8, 128], strides = [1, 1]} : vector<8x384xf32> to vector<8x128xf32>
    %667 = arith.addf %665, %666 : vector<8x128xf32>
    %668 = arith.negf %667 : vector<8x128xf32>
    %669 = math.exp %668 : vector<8x128xf32>
    %cst_176 = arith.constant 1.000000e+00 : f32
    %670 = vector.broadcast %cst_176 : f32 to vector<8x128xf32>
    %671 = arith.addf %670, %669 : vector<8x128xf32>
    %672 = arith.divf %670, %671 : vector<8x128xf32>
    %673 = vector.extract_strided_slice %655 {offsets = [0, 256], sizes = [8, 128], strides = [1, 1]} : vector<8x384xf32> to vector<8x128xf32>
    %674 = vector.extract_strided_slice %656 {offsets = [0, 256], sizes = [8, 128], strides = [1, 1]} : vector<8x384xf32> to vector<8x128xf32>
    %675 = arith.addf %674, %387 : vector<8x128xf32>
    %676 = arith.mulf %664, %675 : vector<8x128xf32>
    %677 = arith.addf %673, %676 : vector<8x128xf32>
    %678 = math.tanh %677 : vector<8x128xf32>
    %cst_177 = arith.constant 1.000000e+00 : f32
    %679 = vector.broadcast %cst_177 : f32 to vector<8x128xf32>
    %680 = arith.subf %679, %672 : vector<8x128xf32>
    %681 = arith.mulf %680, %678 : vector<8x128xf32>
    %682 = arith.mulf %672, %652 : vector<8x128xf32>
    %683 = arith.addf %681, %682 : vector<8x128xf32>
    %684 = vector.broadcast %c6_i32_171 : i32 to vector<8x1xi32>
    %685 = arith.cmpi sgt, %0, %684 : vector<8x1xi32>
    %cst_178 = arith.constant 0.000000e+00 : f32
    %686 = vector.shape_cast %685 : vector<8x1xi1> to vector<8x1xi1>
    %687 = vector.broadcast %686 : vector<8x1xi1> to vector<8x128xi1>
    %688 = vector.broadcast %cst_178 : f32 to vector<8x128xf32>
    %689 = arith.select %687, %683, %688 : vector<8x128xi1>, vector<8x128xf32>
    %690 = arith.index_cast %c6_i32_171 : i32 to index
    %c0_179 = arith.constant 0 : index
    %c0_180 = arith.constant 0 : index
    %691 = vector.load %arg9[%690, %c0_179, %c0_180] : memref<8x8x128xf32, #tpu.memory_space<vmem>>, vector<1x8x128xf32>
    %692 = vector.shape_cast %691 : vector<1x8x128xf32> to vector<8x128xf32>
    %693 = vector.shape_cast %689 : vector<8x128xf32> to vector<1x8x128xf32>
    tpu.vector_store %arg9[%690, %c0_179, %c0_180], %693 {strides = array<i32>} : memref<8x8x128xf32, #tpu.memory_space<vmem>>, vector<1x8x128xf32>,
    %694 = vector.shape_cast %685 : vector<8x1xi1> to vector<8x1xi1>
    %695 = vector.broadcast %694 : vector<8x1xi1> to vector<8x128xi1>
    %696 = arith.select %695, %683, %652 : vector<8x128xi1>, vector<8x128xf32>
    %c7_i32_181 = arith.constant 7 : i32
    %697 = arith.index_cast %c7_i32_181 : i32 to index
    %c0_182 = arith.constant 0 : index
    %c0_183 = arith.constant 0 : index
    %698 = vector.load %arg11[%697, %c0_182, %c0_183] : memref<8x8x384xf32, #tpu.memory_space<vmem>>, vector<1x8x384xf32>
    %699 = vector.shape_cast %698 : vector<1x8x384xf32> to vector<8x384xf32>
    %cst_184 = arith.constant dense<0.000000e+00> : vector<8x384xf32>
    %700 = tpu.matmul %696, %383, %cst_184 {dimension_numbers = #tpu.dot_dimension_numbers<[1], [0], [0], [1], [0, 0, 1, 1], [], []>} : vector<8x128xf32>, vector<128x384xf32>, vector<8x384xf32> -> vector<8x384xf32>
    %701 = vector.extract_strided_slice %699 {offsets = [0, 0], sizes = [8, 128], strides = [1, 1]} : vector<8x384xf32> to vector<8x128xf32>
    %702 = vector.extract_strided_slice %700 {offsets = [0, 0], sizes = [8, 128], strides = [1, 1]} : vector<8x384xf32> to vector<8x128xf32>
    %703 = arith.addf %701, %702 : vector<8x128xf32>
    %704 = arith.negf %703 : vector<8x128xf32>
    %705 = math.exp %704 : vector<8x128xf32>
    %cst_185 = arith.constant 1.000000e+00 : f32
    %706 = vector.broadcast %cst_185 : f32 to vector<8x128xf32>
    %707 = arith.addf %706, %705 : vector<8x128xf32>
    %708 = arith.divf %706, %707 : vector<8x128xf32>
    %709 = vector.extract_strided_slice %699 {offsets = [0, 128], sizes = [8, 128], strides = [1, 1]} : vector<8x384xf32> to vector<8x128xf32>
    %710 = vector.extract_strided_slice %700 {offsets = [0, 128], sizes = [8, 128], strides = [1, 1]} : vector<8x384xf32> to vector<8x128xf32>
    %711 = arith.addf %709, %710 : vector<8x128xf32>
    %712 = arith.negf %711 : vector<8x128xf32>
    %713 = math.exp %712 : vector<8x128xf32>
    %cst_186 = arith.constant 1.000000e+00 : f32
    %714 = vector.broadcast %cst_186 : f32 to vector<8x128xf32>
    %715 = arith.addf %714, %713 : vector<8x128xf32>
    %716 = arith.divf %714, %715 : vector<8x128xf32>
    %717 = vector.extract_strided_slice %699 {offsets = [0, 256], sizes = [8, 128], strides = [1, 1]} : vector<8x384xf32> to vector<8x128xf32>
    %718 = vector.extract_strided_slice %700 {offsets = [0, 256], sizes = [8, 128], strides = [1, 1]} : vector<8x384xf32> to vector<8x128xf32>
    %719 = arith.addf %718, %387 : vector<8x128xf32>
    %720 = arith.mulf %708, %719 : vector<8x128xf32>
    %721 = arith.addf %717, %720 : vector<8x128xf32>
    %722 = math.tanh %721 : vector<8x128xf32>
    %cst_187 = arith.constant 1.000000e+00 : f32
    %723 = vector.broadcast %cst_187 : f32 to vector<8x128xf32>
    %724 = arith.subf %723, %716 : vector<8x128xf32>
    %725 = arith.mulf %724, %722 : vector<8x128xf32>
    %726 = arith.mulf %716, %696 : vector<8x128xf32>
    %727 = arith.addf %725, %726 : vector<8x128xf32>
    %728 = vector.broadcast %c7_i32_181 : i32 to vector<8x1xi32>
    %729 = arith.cmpi sgt, %0, %728 : vector<8x1xi32>
    %cst_188 = arith.constant 0.000000e+00 : f32
    %730 = vector.shape_cast %729 : vector<8x1xi1> to vector<8x1xi1>
    %731 = vector.broadcast %730 : vector<8x1xi1> to vector<8x128xi1>
    %732 = vector.broadcast %cst_188 : f32 to vector<8x128xf32>
    %733 = arith.select %731, %727, %732 : vector<8x128xi1>, vector<8x128xf32>
    %734 = arith.index_cast %c7_i32_181 : i32 to index
    %c0_189 = arith.constant 0 : index
    %c0_190 = arith.constant 0 : index
    %735 = vector.load %arg9[%734, %c0_189, %c0_190] : memref<8x8x128xf32, #tpu.memory_space<vmem>>, vector<1x8x128xf32>
    %736 = vector.shape_cast %735 : vector<1x8x128xf32> to vector<8x128xf32>
    %737 = vector.shape_cast %733 : vector<8x128xf32> to vector<1x8x128xf32>
    tpu.vector_store %arg9[%734, %c0_189, %c0_190], %737 {strides = array<i32>} : memref<8x8x128xf32, #tpu.memory_space<vmem>>, vector<1x8x128xf32>,
    %738 = vector.shape_cast %729 : vector<8x1xi1> to vector<8x1xi1>
    %739 = vector.broadcast %738 : vector<8x1xi1> to vector<8x128xi1>
    %740 = arith.select %739, %727, %696 : vector<8x128xi1>, vector<8x128xf32>
    %c8_i32_191 = arith.constant 8 : i32
    %c0_192 = arith.constant 0 : index
    %c0_193 = arith.constant 0 : index
    %c0_194 = arith.constant 0 : index
    %741 = vector.load %arg9[%c0_192, %c0_193, %c0_194] : memref<8x8x128xf32, #tpu.memory_space<vmem>>, vector<8x8x128xf32>
    %742 = tpu.iota {dimensions = array<i32: 0>} : vector<8x8x1xi32>
    %743 = vector.shape_cast %0 : vector<8x1xi32> to vector<1x8x1xi32>
    %744 = vector.broadcast %743 : vector<1x8x1xi32> to vector<8x8x1xi32>
    %745 = arith.cmpi slt, %742, %744 : vector<8x8x1xi32>
    %cst_195 = arith.constant 0.000000e+00 : f32
    %746 = vector.shape_cast %745 : vector<8x8x1xi1> to vector<8x8x1xi1>
    %747 = vector.broadcast %746 : vector<8x8x1xi1> to vector<8x8x128xi1>
    %748 = vector.broadcast %cst_195 : f32 to vector<8x8x128xf32>
    %749 = arith.select %747, %741, %748 : vector<8x8x128xi1>, vector<8x8x128xf32>
    %750 = vector.shape_cast %749 : vector<8x8x128xf32> to vector<64x128xf32>
    %c0_196 = arith.constant 0 : index
    %c0_197 = arith.constant 0 : index
    %751 = vector.load %arg7[%c0_196, %c0_197] : memref<128x128xf32, #tpu.memory_space<vmem>>, vector<128x128xf32>
    %cst_198 = arith.constant dense<0.000000e+00> : vector<64x128xf32>
    %752 = tpu.matmul %750, %751, %cst_198 {dimension_numbers = #tpu.dot_dimension_numbers<[1], [0], [0], [1], [0, 0, 1, 1], [], []>} : vector<64x128xf32>, vector<128x128xf32>, vector<64x128xf32> -> vector<64x128xf32>
    %c0_199 = arith.constant 0 : index
    %c0_200 = arith.constant 0 : index
    %753 = vector.load %arg8[%c0_199, %c0_200] : memref<1x128xf32, #tpu.memory_space<vmem>>, vector<1x128xf32>
    %754 = vector.broadcast %753 : vector<1x128xf32> to vector<64x128xf32>
    %755 = arith.addf %752, %754 : vector<64x128xf32>
    %756 = arith.negf %755 : vector<64x128xf32>
    %757 = math.exp %756 : vector<64x128xf32>
    %cst_201 = arith.constant 1.000000e+00 : f32
    %758 = vector.broadcast %cst_201 : f32 to vector<64x128xf32>
    %759 = arith.addf %758, %757 : vector<64x128xf32>
    %760 = arith.divf %758, %759 : vector<64x128xf32>
    %761 = vector.shape_cast %760 : vector<64x128xf32> to vector<8x8x128xf32>
    %c0_202 = arith.constant 0 : index
    %c0_203 = arith.constant 0 : index
    %c0_204 = arith.constant 0 : index
    %762 = vector.load %arg9[%c0_202, %c0_203, %c0_204] : memref<8x8x128xf32, #tpu.memory_space<vmem>>, vector<8x8x128xf32>
    tpu.vector_store %arg9[%c0_202, %c0_203, %c0_204], %761 {strides = array<i32>} : memref<8x8x128xf32, #tpu.memory_space<vmem>>, vector<8x8x128xf32>,
    return
  }
  func.func @transform_0(%arg0: i32) -> (i32, i32) {
    %c0_i32 = arith.constant 0 : i32
    %c0_i32_0 = arith.constant 0 : i32
    return %arg0, %c0_i32 : i32, i32
  }
  func.func @transform_1(%arg0: i32) -> (i32, i32, i32) {
    %c0_i32 = arith.constant 0 : i32
    %c0_i32_0 = arith.constant 0 : i32
    %c0_i32_1 = arith.constant 0 : i32
    return %c0_i32, %arg0, %c0_i32_0 : i32, i32, i32
  }
  func.func @transform_2(%arg0: i32) -> (i32, i32, i32) {
    %c0_i32 = arith.constant 0 : i32
    %c0_i32_0 = arith.constant 0 : i32
    %c0_i32_1 = arith.constant 0 : i32
    %c0_i32_2 = arith.constant 0 : i32
    return %c0_i32, %c0_i32_0, %c0_i32_1 : i32, i32, i32
  }
  func.func @transform_3(%arg0: i32) -> (i32, i32, i32) {
    %c0_i32 = arith.constant 0 : i32
    %c0_i32_0 = arith.constant 0 : i32
    %c0_i32_1 = arith.constant 0 : i32
    %c0_i32_2 = arith.constant 0 : i32
    return %c0_i32, %c0_i32_0, %c0_i32_1 : i32, i32, i32
  }
  func.func @transform_4(%arg0: i32) -> (i32, i32, i32) {
    %c0_i32 = arith.constant 0 : i32
    %c0_i32_0 = arith.constant 0 : i32
    %c0_i32_1 = arith.constant 0 : i32
    %c0_i32_2 = arith.constant 0 : i32
    return %c0_i32, %c0_i32_0, %c0_i32_1 : i32, i32, i32
  }
  func.func @transform_5(%arg0: i32) -> (i32, i32, i32) {
    %c0_i32 = arith.constant 0 : i32
    %c0_i32_0 = arith.constant 0 : i32
    %c0_i32_1 = arith.constant 0 : i32
    %c0_i32_2 = arith.constant 0 : i32
    return %c0_i32, %c0_i32_0, %c0_i32_1 : i32, i32, i32
  }
  func.func @transform_6(%arg0: i32) -> (i32, i32) {
    %c0_i32 = arith.constant 0 : i32
    %c0_i32_0 = arith.constant 0 : i32
    %c0_i32_1 = arith.constant 0 : i32
    return %c0_i32, %c0_i32_0 : i32, i32
  }
  func.func @transform_7(%arg0: i32) -> (i32, i32) {
    %c0_i32 = arith.constant 0 : i32
    %c0_i32_0 = arith.constant 0 : i32
    %c0_i32_1 = arith.constant 0 : i32
    return %c0_i32, %c0_i32_0 : i32, i32
  }
  func.func @transform_8(%arg0: i32) -> (i32, i32, i32) {
    %c0_i32 = arith.constant 0 : i32
    %c0_i32_0 = arith.constant 0 : i32
    %c0_i32_1 = arith.constant 0 : i32
    return %c0_i32, %arg0, %c0_i32_0 : i32, i32, i32
  }
}

</mosaic_0001>

<bundles_post_ra>
// kernel: tpu_custom_call.1
= control target key start
LH: loop header
LB: loop body
LE: loop exit
PB: predicated region body
PF: predicated region fallthrough
CT: control target
= control target key end

     0   :  { %13 = vsyncpa [#allocation5], 0  ;;  %s5179_s0 = inlined_call_operand.vmem [shape: s32[8,1], index: 0, kind: input, shape index: {}]   ;;  %s5180_s1 = inlined_call_operand.hbm [shape: f32[8,8,128], index: 1, kind: input, shape index: {}]   ;;  %s5181_s2 = inlined_call_operand.hbm [shape: f32[2,128,384], index: 2, kind: input, shape index: {}]   ;;  %s5182_s3 = inlined_call_operand.hbm [shape: f32[2,128,384], index: 3, kind: input, shape index: {}]   ;;  %s5183_s4 = inlined_call_operand.vmem [shape: f32[2,1,384], index: 4, kind: input, shape index: {}]   ;;  %s5184_s5 = inlined_call_operand.vmem [shape: f32[2,1,128], index: 5, kind: input, shape index: {}]   ;;  %s5185_s6 = inlined_call_operand.hbm [shape: f32[128,128], index: 6, kind: input, shape index: {}]   ;;  %s5186_s7 = inlined_call_operand.vmem [shape: f32[1,128], index: 7, kind: input, shape index: {}]   ;;  %s5187_s8 = inlined_call_operand.hbm [shape: f32[8,8,128], index: 8, kind: output, shape index: {}]  }
   0x1   :  { %14 = vsyncpa [#allocation8], 0 }
   0x2   :  { %15 = vsyncpa [#allocation11], 0  ;;  %s36_s29 = sshll.u32 %s5181_s2, 4  ;;  %s37_s29 = int_to_ptr.hbm [resolvable:$true] %s36_s29 }
   0x3   :  { %16 = vsyncpa [#allocation6], 0  ;;  %s3303_s30 = smov [#allocation7]   ;;  %s23_s12 = sshll.u32 %s5180_s1, 4  ;;  %s24_s12 = int_to_ptr.hbm [resolvable:$true] %s23_s12 }
   0x4   :  { %s38_s9 = sshll.u32 %s3303_s30, 4  ;;  %s3304_s13 = smov 384   ;;  %s39_s9 = int_to_ptr.vmem [resolvable:$true] %s38_s9 }
   0x5   :  { %s3305_s14 = smov 24   ;;  %s3306_s15 = smov [#allocation4]  }
   0x6   :  { %44 = dma.hbm_to_vmem [thread:$0]  %s37_s29, 12288, %s39_s9, [#allocation8], %s3304_s13, %s3304_s13, %s3305_s14  }
   0x7   :  { %s25_s16 = sshll.u32 %s3306_s15, 4  ;;  %s3307_s17 = smov 128   ;;  %s26_s16 = int_to_ptr.vmem [resolvable:$true] %s25_s16 }
   0x8   :  { %s3308_s18 = smov 8   ;;  %s49_s20 = sshll.u32 %s5182_s3, 4  ;;  %s50_s20 = int_to_ptr.hbm [resolvable:$true] %s49_s20 }
   0x9   :  { %31 = dma.hbm_to_vmem [thread:$0]  %s24_s12, 1024, %s26_s16, [#allocation5], %s3307_s17, %s3307_s17, %s3308_s18  }
   0xa   :  { %s3309_s21 = smov [#allocation9]   ;;  %s66_s24 = sshll.u32 %s5185_s6, 4  ;;  %s67_s24 = int_to_ptr.hbm [resolvable:$true] %s66_s24 }
   0xb   :  { %s51_s1 = sshll.u32 %s3309_s21, 4  ;;  %s3310_s25 = smov [#allocation10]   ;;  %s52_s1 = int_to_ptr.vmem [resolvable:$true] %s51_s1 }
   0xc   :  { %57 = dma.hbm_to_vmem [thread:$0]  %s50_s20, 12288, %s52_s1, [#allocation8], %s3304_s13, %s3304_s13, %s3305_s14  }
   0xd   :  { %s68_s26 = sshll.u32 %s3310_s25, 4  ;;  %s69_s26 = int_to_ptr.vmem [resolvable:$true] %s68_s26 }
   0xe   :  { %74 = dma.hbm_to_vmem [thread:$0]  %s67_s24, 2048, %s69_s26, [#allocation11], %s3307_s17, %s3307_s17, %s3308_s18  }
   0xf   :  { %3295 = dma.done.wait [#allocation5], 1024  }
  0x10   :  { %3296 = vsyncadd [#allocation5], 4294966272 }
  0x11   :  { %3297 = dma.done.wait [#allocation8], 24576  }
  0x12   :  { %3298 = vsyncadd [#allocation8], 4294942720 }
  0x13   :  { %3299 = dma.done.wait [#allocation11], 2048  }
  0x14   :  { %3300 = vsyncadd [#allocation11], 4294965248  ;;  %v147_v0 = vld [vmem:[#allocation7 + $0x168] sm:$0xff]  ;;  %v144_v2 = vld [vmem:[#allocation7 + $0x150] sm:$0xff]  ;;  %v5188_v45 = vmov 0.0   ;;  %s2756_s1 = sshll.u32 %s5187_s8, 4  ;;  %s2757_s1 = int_to_ptr.hbm [resolvable:$true] %s2756_s1 }
  0x15   :  { %v3377_v1 = vld [vmem:[#allocation9 + $0x168] sm:$0xff]  ;;  %2851 = vmatpush.msra.mxu2 %v147_v0  ;;  %v3380_v3 = vld [vmem:[#allocation9 + $0x150] sm:$0xff]  ;;  %158 = vmatpush.msra.mxu1 %v147_v0  ;;  %v141_v4 = vld [vmem:[#allocation7 + $0x138] sm:$0xff] }
  0x16   :  { %360 = vmatpush.msra.mxu3 %v3377_v1  ;;  %v3382_v5 = vld [vmem:[#allocation9 + $0x138] sm:$0xff]  ;;  %v138_v6 = vld [vmem:[#allocation7 + $0x120] sm:$0xff]  ;;  %v135_v8 = vld [vmem:[#allocation7 + $0x108] sm:$0xff] }
  0x17   :  { %2852 = vmatpush.msra.mxu2 %v144_v2  ;;  %159 = vmatpush.msra.mxu1 %v144_v2  ;;  %v3385_v7 = vld [vmem:[#allocation9 + $0x120] sm:$0xff]  ;;  %v3388_v9 = vld [vmem:[#allocation9 + $0x108] sm:$0xff]  ;;  %v132_v10 = vld [vmem:[#allocation7 + $0xf0] sm:$0xff] }
  0x18   :  { %361 = vmatpush.msra.mxu3 %v3380_v3  ;;  %v3391_v11 = vld [vmem:[#allocation9 + $0xf0] sm:$0xff]  ;;  %v129_v12 = vld [vmem:[#allocation7 + $0xd8] sm:$0xff]  ;;  %v126_v14 = vld [vmem:[#allocation7 + $0xc0] sm:$0xff] }
  0x19   :  { %2853 = vmatpush.msra.mxu2 %v141_v4  ;;  %160 = vmatpush.msra.mxu1 %v141_v4  ;;  %v3394_v13 = vld [vmem:[#allocation9 + $0xd8] sm:$0xff]  ;;  %v3397_v15 = vld [vmem:[#allocation9 + $0xc0] sm:$0xff]  ;;  %v123_v17 = vld [vmem:[#allocation7 + $0xa8] sm:$0xff] }
  0x1a   :  { %362 = vmatpush.msra.mxu3 %v3382_v5  ;;  %v3400_v16 = vld [vmem:[#allocation9 + $0x178] sm:$0xff]  ;;  %v3402_v18 = vld [vmem:[#allocation9 + $0xa8] sm:$0xff]  ;;  %v3405_v19 = vld [vmem:[#allocation9 + $0x160] sm:$0xff] }
  0x1b   :  { %2854 = vmatpush.msra.mxu2 %v138_v6  ;;  %161 = vmatpush.msra.mxu1 %v138_v6  ;;  %v3408_v20 = vld [vmem:[#allocation9 + $0x148] sm:$0xff]  ;;  %v120_v21 = vld [vmem:[#allocation7 + $0x90] sm:$0xff]  ;;  %v117_v24 = vld [vmem:[#allocation7 + $0x78] sm:$0xff] }
  0x1c   :  { %363 = vmatpush.msra.mxu3 %v3385_v7  ;;  %400 = vmatpush.msra.mxu0 %v3400_v16  ;;  %v3410_v22 = vld [vmem:[#allocation9 + $0x90] sm:$0xff]  ;;  %v3416_v25 = vld [vmem:[#allocation9 + $0x78] sm:$0xff]  ;;  %v114_v27 = vld [vmem:[#allocation7 + $0x60] sm:$0xff] }
  0x1d   :  { %2855 = vmatpush.msra.mxu2 %v135_v8  ;;  %162 = vmatpush.msra.mxu1 %v135_v8  ;;  %v3414_v23 = vld [vmem:[#allocation9 + $0x130] sm:$0xff]  ;;  %v3420_v26 = vld [vmem:[#allocation9 + $0x118] sm:$0xff]  ;;  %v3422_v28 = vld [vmem:[#allocation9 + $0x60] sm:$0xff] }
  0x1e   :  { %364 = vmatpush.msra.mxu3 %v3388_v9  ;;  %401 = vmatpush.msra.mxu0 %v3405_v19  ;;  %v3426_v29 = vld [vmem:[#allocation9 + $0x100] sm:$0xff]  ;;  %v111_v30 = vld [vmem:[#allocation7 + $0x48] sm:$0xff]  ;;  %v108_v33 = vld [vmem:[#allocation7 + $0x30] sm:$0xff] }
  0x1f   :  { %2856 = vmatpush.msra.mxu2 %v132_v10  ;;  %163 = vmatpush.msra.mxu1 %v132_v10  ;;  %v3428_v31 = vld [vmem:[#allocation9 + $0x48] sm:$0xff]  ;;  %v3434_v34 = vld [vmem:[#allocation9 + $0x30] sm:$0xff]  ;;  %v105_v36 = vld [vmem:[#allocation7 + $0x18] sm:$0xff] }
  0x20   :  { %365 = vmatpush.msra.mxu3 %v3391_v11  ;;  %402 = vmatpush.msra.mxu0 %v3408_v20  ;;  %v3432_v32 = vld [vmem:[#allocation9 + $0xe8] sm:$0xff]  ;;  %v3438_v35 = vld [vmem:[#allocation9 + $0xd0] sm:$0xff]  ;;  %v3440_v37 = vld [vmem:[#allocation9 + $0x18] sm:$0xff] }
  0x21   :  { %2857 = vmatpush.msra.mxu2 %v129_v12  ;;  %164 = vmatpush.msra.mxu1 %v129_v12  ;;  %5269 = vst [vmem:[#allocation17_spill] sm:$0xff] %v3440_v37  ;;  %v3444_v38 = vld [vmem:[#allocation9 + $0xb8] sm:$0xff]  ;;  %v102_v39 = vld [vmem:[#allocation7] sm:$0xff]  ;;  %v3452_v42 = vld [vmem:[#allocation9 + $0x170] sm:$0xff] }
  0x22   :  { %366 = vmatpush.msra.mxu3 %v3394_v13  ;;  %403 = vmatpush.msra.mxu0 %v3414_v23  ;;  %v3446_v40 = vld [vmem:[#allocation9] sm:$0xff]  ;;  %v149_v43 = vld [vmem:[#allocation7 + $0x178] sm:$0xff]  ;;  %v148_v48 = vld [vmem:[#allocation7 + $0x170] sm:$0xff] }
  0x23   :  { %2858 = vmatpush.msra.mxu2 %v126_v14  ;;  %165 = vmatpush.msra.mxu1 %v126_v14  ;;  %5270 = vst [vmem:[#allocation18_spill] sm:$0xff] %v3446_v40  ;;  %v3450_v41 = vld [vmem:[#allocation4 + $0x20] sm:$0xff]  ;;  %v3460_v46 = vld [vmem:[#allocation9 + $0x158] sm:$0xff]  ;;  %v3468_v52 = vld [vmem:[#allocation9 + $0x88] sm:$0xff] }
  0x24   :  { %367 = vmatpush.msra.mxu3 %v3397_v15  ;;  %404 = vmatpush.msra.mxu0 %v3420_v26  ;;  %v3456_v44 = vld [vmem:[#allocation9 + $0xa0] sm:$0xff]  ;;  %v145_v51 = vld [vmem:[#allocation7 + $0x158] sm:$0xff]  ;;  %v143_v53 = vld [vmem:[#allocation7 + $0x148] sm:$0xff] }
  0x25   :  { %2859 = vmatpush.msra.mxu2 %v123_v17  ;;  %166 = vmatpush.msra.mxu1 %v123_v17  ;;  %v3462_v47 = vld [vmem:[#allocation4] sm:$0xff]  ;;  %v3472_v54 = vld [vmem:[#allocation9 + $0x128] sm:$0xff]  ;;  %v3474_v55 = vld [vmem:[#allocation9 + $0x70] sm:$0xff] }
  0x26   :  { %368 = vmatpush.msra.mxu3 %v3402_v18  ;;  %405 = vmatpush.msra.mxu0 %v3426_v29  ;;  %v146_v49 = vld [vmem:[#allocation7 + $0x160] sm:$0xff]  ;;  %v140_v57 = vld [vmem:[#allocation7 + $0x130] sm:$0xff]  ;;  %v3478_v58 = vld [vmem:[#allocation4 + $0x28] sm:$0xff] }
  0x27   :  { %2860 = vmatpush.msra.mxu2 %v120_v21  ;;  %167 = vmatpush.msra.mxu1 %v120_v21  ;;  %v3465_v50 = vld [vmem:[#allocation9 + $0x140] sm:$0xff]  ;;  %v3480_v59 = vld [vmem:[#allocation9 + $0x110] sm:$0xff]  ;;  %v139_v60 = vld [vmem:[#allocation7 + $0x128] sm:$0xff] }
  0x28   :  { %369 = vmatpush.msra.mxu3 %v3410_v22  ;;  %406 = vmatpush.msra.mxu0 %v3432_v32  ;;  %v142_v56 = vld [vmem:[#allocation7 + $0x140] sm:$0xff]  ;;  %v137_v61 = vld [vmem:[#allocation7 + $0x118] sm:$0xff]  ;;  %v3486_v63 = vld [vmem:[#allocation4 + $0x8] sm:$0xff] }
  0x29   :  { %2861 = vmatpush.msra.mxu2 %v117_v24  ;;  %168 = vmatpush.msra.mxu1 %v117_v24  ;;  %v3484_v62 = vld [vmem:[#allocation9 + $0xf8] sm:$0xff]  ;;  %v136_v0 = vld [vmem:[#allocation7 + $0x110] sm:$0xff]  ;;  %v134_v2 = vld [vmem:[#allocation7 + $0x100] sm:$0xff] }
  0x2a   :  { %370 = vmatpush.msra.mxu3 %v3416_v25  ;;  %407 = vmatpush.msra.mxu0 %v3438_v35  ;;  %v3490_v4 = vld [vmem:[#allocation9 + $0xe0] sm:$0xff]  ;;  %v3492_v6 = vld [vmem:[#allocation9 + $0x58] sm:$0xff]  ;;  %v131_v10 = vld [vmem:[#allocation7 + $0xe8] sm:$0xff] }
  0x2b   :  { %2862 = vmatpush.msra.mxu2 %v114_v27  ;;  %169 = vmatpush.msra.mxu1 %v114_v27  ;;  %v133_v8 = vld [vmem:[#allocation7 + $0xf8] sm:$0xff]  ;;  %v3496_v12 = vld [vmem:[#allocation9 + $0xc8] sm:$0xff]  ;;  %v3498_v14 = vld [vmem:[#allocation9 + $0x40] sm:$0xff] }
  0x2c   :  { %371 = vmatpush.msra.mxu3 %v3422_v28  ;;  %408 = vmatpush.msra.mxu0 %v3444_v38  ;;  %v130_v17 = vld [vmem:[#allocation7 + $0xe0] sm:$0xff]  ;;  %v128_v21 = vld [vmem:[#allocation7 + $0xd0] sm:$0xff] }
  0x2d   :  { %2863 = vmatpush.msra.mxu2 %v111_v30  ;;  %170 = vmatpush.msra.mxu1 %v111_v30  ;;  %v3502_v24 = vld [vmem:[#allocation4 + $0x30] sm:$0xff]  ;;  %v127_v30 = vld [vmem:[#allocation7 + $0xc8] sm:$0xff] }
  0x2e   :  { %372 = vmatpush.msra.mxu3 %v3428_v31  ;;  %409 = vmatpush.msra.mxu0 %v3456_v44  ;;  %5271 = vst [vmem:[#allocation19_spill] sm:$0xff] %v3502_v24  ;;  %v3504_v27 = vld [vmem:[#allocation9 + $0xb0] sm:$0xff] }
  0x2f   :  { %2864 = vmatpush.msra.mxu2 %v108_v33  ;;  %171 = vmatpush.msra.mxu1 %v108_v33  ;;  %v125_v33 = vld [vmem:[#allocation7 + $0xb8] sm:$0xff] }
  0x30   :  { %373 = vmatpush.msra.mxu3 %v3434_v34  ;;  %410 = vmatpush.msra.mxu0 %v3468_v52 }
  0x31   :  { %2865 = vmatpush.msra.mxu2 %v105_v36  ;;  %172 = vmatpush.msra.mxu1 %v105_v36  ;;  %v3508_v36 = vld [vmem:[#allocation9 + $0x98] sm:$0xff] }
  0x32   :  { %374 = vmatpush.msra.mxu3 %v3440_v37  ;;  %411 = vmatpush.msra.mxu0 %v3474_v55 }
  0x33   :  { %2866 = vmatpush.msra.mxu2 %v102_v39  ;;  %173 = vmatpush.msra.mxu1 %v102_v39  ;;  %v3510_v39 = vld [vmem:[#allocation4 + $0x10] sm:$0xff] }
  0x34   :  { %375 = vmatpush.msra.mxu3 %v3446_v40  ;;  %186 = vmatmul.f32.vlgmr.msra.gmra.mxu2 %v3450_v41 }
  0x35   :  { %376 = vmatmul.f32.vlgmr.msra.gmra.mxu3 %v5188_v45  ;;  %240 = vmatpush.msrb.mxu2 %v149_v43  ;;  %v124_v43 = vld [vmem:[#allocation7 + $0xb0] sm:$0xff]  ;;  %v106_v45 = vld [vmem:[#allocation7 + $0x20] sm:$0xff] }
  0x36   :  { %380 = vmatpush.msrb.mxu3 %v3452_v42  ;;  %174 = vmatmul.f32.vlgmr.msra.gmra.mxu1 %v3462_v47 }
  0x37   :  { %199 = vmatpush.msrb.mxu1 %v148_v48  ;;  %241 = vmatpush.msrb.mxu2 %v146_v49  ;;  %v122_v48 = vld [vmem:[#allocation7 + $0xa0] sm:$0xff] }
  0x38   :  { %381 = vmatpush.msrb.mxu3 %v3460_v46  ;;  %412 = vmatpush.msra.mxu0 %v3492_v6  ;;  %v3514_v49 = vld [vmem:[#allocation9 + $0x80] sm:$0xff] }
  0x39   :  { %200 = vmatpush.msrb.mxu1 %v145_v51  ;;  %242 = vmatpush.msrb.mxu2 %v143_v53  ;;  %v3516_v51 = vld [vmem:[#allocation9 + $0x28] sm:$0xff]  ;;  %v121_v53 = vld [vmem:[#allocation7 + $0x98] sm:$0xff] }
  0x3a   :  { %382 = vmatpush.msrb.mxu3 %v3465_v50  ;;  %413 = vmatpush.msra.mxu0 %v3498_v14  ;;  %5272 = vst [vmem:[#allocation20_spill] sm:$0xff] %v3516_v51 }
  0x3b   :  { %201 = vmatpush.msrb.mxu1 %v142_v56  ;;  %243 = vmatpush.msrb.mxu2 %v140_v57  ;;  %v119_v56 = vld [vmem:[#allocation7 + $0x88] sm:$0xff] }
  0x3c   :  { %383 = vmatpush.msrb.mxu3 %v3472_v54  ;;  %189 = vmatmul.f32.gmra.mxu2 %v3478_v58  ;;  %v3520_v57 = vld [vmem:[#allocation9 + $0x68] sm:$0xff] }
  0x3d   :  { %202 = vmatpush.msrb.mxu1 %v139_v60  ;;  %244 = vmatpush.msrb.mxu2 %v137_v61  ;;  %v3522_v60 = vld [vmem:[#allocation9 + $0x10] sm:$0xff]  ;;  %v118_v61 = vld [vmem:[#allocation7 + $0x80] sm:$0xff] }
  0x3e   :  { %384 = vmatpush.msrb.mxu3 %v3480_v59  ;;  %177 = vmatmul.f32.gmra.mxu1 %v3486_v63  ;;  %5273 = vst [vmem:[#allocation21_spill] sm:$0xff] %v3522_v60 }
  0x3f   :  { %203 = vmatpush.msrb.mxu1 %v136_v0  ;;  %245 = vmatpush.msrb.mxu2 %v134_v2  ;;  %v116_v0 = vld [vmem:[#allocation7 + $0x70] sm:$0xff]  ;;  %v3526_v2 = vld [vmem:[#allocation4 + $0x38] sm:$0xff] }
  0x40   :  { %385 = vmatpush.msrb.mxu3 %v3484_v62  ;;  %414 = vmatpush.msra.mxu0 %v3516_v51  ;;  %5274 = vst [vmem:[#allocation22_spill] sm:$0xff] %v3526_v2 }
  0x41   :  { %204 = vmatpush.msrb.mxu1 %v133_v8  ;;  %246 = vmatpush.msrb.mxu2 %v131_v10  ;;  %v3528_v8 = vld [vmem:[#allocation9 + $0x50] sm:$0xff]  ;;  %v115_v10 = vld [vmem:[#allocation7 + $0x68] sm:$0xff] }
  0x42   :  { %386 = vmatpush.msrb.mxu3 %v3490_v4  ;;  %415 = vmatpush.msra.mxu0 %v3522_v60 }
  0x43   :  { %205 = vmatpush.msrb.mxu1 %v130_v17  ;;  %247 = vmatpush.msrb.mxu2 %v128_v21  ;;  %v113_v17 = vld [vmem:[#allocation7 + $0x58] sm:$0xff] }
  0x44   :  { %387 = vmatpush.msrb.mxu3 %v3496_v12  ;;  %192 = vmatmul.f32.gmra.mxu2 %v3502_v24  ;;  %v3532_v21 = vld [vmem:[#allocation9 + $0x38] sm:$0xff]  ;;  %v5194_v24 = vmov 0  }
  0x45   :  { %206 = vmatpush.msrb.mxu1 %v127_v30  ;;  %248 = vmatpush.msrb.mxu2 %v125_v33  ;;  %5275 = vst [vmem:[#allocation23_spill] sm:$0xff] %v3532_v21  ;;  %v3534_v30 = vld [vmem:[#allocation4 + $0x18] sm:$0xff]  ;;  %v112_v33 = vld [vmem:[#allocation7 + $0x50] sm:$0xff] }
  0x46   :  { %388 = vmatpush.msrb.mxu3 %v3504_v27  ;;  %180 = vmatmul.f32.gmra.mxu1 %v3510_v39 }
  0x47   :  { %207 = vmatpush.msrb.mxu1 %v124_v43  ;;  %249 = vmatpush.msrb.mxu2 %v122_v48  ;;  %v110_v43 = vld [vmem:[#allocation7 + $0x40] sm:$0xff] }
  0x48   :  { %389 = vmatpush.msrb.mxu3 %v3508_v36  ;;  %v3541_v48 = vld [vmem:[%s5179_s0] sm:$0xff]  ;;  %2878 = vset.pattern.permute.xlu0 %v5194_v24 }
  0x49   :  { %208 = vmatpush.msrb.mxu1 %v121_v53  ;;  %250 = vmatpush.msrb.mxu2 %v119_v56  ;;  %5276 = vst [vmem:[#allocation24_spill] sm:$0xff] %v3541_v48  ;;  %v3543_v53 = vld [vmem:[#allocation9 + $0x20] sm:$0xff]  ;;  %v109_v56 = vld [vmem:[#allocation7 + $0x38] sm:$0xff]  ;;  %vm468_vm0 = vcmp.gt.s32.totalorder %v3541_v48, 0  ;;  %vm588_vm1 = vcmp.gt.s32.totalorder %v3541_v48, 1  ;;  %vm1198_vm2 = vcmp.gt.s32.totalorder %v3541_v48, 6 }
  0x4a   :  { %390 = vmatpush.msrb.mxu3 %v3514_v49  ;;  %5277 = vst [vmem:[#allocation25_spill] sm:$0xff] %v3543_v53  ;;  %602 = vmatpush.msrb.mxu0 %v3377_v1 }
  0x4b   :  { %209 = vmatpush.msrb.mxu1 %v118_v61  ;;  %251 = vmatpush.msrb.mxu2 %v116_v0  ;;  %v107_v61 = vld [vmem:[#allocation7 + $0x28] sm:$0xff] }
  0x4c   :  { %391 = vmatpush.msrb.mxu3 %v3520_v57  ;;  %195 = vmatmul.f32.gmra.mxu2 %v3526_v2  ;;  %v3547_v0 = vld [vmem:[#allocation9 + $0x8] sm:$0xff]  ;;  %v104_v2 = vld [vmem:[#allocation7 + $0x10] sm:$0xff] }
  0x4d   :  { %210 = vmatpush.msrb.mxu1 %v115_v10  ;;  %252 = vmatpush.msrb.mxu2 %v113_v17  ;;  %5278 = vst [vmem:[#allocation26_spill] sm:$0xff] %v3547_v0  ;;  %v5279_v10 = vmov 0.0   ;;  %v103_v17 = vld [vmem:[#allocation7 + $0x8] sm:$0xff] }
  0x4e   :  { %392 = vmatpush.msrb.mxu3 %v3528_v8  ;;  %183 = vmatmul.f32.gmra.mxu1 %v3534_v30 }
  0x4f   :  { %211 = vmatpush.msrb.mxu1 %v112_v33  ;;  %253 = vmatpush.msrb.mxu2 %v110_v43  ;;  %v469_v33 = vsel %vm468_vm0, 1, %v5194_v24 }
  0x50   :  { %393 = vmatpush.msrb.mxu3 %v3532_v21  ;;  %416 = vmatmul.f32.vlgmr.msra.gmra.mxu0 %v5279_v10 }
  0x51   :  { %212 = vmatpush.msrb.mxu1 %v109_v56  ;;  %254 = vmatpush.msrb.mxu2 %v107_v61 }
  0x52   :  { %394 = vmatpush.msrb.mxu3 %v3543_v53  ;;  %471 = vperm.xlu0 %2878, %v469_v33  }
  0x53   :  { %213 = vmatpush.msrb.mxu1 %v106_v45  ;;  %255 = vmatpush.msrb.mxu2 %v104_v2  ;;  %v589_v45 = vsel %vm588_vm1, 1, %v5194_v24 }
  0x54   :  { %395 = vmatpush.msrb.mxu3 %v3547_v0  ;;  %256 = vmatmul.f32.vlgmr.msrb.gmra.mxu2 %v3462_v47 }
  0x55   :  { %396 = vmatmul.f32.vlgmr.msrb.gmra.mxu3 %v5279_v10  ;;  %214 = vmatpush.msrb.mxu1 %v103_v17 }
  0x56   :  { %215 = vmatmul.f32.vlgmr.msrb.gmra.mxu1 %v3462_v47  ;;  %500 = vmatpush.msra.mxu2 %v3452_v42  ;;  %v1199_v47 = vsel %vm1198_vm2, 1, %v5194_v24 }
  0x57   :  { %480 = vmatpush.msra.mxu1 %v3377_v1  ;;  %520 = vmatpush.msra.mxu3 %v3400_v16 }
  0x58   :  { %501 = vmatpush.msra.mxu2 %v3460_v46  ;;  %603 = vmatpush.msrb.mxu0 %v3380_v3 }
  0x59   :  { %481 = vmatpush.msra.mxu1 %v3380_v3  ;;  %521 = vmatpush.msra.mxu3 %v3405_v19 }
  0x5a   :  { %502 = vmatpush.msra.mxu2 %v3465_v50  ;;  %604 = vmatpush.msrb.mxu0 %v3382_v5 }
  0x5b   :  { %482 = vmatpush.msra.mxu1 %v3382_v5  ;;  %522 = vmatpush.msra.mxu3 %v3408_v20 }
  0x5c   :  { %259 = vmatmul.f32.gmra.mxu2 %v3486_v63  ;;  %591 = vperm.xlu0 %2878, %v589_v45  }
  0x5d   :  { %483 = vmatpush.msra.mxu1 %v3385_v7  ;;  %503 = vmatpush.msra.mxu2 %v3472_v54 }
  0x5e   :  { %218 = vmatmul.f32.gmra.mxu1 %v3486_v63  ;;  %523 = vmatpush.msra.mxu3 %v3414_v23  ;;  %v150_v63 = vld [vmem:[%s5183_s4] sm:$0x7] }
  0x5f   :  { %484 = vmatpush.msra.mxu1 %v3388_v9  ;;  %504 = vmatpush.msra.mxu2 %v3480_v59 }
  0x60   :  { %605 = vmatpush.msrb.mxu0 %v3385_v7  ;;  %524 = vmatpush.msra.mxu3 %v3420_v26 }
  0x61   :  { %485 = vmatpush.msra.mxu1 %v3391_v11  ;;  %505 = vmatpush.msra.mxu2 %v3484_v62 }
  0x62   :  { %606 = vmatpush.msrb.mxu0 %v3388_v9  ;;  %525 = vmatpush.msra.mxu3 %v3426_v29 }
  0x63   :  { %486 = vmatpush.msra.mxu1 %v3394_v13  ;;  %506 = vmatpush.msra.mxu2 %v3490_v4 }
  0x64   :  { %262 = vmatmul.f32.gmra.mxu2 %v3510_v39  ;;  %607 = vmatpush.msrb.mxu0 %v3391_v11 }
  0x65   :  { %1201 = vperm.xlu0 %2878, %v1199_v47   ;;  %526 = vmatpush.msra.mxu3 %v3432_v32 }
  0x66   :  { %221 = vmatmul.f32.gmra.mxu1 %v3510_v39  ;;  %507 = vmatpush.msra.mxu2 %v3496_v12  ;;  %v3709_v39 = vperm.slane %v150_v63, 0 }
  0x67   :  { %487 = vmatpush.msra.mxu1 %v3397_v15  ;;  %527 = vmatpush.msra.mxu3 %v3438_v35 }
  0x68   :  { %608 = vmatpush.msrb.mxu0 %v3394_v13  ;;  %508 = vmatpush.msra.mxu2 %v3504_v27 }
  0x69   :  { %488 = vmatpush.msra.mxu1 %v3402_v18  ;;  %528 = vmatpush.msra.mxu3 %v3444_v38 }
  0x6a   :  { %609 = vmatpush.msrb.mxu0 %v3397_v15  ;;  %509 = vmatpush.msra.mxu2 %v3508_v36 }
  0x6b   :  { %489 = vmatpush.msra.mxu1 %v3410_v22  ;;  %529 = vmatpush.msra.mxu3 %v3456_v44 }
  0x6c   :  { %265 = vmatmul.f32.gmra.mxu2 %v3534_v30  ;;  %610 = vmatpush.msrb.mxu0 %v3402_v18 }
  0x6d   :  { %490 = vmatpush.msra.mxu1 %v3416_v25  ;;  %510 = vmatpush.msra.mxu2 %v3514_v49 }
  0x6e   :  { %224 = vmatmul.f32.gmra.mxu1 %v3534_v30  ;;  %530 = vmatpush.msra.mxu3 %v3468_v52 }
  0x6f   :  { %491 = vmatpush.msra.mxu1 %v3422_v28  ;;  %511 = vmatpush.msra.mxu2 %v3520_v57 }
  0x70   :  { %531 = vmatpush.msra.mxu3 %v3474_v55  ;;  %611 = vmatpush.msrb.mxu0 %v3410_v22 }
  0x71   :  { %492 = vmatpush.msra.mxu1 %v3428_v31  ;;  %512 = vmatpush.msra.mxu2 %v3528_v8 }
  0x72   :  { %532 = vmatpush.msra.mxu3 %v3492_v6  ;;  %612 = vmatpush.msrb.mxu0 %v3416_v25 }
  0x73   :  { %493 = vmatpush.msra.mxu1 %v3434_v34  ;;  %513 = vmatpush.msra.mxu2 %v3532_v21 }
  0x74   :  { %268 = vmatmul.f32.gmra.mxu2 %v3450_v41  ;;  %533 = vmatpush.msra.mxu3 %v3498_v14 }
  0x75   :  { %494 = vmatpush.msra.mxu1 %v3440_v37  ;;  %514 = vmatpush.msra.mxu2 %v3543_v53 }
  0x76   :  { %227 = vmatmul.f32.gmra.mxu1 %v3450_v41  ;;  %534 = vmatpush.msra.mxu3 %v3516_v51  ;;  %v5280_v41 = vld [vmem:[#allocation19_spill] sm:$0xff] }
  0x77   :  { %495 = vmatpush.msra.mxu1 %v3446_v40  ;;  %515 = vmatpush.msra.mxu2 %v3547_v0  ;;  %5282 = vst [vmem:[#allocation19_spill] sm:$0xff] %v3709_v39 }
  0x78   :  { %535 = vmatpush.msra.mxu3 %v3522_v60  ;;  %2879 = vset.pattern.permute.xlu1 %v5194_v24 }
  0x79   :  { %622 = vmatpush.msrb.mxu1 %v3452_v42  ;;  %642 = vmatpush.msrb.mxu2 %v3400_v16 }
  0x7a   :  { %613 = vmatpush.msrb.mxu0 %v3422_v28  ;;  %724 = vmatpush.msrb.mxu3 %v3377_v1 }
  0x7b   :  { %623 = vmatpush.msrb.mxu1 %v3460_v46  ;;  %643 = vmatpush.msrb.mxu2 %v3405_v19 }
  0x7c   :  { %271 = vmatmul.f32.gmra.mxu2 %v3478_v58  ;;  %614 = vmatpush.msrb.mxu0 %v3428_v31 }
  0x7d   :  { %624 = vmatpush.msrb.mxu1 %v3465_v50  ;;  %644 = vmatpush.msrb.mxu2 %v3408_v20 }
  0x7e   :  { %230 = vmatmul.f32.gmra.mxu1 %v3478_v58  ;;  %615 = vmatpush.msrb.mxu0 %v3434_v34  ;;  %v5281_v58 = vld [vmem:[#allocation22_spill] sm:$0xff] }
  0x7f   :  { %625 = vmatpush.msrb.mxu1 %v3472_v54  ;;  %645 = vmatpush.msrb.mxu2 %v3414_v23 }
  0x80   :  { %725 = vmatpush.msrb.mxu3 %v3380_v3  ;;  %616 = vmatpush.msrb.mxu0 %v3440_v37 }
  0x81   :  { %626 = vmatpush.msrb.mxu1 %v3480_v59  ;;  %646 = vmatpush.msrb.mxu2 %v3420_v26 }
  0x82   :  { %726 = vmatpush.msrb.mxu3 %v3382_v5  ;;  %617 = vmatpush.msrb.mxu0 %v3446_v40 }
  0x83   :  { %627 = vmatpush.msrb.mxu1 %v3484_v62  ;;  %647 = vmatpush.msrb.mxu2 %v3426_v29 }
  0x84   :  { %274 = vmatmul.f32.gmra.mxu2 %v5280_v41  ;;  %744 = vmatpush.msra.mxu0 %v3452_v42 }
  0x85   :  { %628 = vmatpush.msrb.mxu1 %v3490_v4  ;;  %648 = vmatpush.msrb.mxu2 %v3432_v32 }
  0x86   :  { %233 = vmatmul.f32.gmra.mxu1 %v5280_v41  ;;  %745 = vmatpush.msra.mxu0 %v3460_v46 }
  0x87   :  { %629 = vmatpush.msrb.mxu1 %v3496_v12  ;;  %649 = vmatpush.msrb.mxu2 %v3438_v35 }
  0x88   :  { %727 = vmatpush.msrb.mxu3 %v3385_v7  ;;  %746 = vmatpush.msra.mxu0 %v3465_v50 }
  0x89   :  { %630 = vmatpush.msrb.mxu1 %v3504_v27  ;;  %650 = vmatpush.msrb.mxu2 %v3444_v38 }
  0x8a   :  { %728 = vmatpush.msrb.mxu3 %v3388_v9  ;;  %747 = vmatpush.msra.mxu0 %v3472_v54 }
  0x8b   :  { %631 = vmatpush.msrb.mxu1 %v3508_v36  ;;  %651 = vmatpush.msrb.mxu2 %v3456_v44 }
  0x8c   :  { %277 = vmatmul.f32.gmra.mxu2 %v5281_v58  ;;  %748 = vmatpush.msra.mxu0 %v3480_v59 }
  0x8d   :  { %632 = vmatpush.msrb.mxu1 %v3514_v49  ;;  %652 = vmatpush.msrb.mxu2 %v3468_v52 }
  0x8e   :  { %236 = vmatmul.f32.gmra.mxu1 %v5281_v58  ;;  %729 = vmatpush.msrb.mxu3 %v3391_v11 }
  0x8f   :  { %633 = vmatpush.msrb.mxu1 %v3520_v57  ;;  %653 = vmatpush.msrb.mxu2 %v3474_v55 }
  0x90   :  { %749 = vmatpush.msra.mxu0 %v3484_v62  ;;  %730 = vmatpush.msrb.mxu3 %v3394_v13 }
  0x91   :  { %634 = vmatpush.msrb.mxu1 %v3528_v8  ;;  %654 = vmatpush.msrb.mxu2 %v3492_v6 }
  0x92   :  { %750 = vmatpush.msra.mxu0 %v3490_v4  ;;  %731 = vmatpush.msrb.mxu3 %v3397_v15 }
  0x93   :  { %635 = vmatpush.msrb.mxu1 %v3532_v21  ;;  %655 = vmatpush.msrb.mxu2 %v3498_v14 }
  0x94   :  { %751 = vmatpush.msra.mxu0 %v3496_v12  ;;  %732 = vmatpush.msrb.mxu3 %v3402_v18 }
  0x95   :  { %636 = vmatpush.msrb.mxu1 %v3543_v53  ;;  %656 = vmatpush.msrb.mxu2 %v3516_v51 }
  0x96   :  { %752 = vmatpush.msra.mxu0 %v3504_v27  ;;  %733 = vmatpush.msrb.mxu3 %v3410_v22 }
  0x97   :  { %637 = vmatpush.msrb.mxu1 %v3547_v0  ;;  %657 = vmatpush.msrb.mxu2 %v3522_v60 }
  0x98   :  { %753 = vmatpush.msra.mxu0 %v3508_v36  ;;  %2880 = vset.pattern.permute.xlu2 %v5194_v24 }
  0x99   :  { %734 = vmatpush.msrb.mxu3 %v3416_v25 }
  0x9a   :  { %754 = vmatpush.msra.mxu0 %v3514_v49 }
  0x9b   :  { %735 = vmatpush.msrb.mxu3 %v3422_v28 }
  0x9c   :  { %755 = vmatpush.msra.mxu0 %v3520_v57 }
  0x9d   :  { %736 = vmatpush.msrb.mxu3 %v3428_v31 }
  0x9e   :  { %756 = vmatpush.msra.mxu0 %v3528_v8 }
  0x9f   :  { %737 = vmatpush.msrb.mxu3 %v3434_v34 }
  0xa0   :  { %757 = vmatpush.msra.mxu0 %v3532_v21 }
  0xa1   :  { %738 = vmatpush.msrb.mxu3 %v3440_v37 }
  0xa2   :  { %758 = vmatpush.msra.mxu0 %v3543_v53 }
  0xa3   :  { %739 = vmatpush.msrb.mxu3 %v3446_v40 }
  0xa4   :  { %759 = vmatpush.msra.mxu0 %v3547_v0 }
  0xb3   :  { %v175_v2 = vpop.f32.mrf.mxu1 }
  0xb4   :  { %v176_v30 = vadd.f32 %v175_v2, %v3709_v39 }
  0xb7   :  { %v3712_v43 = vpop.f32.mrf.mxu2 }
  0xb8   :  { %5283 = vst [vmem:[#allocation22_spill] sm:$0xff] %v3712_v43  ;;  %v377_v56 = vpop.f32.mrf.mxu3 }
  0xb9   :  { %v420_v61 = vadd.f32 %v377_v56, %v176_v30 }
  0xbb   :  { %v2771_v17 = vmul.f32 -1.442695, %v420_v61  ;;  %v178_v33 = vpop.f32.mrf.mxu1  ;;  %v3729_v61 = vperm.slane %v150_v63, 1 }
  0xbc   :  { %v3715_v45 = vadd.f32 %v178_v33, %v3709_v39 }
  0xbd   :  { %2884 = vpow2.f32 %v2771_v17  ;;  %5290 = vst [vmem:[#allocation33_spill] sm:$0xff] %v3729_v61 }
  0xbe   :  { %5284 = vst [vmem:[#allocation27_spill] sm:$0xff] %v3715_v45 }
  0xbf   :  { %v3717_v47 = vpop.f32.mrf.mxu2 }
  0xc0   :  { %5285 = vst [vmem:[#allocation28_spill] sm:$0xff] %v3717_v47 }
  0xc3   :  { %v181_v41 = vpop.f32.mrf.mxu1  ;;  %v2885_v24 = vpop.eup %2884 }
  0xc4   :  { %v3720_v58 = vadd.f32 %v181_v41, %v3709_v39  ;;  %v424_v2 = vadd.f32 1.0, %v2885_v24 }
  0xc6   :  { %5286 = vst [vmem:[#allocation29_spill] sm:$0xff] %v3720_v58  ;;  %2886 = vrcp.f32 %v424_v2  ;;  %vm430_vm4 = vweird.f32 %v424_v2  ;;  %v434_v60 = vand.u32 2147483647, %v424_v2 }
  0xc7   :  { %v3722_v10 = vpop.f32.mrf.mxu2 }
  0xc8   :  { %5287 = vst [vmem:[#allocation30_spill] sm:$0xff] %v3722_v10  ;;  %vm435_vm6 = vcmp.eq.f32.partialorder %v434_v60, 8.507059e+37 }
  0xcb   :  { %v184_v48 = vpop.f32.mrf.mxu1 }
  0xcc   :  { %v3725_v30 = vadd.f32 %v184_v48, %v3709_v39  ;;  %v2887_v17 = vpop.eup %2886 }
  0xcd   :  { %v426_v43 = vmul.f32 %v2887_v17, %v424_v2  ;;  %vm431_vm3 = vweird.f32 %v2887_v17 }
  0xce   :  { %5288 = vst [vmem:[#allocation31_spill] sm:$0xff] %v3725_v30  ;;  %v436_v30 = vand.u32 2147483648, %v424_v2  ;;  %vm432_vm5 = vmor %vm430_vm4, %vm431_vm3 }
  0xcf   :  { %v3727_v56 = vpop.f32.mrf.mxu2  ;;  %v427_v0 = vsub.f32 1.0, %v426_v43  ;;  %v417_v43 = vpop.f32.mrf.mxu0 }
  0xd0   :  { %5289 = vst [vmem:[#allocation32_spill] sm:$0xff] %v3727_v56 }
  0xd1   :  { %v428_v24 = vmul.f32 %v2887_v17, %v427_v0  ;;  %v3741_v0 = vperm.slane %v150_v63, 2 }
  0xd3   :  { %v216_v33 = vpop.f32.mrf.mxu1  ;;  %v429_v39 = vadd.f32 %v2887_v17, %v428_v24  ;;  %5293 = vst [vmem:[#allocation36_spill] sm:$0xff] %v3741_v0 }
  0xd4   :  { %v217_v47 = vadd.f32 %v216_v33, %v3729_v61  ;;  %v3739_v33 = vld [vmem:[%s5184_s5] ss:$0 sm:$0xff] }
  0xd7   :  { %v257_v58 = vpop.f32.mrf.mxu2 }
  0xd8   :  { %v397_v41 = vpop.f32.mrf.mxu3  ;;  %v258_v2 = vadd.f32 %v257_v58, %v3741_v0 }
  0xd9   :  { %v440_v45 = vadd.f32 %v397_v41, %v217_v47  ;;  %v437_v41 = vor.u32 1.1754944e-38, %v436_v30 }
  0xdb   :  { %v2772_v10 = vmul.f32 -1.442695, %v440_v45  ;;  %v3732_v40 = vpop.f32.mrf.mxu1 }
  0xdc   :  { %5291 = vst [vmem:[#allocation34_spill] sm:$0xff] %v3732_v40 }
  0xdd   :  { %2888 = vpow2.f32 %v2772_v10  ;;  %v433_v10 = vsel %vm432_vm5, %v2887_v17, %v429_v39 }
  0xde   :  { %v438_v53 = vsel %vm435_vm6, %v437_v41, %v433_v10 }
  0xdf   :  { %v3734_v48 = vpop.f32.mrf.mxu2 }
  0xe0   :  { %5292 = vst [vmem:[#allocation35_spill] sm:$0xff] %v3734_v48  ;;  %v460_v48 = vadd.f32 %v3739_v33, %v417_v43 }
  0xe2   :  { %v461_v37 = vmul.f32 %v460_v48, %v438_v53 }
  0xe3   :  { %v2889_v56 = vpop.eup %2888  ;;  %v222_v45 = vpop.f32.mrf.mxu1 }
  0xe4   :  { %v444_v47 = vadd.f32 1.0, %v2889_v56  ;;  %v3744_v24 = vadd.f32 %v222_v45, %v3729_v61  ;;  %v462_v39 = vadd.f32 %v461_v37, %v258_v2 }
  0xe6   :  { %2890 = vrcp.f32 %v444_v47  ;;  %5294 = vst [vmem:[#allocation37_spill] sm:$0xff] %v3744_v24  ;;  %v456_v30 = vand.u32 2147483648, %v444_v47  ;;  %v454_v60 = vand.u32 2147483647, %v444_v47  ;;  %vm450_vm8 = vweird.f32 %v444_v47 }
  0xe7   :  { %v3747_v40 = vpop.f32.mrf.mxu2  ;;  %2892 = vtanh.f32 %v462_v39 }
  0xe8   :  { %5295 = vst [vmem:[#allocation38_spill] sm:$0xff] %v3747_v40  ;;  %v457_v53 = vor.u32 1.1754944e-38, %v456_v30  ;;  %vm455_vm10 = vcmp.eq.f32.partialorder %v454_v60, 8.507059e+37  ;;  %v3759_v40 = vpop.permute.xlu0 %471 }
  0xe9   :  { %5298 = vst [vmem:[#allocation41_spill] sm:$0xff] %v3759_v40  ;;  %vm473_vm11 = vcmp.eq.s32.totalorder %v3759_v40, 1 }
  0xeb   :  { %v225_v17 = vpop.f32.mrf.mxu1 }
  0xec   :  { %v2891_v56 = vpop.eup %2890  ;;  %v3751_v21 = vadd.f32 %v225_v17, %v3729_v61 }
  0xed   :  { %v446_v51 = vmul.f32 %v2891_v56, %v444_v47  ;;  %vm451_vm7 = vweird.f32 %v2891_v56  ;;  %v2893_v2 = vpop.eup %2892 }
  0xee   :  { %5296 = vst [vmem:[#allocation39_spill] sm:$0xff] %v3751_v21  ;;  %vm452_vm9 = vmor %vm450_vm8, %vm451_vm7 }
  0xef   :  { %v447_v63 = vsub.f32 1.0, %v446_v51  ;;  %v266_v45 = vpop.f32.mrf.mxu2 }
  0xf0   :  { %v3754_v43 = vadd.f32 %v266_v45, %v3741_v0 }
  0xf1   :  { %v448_v24 = vmul.f32 %v2891_v56, %v447_v63 }
  0xf3   :  { %v449_v10 = vadd.f32 %v2891_v56, %v448_v24  ;;  %v228_v51 = vpop.f32.mrf.mxu1 }
  0xf4   :  { %v3757_v41 = vadd.f32 %v228_v51, %v3729_v61 }
  0xf5   :  { %v453_v37 = vsel %vm452_vm9, %v2891_v56, %v449_v10 }
  0xf6   :  { %v458_v58 = vsel %vm455_vm10, %v457_v53, %v453_v37  ;;  %5297 = vst [vmem:[#allocation40_spill] sm:$0xff] %v3757_v41 }
  0xf7   :  { %v464_v48 = vsub.f32 1.0, %v458_v58  ;;  %v269_v17 = vpop.f32.mrf.mxu2  ;;  %v466_v21 = vmul.f32 0.0, %v458_v58 }
  0xf8   :  { %v3762_v39 = vadd.f32 %v269_v17, %v3741_v0 }
  0xf9   :  { %v465_v63 = vmul.f32 %v2893_v2, %v464_v48 }
  0xfa   :  { %5299 = vst [vmem:[#allocation42_spill] sm:$0xff] %v3762_v39 }
  0xfb   :  { %v3765_v47 = vadd.f32 %v466_v21, %v465_v63  ;;  %v231_v24 = vpop.f32.mrf.mxu1 }
  0xfc   :  { %v3778_v56 = vadd.f32 %v231_v24, %v3729_v61 }
  0xfd   :  { %5300 = vst [vmem:[#allocation43_spill] sm:$0xff] %v3765_v47  ;;  %2773 = vmatmul.msk.f32.vlgmr.msra.gmra.mxu1 %vm473_vm11, %v3765_v47  ;;  %2774 = vmatmul.msk.f32.vlgmr.msra.gmra.mxu2 %vm473_vm11, %v3765_v47 }
  0xfe   :  { %2775 = vmatmul.msk.f32.vlgmr.msra.gmra.mxu3 %vm473_vm11, %v3765_v47  ;;  %764 = vmatpush.msra.mxu1 %v3400_v16  ;;  %5301 = vst [vmem:[#allocation44_spill] sm:$0xff] %v3778_v56 }
  0xff   :  { %846 = vmatpush.msra.mxu2 %v3377_v1  ;;  %866 = vmatpush.msra.mxu3 %v3452_v42  ;;  %v272_v21 = vpop.f32.mrf.mxu2 }
 0x100   :  { %765 = vmatpush.msra.mxu1 %v3405_v19  ;;  %v3784_v30 = vadd.f32 %v272_v21, %v3741_v0  ;;  %v5311_v19 = vld [vmem:[#allocation26_spill] sm:$0xff] }
 0x101   :  { %847 = vmatpush.msra.mxu2 %v3380_v3  ;;  %867 = vmatpush.msra.mxu3 %v3460_v46 }
 0x102   :  { %5302 = vst [vmem:[#allocation45_spill] sm:$0xff] %v3784_v30  ;;  %766 = vmatpush.msra.mxu1 %v3408_v20 }
 0x103   :  { %848 = vmatpush.msra.mxu2 %v3382_v5  ;;  %868 = vmatpush.msra.mxu3 %v3465_v50  ;;  %v234_v1 = vpop.f32.mrf.mxu1 }
 0x104   :  { %767 = vmatpush.msra.mxu1 %v3414_v23  ;;  %v3796_v16 = vadd.f32 %v234_v1, %v3729_v61 }
 0x105   :  { %849 = vmatpush.msra.mxu2 %v3385_v7  ;;  %869 = vmatpush.msra.mxu3 %v3472_v54  ;;  %v5305_v7 = vld [vmem:[#allocation23_spill] sm:$0xff] }
 0x106   :  { %768 = vmatpush.msra.mxu1 %v3420_v26  ;;  %5303 = vst [vmem:[#allocation46_spill] sm:$0xff] %v3796_v16  ;;  %v5334_v16 = vld [vmem:[#allocation39_spill] sm:$0xff] }
 0x107   :  { %850 = vmatpush.msra.mxu2 %v3388_v9  ;;  %870 = vmatpush.msra.mxu3 %v3480_v59  ;;  %v275_v3 = vpop.f32.mrf.mxu2  ;;  %v5306_v9 = vld [vmem:[#allocation20_spill] sm:$0xff] }
 0x108   :  { %769 = vmatpush.msra.mxu1 %v3426_v29  ;;  %v3802_v5 = vadd.f32 %v275_v3, %v3741_v0  ;;  %v5315_v29 = vld [vmem:[#allocation34_spill] sm:$0xff] }
 0x109   :  { %851 = vmatpush.msra.mxu2 %v3391_v11  ;;  %871 = vmatpush.msra.mxu3 %v3484_v62  ;;  %v5307_v11 = vld [vmem:[#allocation17_spill] sm:$0xff] }
 0x10a   :  { %5304 = vst [vmem:[#allocation47_spill] sm:$0xff] %v3802_v5  ;;  %770 = vmatpush.msra.mxu1 %v3432_v32 }
 0x10b   :  { %852 = vmatpush.msra.mxu2 %v3394_v13  ;;  %872 = vmatpush.msra.mxu3 %v3490_v4  ;;  %v5308_v13 = vld [vmem:[#allocation25_spill] sm:$0xff]  ;;  %v3836_v20 = vpop.f32.mrf.mxu1 }
 0x10c   :  { %771 = vmatpush.msra.mxu1 %v3438_v35  ;;  %5312 = vst [vmem:[#allocation23_spill] sm:$0xff] %v3836_v20 }
 0x10d   :  { %853 = vmatpush.msra.mxu2 %v3397_v15  ;;  %873 = vmatpush.msra.mxu3 %v3496_v12  ;;  %v5309_v15 = vld [vmem:[#allocation21_spill] sm:$0xff] }
 0x10e   :  { %772 = vmatpush.msra.mxu1 %v3444_v38 }
 0x10f   :  { %854 = vmatpush.msra.mxu2 %v3402_v18  ;;  %874 = vmatpush.msra.mxu3 %v3504_v27  ;;  %v5310_v18 = vld [vmem:[#allocation18_spill] sm:$0xff] }
 0x110   :  { %773 = vmatpush.msra.mxu1 %v3456_v44  ;;  %v5316_v44 = vld [vmem:[#allocation24_spill] sm:$0xff] }
 0x111   :  { %855 = vmatpush.msra.mxu2 %v3410_v22  ;;  %875 = vmatpush.msra.mxu3 %v3508_v36  ;;  %v3838_v22 = vpop.f32.mrf.mxu2  ;;  %vm710_vm12 = vcmp.gt.s32.totalorder %v5316_v44, 2  ;;  %vm832_vm13 = vcmp.gt.s32.totalorder %v5316_v44, 3  ;;  %vm1320_vm0 = vcmp.gt.s32.totalorder %v5316_v44, 7 }
 0x112   :  { %774 = vmatpush.msra.mxu1 %v3468_v52  ;;  %5313 = vst [vmem:[#allocation20_spill] sm:$0xff] %v3838_v22 }
 0x113   :  { %856 = vmatpush.msra.mxu2 %v3416_v25  ;;  %876 = vmatpush.msra.mxu3 %v3514_v49  ;;  %v5314_v25 = vld [vmem:[#allocation27_spill] sm:$0xff] }
 0x114   :  { %775 = vmatpush.msra.mxu1 %v3474_v55  ;;  %v5317_v55 = vmov 0  }
 0x115   :  { %857 = vmatpush.msra.mxu2 %v3422_v28  ;;  %877 = vmatpush.msra.mxu3 %v3520_v57  ;;  %v711_v45 = vsel %vm710_vm12, 1, %v5317_v55  ;;  %v833_v58 = vsel %vm832_vm13, 1, %v5317_v55 }
 0x116   :  { %776 = vmatpush.msra.mxu1 %v3492_v6  ;;  %713 = vperm.xlu1 %2879, %v711_v45  }
 0x117   :  { %858 = vmatpush.msra.mxu2 %v3428_v31  ;;  %878 = vmatpush.msra.mxu3 %v3528_v8  ;;  %v220_v31 = vadd.f32 %v5315_v29, %v3729_v61 }
 0x118   :  { %777 = vmatpush.msra.mxu1 %v3498_v14 }
 0x119   :  { %859 = vmatpush.msra.mxu2 %v3434_v34  ;;  %879 = vmatpush.msra.mxu3 %v5305_v7 }
 0x11a   :  { %778 = vmatpush.msra.mxu1 %v5306_v9 }
 0x11b   :  { %860 = vmatpush.msra.mxu2 %v5307_v11  ;;  %880 = vmatpush.msra.mxu3 %v5308_v13 }
 0x11c   :  { %779 = vmatpush.msra.mxu1 %v5309_v15 }
 0x11d   :  { %861 = vmatpush.msra.mxu2 %v5310_v18  ;;  %881 = vmatpush.msra.mxu3 %v5311_v19 }
 0x11e   :  { %835 = vperm.xlu1 %2879, %v833_v58  }
 0x17a   :  { %v497_v23 = vpop.f32.mrf.mxu1 }
 0x17b   :  { %v540_v26 = vadd.f32 %v497_v23, %v5314_v25  ;;  %v5318_v23 = vld [vmem:[#allocation35_spill] sm:$0xff] }
 0x17c   :  { %v261_v25 = vadd.f32 %v5318_v23, %v3741_v0  ;;  %v3901_v23 = vld [vmem:[#allocation9 + $0x108] sm:$0xff] }
 0x17d   :  { %v2776_v28 = vmul.f32 -1.442695, %v540_v26 }
 0x17f   :  { %2894 = vpow2.f32 %v2776_v28  ;;  %v1321_v28 = vsel %vm1320_vm0, 1, %v5317_v55 }
 0x180   :  { %v517_v32 = vpop.f32.mrf.mxu2  ;;  %1323 = vperm.xlu1 %2879, %v1321_v28   ;;  %v3922_v28 = vld [vmem:[#allocation9 + $0xc0] sm:$0xff] }
 0x181   :  { %v560_v34 = vadd.f32 %v517_v32, %v220_v31  ;;  %v537_v63 = vpop.f32.mrf.mxu3 }
 0x182   :  { %v580_v18 = vadd.f32 %v3739_v33, %v537_v63  ;;  %v3874_v63 = vld [vmem:[#allocation9 + $0x170] sm:$0xff] }
 0x183   :  { %v2777_v35 = vmul.f32 -1.442695, %v560_v34 }
 0x185   :  { %v2895_v38 = vpop.eup %2894  ;;  %2896 = vpow2.f32 %v2777_v35 }
 0x186   :  { %v544_v42 = vadd.f32 1.0, %v2895_v38 }
 0x188   :  { %2898 = vrcp.f32 %v544_v42  ;;  %v556_v51 = vand.u32 2147483648, %v544_v42  ;;  %v554_v2 = vand.u32 2147483647, %v544_v42  ;;  %vm550_vm15 = vweird.f32 %v544_v42 }
 0x18a   :  { %v557_v1 = vor.u32 1.1754944e-38, %v556_v51  ;;  %vm555_vm2 = vcmp.eq.f32.partialorder %v554_v2, 8.507059e+37  ;;  %v3855_v51 = vpop.permute.xlu0 %591  ;;  %v3868_v2 = vld [vmem:[#allocation9 + $0x178] sm:$0xff] }
 0x18b   :  { %v2897_v52 = vpop.eup %2896  ;;  %5319 = vst [vmem:[#allocation17_spill] sm:$0xff] %v3855_v51  ;;  %vm593_vm7 = vcmp.eq.s32.totalorder %v3855_v51, 1 }
 0x18c   :  { %v564_v60 = vadd.f32 1.0, %v2897_v52 }
 0x18e   :  { %v2899_v10 = vpop.eup %2898  ;;  %2900 = vrcp.f32 %v564_v60  ;;  %v576_v32 = vand.u32 2147483648, %v564_v60  ;;  %v574_v34 = vand.u32 2147483647, %v564_v60  ;;  %vm570_vm4 = vweird.f32 %v564_v60 }
 0x18f   :  { %v546_v53 = vmul.f32 %v2899_v10, %v544_v42  ;;  %vm551_vm14 = vweird.f32 %v2899_v10 }
 0x190   :  { %vm552_vm1 = vmor %vm550_vm15, %vm551_vm14  ;;  %v577_v44 = vor.u32 1.1754944e-38, %v576_v32  ;;  %vm575_vm6 = vcmp.eq.f32.partialorder %v574_v34, 8.507059e+37  ;;  %v3943_v32 = vld [vmem:[#allocation9 + $0x78] sm:$0xff]  ;;  %v3950_v34 = vld [vmem:[#allocation9 + $0x60] sm:$0xff] }
 0x191   :  { %v547_v37 = vsub.f32 1.0, %v546_v53  ;;  %v474_v53 = vsel %vm473_vm11, %v3765_v47, 0.0 }
 0x193   :  { %v548_v48 = vmul.f32 %v2899_v10, %v547_v37 }
 0x194   :  { %v2901_v17 = vpop.eup %2900 }
 0x195   :  { %v566_v24 = vmul.f32 %v2901_v17, %v564_v60  ;;  %v549_v21 = vadd.f32 %v2899_v10, %v548_v48  ;;  %vm571_vm3 = vweird.f32 %v2901_v17 }
 0x196   :  { %vm572_vm5 = vmor %vm570_vm4, %vm571_vm3 }
 0x197   :  { %v567_v3 = vsub.f32 1.0, %v566_v24  ;;  %v553_v11 = vsel %vm552_vm1, %v2899_v10, %v549_v21  ;;  %v3877_v24 = vld [vmem:[#allocation9 + $0x160] sm:$0xff]  ;;  %v3880_v21 = vld [vmem:[#allocation9 + $0x150] sm:$0xff] }
 0x198   :  { %v558_v26 = vsel %vm555_vm2, %v557_v1, %v553_v11  ;;  %v3884_v1 = vld [vmem:[#allocation9 + $0x148] sm:$0xff]  ;;  %v3891_v11 = vld [vmem:[#allocation9 + $0x130] sm:$0xff] }
 0x199   :  { %v568_v29 = vmul.f32 %v2901_v17, %v567_v3  ;;  %v581_v31 = vmul.f32 %v580_v18, %v558_v26  ;;  %v3887_v3 = vld [vmem:[#allocation9 + $0x138] sm:$0xff]  ;;  %v3894_v18 = vld [vmem:[#allocation9 + $0x120] sm:$0xff] }
 0x19a   :  { %v3915_v26 = vld [vmem:[#allocation9 + $0xd8] sm:$0xff] }
 0x19b   :  { %v582_v35 = vadd.f32 %v581_v31, %v261_v25  ;;  %v569_v38 = vadd.f32 %v2901_v17, %v568_v29  ;;  %v3908_v25 = vld [vmem:[#allocation9 + $0xf0] sm:$0xff]  ;;  %v3929_v29 = vld [vmem:[#allocation9 + $0xa8] sm:$0xff] }
 0x19c   :  { %v3936_v31 = vld [vmem:[#allocation9 + $0x90] sm:$0xff] }
 0x19d   :  { %2902 = vtanh.f32 %v582_v35  ;;  %v573_v42 = vsel %vm572_vm5, %v2901_v17, %v569_v38  ;;  %v3871_v17 = vld [vmem:[#allocation9 + $0x168] sm:$0xff]  ;;  %v3965_v35 = vld [vmem:[#allocation9 + $0x18] sm:$0xff]  ;;  %v5325_v38 = vld [vmem:[#allocation37_spill] sm:$0xff] }
 0x19e   :  { %v578_v52 = vsel %vm575_vm6, %v577_v44, %v573_v42  ;;  %5322 = vst [vmem:[#allocation18_spill] sm:$0xff] %v3965_v35 }
 0x19f   :  { %v584_v45 = vsub.f32 1.0, %v578_v52  ;;  %v586_v58 = vmul.f32 %v578_v52, %v474_v53 }
 0x1a3   :  { %v2903_v10 = vpop.eup %2902 }
 0x1a4   :  { %v585_v37 = vmul.f32 %v2903_v10, %v584_v45 }
 0x1a6   :  { %v3857_v48 = vadd.f32 %v586_v58, %v585_v37 }
 0x1a8   :  { %5320 = vst [vmem:[#allocation25_spill] sm:$0xff] %v3857_v48  ;;  %v3863_v60 = vsel %vm593_vm7, %v3857_v48, %v474_v53  ;;  %v5335_v48 = vld [vmem:[#allocation31_spill] sm:$0xff] }
 0x1a9   :  { %618 = vmatmul.f32.vlgmr.msrb.gmra.mxu0 %v3863_v60  ;;  %638 = vmatmul.f32.vlgmr.msrb.gmra.mxu1 %v3863_v60 }
 0x1aa   :  { %658 = vmatmul.f32.vlgmr.msrb.gmra.mxu2 %v3863_v60  ;;  %886 = vmatpush.msrb.mxu0 %v3868_v2 }
 0x1ab   :  { %968 = vmatpush.msrb.mxu1 %v3871_v17  ;;  %988 = vmatpush.msrb.mxu2 %v3874_v63 }
 0x1ac   :  { %887 = vmatpush.msrb.mxu0 %v3877_v24 }
 0x1ad   :  { %969 = vmatpush.msrb.mxu1 %v3880_v21  ;;  %989 = vmatpush.msrb.mxu2 %v3460_v46  ;;  %v3898_v46 = vld [vmem:[#allocation9 + $0x118] sm:$0xff] }
 0x1ae   :  { %888 = vmatpush.msrb.mxu0 %v3884_v1 }
 0x1af   :  { %970 = vmatpush.msrb.mxu1 %v3887_v3  ;;  %990 = vmatpush.msrb.mxu2 %v3465_v50  ;;  %v3905_v50 = vld [vmem:[#allocation9 + $0x100] sm:$0xff] }
 0x1b0   :  { %889 = vmatpush.msrb.mxu0 %v3891_v11 }
 0x1b1   :  { %971 = vmatpush.msrb.mxu1 %v3894_v18  ;;  %991 = vmatpush.msrb.mxu2 %v3472_v54  ;;  %v3912_v54 = vld [vmem:[#allocation9 + $0xe8] sm:$0xff] }
 0x1b2   :  { %890 = vmatpush.msrb.mxu0 %v3898_v46 }
 0x1b3   :  { %972 = vmatpush.msrb.mxu1 %v3901_v23  ;;  %992 = vmatpush.msrb.mxu2 %v3480_v59  ;;  %v3919_v59 = vld [vmem:[#allocation9 + $0xd0] sm:$0xff] }
 0x1b4   :  { %891 = vmatpush.msrb.mxu0 %v3905_v50 }
 0x1b5   :  { %973 = vmatpush.msrb.mxu1 %v3908_v25  ;;  %993 = vmatpush.msrb.mxu2 %v3484_v62  ;;  %v3926_v62 = vld [vmem:[#allocation9 + $0xb8] sm:$0xff] }
 0x1b6   :  { %892 = vmatpush.msrb.mxu0 %v3912_v54 }
 0x1b7   :  { %974 = vmatpush.msrb.mxu1 %v3915_v26  ;;  %994 = vmatpush.msrb.mxu2 %v3490_v4  ;;  %v3933_v4 = vld [vmem:[#allocation9 + $0xa0] sm:$0xff] }
 0x1b8   :  { %893 = vmatpush.msrb.mxu0 %v3919_v59 }
 0x1b9   :  { %975 = vmatpush.msrb.mxu1 %v3922_v28  ;;  %995 = vmatpush.msrb.mxu2 %v3496_v12  ;;  %v3940_v12 = vld [vmem:[#allocation9 + $0x88] sm:$0xff] }
 0x1ba   :  { %894 = vmatpush.msrb.mxu0 %v3926_v62 }
 0x1bb   :  { %976 = vmatpush.msrb.mxu1 %v3929_v29  ;;  %996 = vmatpush.msrb.mxu2 %v3504_v27  ;;  %v3947_v27 = vld [vmem:[#allocation9 + $0x70] sm:$0xff] }
 0x1bc   :  { %895 = vmatpush.msrb.mxu0 %v3933_v4 }
 0x1bd   :  { %977 = vmatpush.msrb.mxu1 %v3936_v31  ;;  %997 = vmatpush.msrb.mxu2 %v3508_v36  ;;  %v3955_v36 = vld [vmem:[#allocation9 + $0x48] sm:$0xff] }
 0x1be   :  { %896 = vmatpush.msrb.mxu0 %v3940_v12 }
 0x1bf   :  { %978 = vmatpush.msrb.mxu1 %v3943_v32  ;;  %998 = vmatpush.msrb.mxu2 %v3514_v49  ;;  %v3960_v49 = vld [vmem:[#allocation9 + $0x30] sm:$0xff] }
 0x1c0   :  { %897 = vmatpush.msrb.mxu0 %v3947_v27  ;;  %5321 = vst [vmem:[#allocation21_spill] sm:$0xff] %v3960_v49 }
 0x1c1   :  { %979 = vmatpush.msrb.mxu1 %v3950_v34  ;;  %999 = vmatpush.msrb.mxu2 %v3520_v57 }
 0x1c2   :  { %898 = vmatpush.msrb.mxu0 %v3492_v6  ;;  %v3970_v6 = vld [vmem:[#allocation9] sm:$0xff] }
 0x1c3   :  { %980 = vmatpush.msrb.mxu1 %v3955_v36  ;;  %1000 = vmatpush.msrb.mxu2 %v3528_v8  ;;  %5323 = vst [vmem:[#allocation26_spill] sm:$0xff] %v3970_v6  ;;  %v5324_v8 = vld [vmem:[#allocation29_spill] sm:$0xff] }
 0x1c4   :  { %899 = vmatpush.msrb.mxu0 %v3498_v14 }
 0x1c5   :  { %981 = vmatpush.msrb.mxu1 %v3960_v49  ;;  %1001 = vmatpush.msrb.mxu2 %v5305_v7 }
 0x1c6   :  { %900 = vmatpush.msrb.mxu0 %v5306_v9 }
 0x1c7   :  { %982 = vmatpush.msrb.mxu1 %v3965_v35  ;;  %1002 = vmatpush.msrb.mxu2 %v5308_v13 }
 0x1c8   :  { %901 = vmatpush.msrb.mxu0 %v5309_v15 }
 0x1c9   :  { %983 = vmatpush.msrb.mxu1 %v3970_v6  ;;  %1003 = vmatpush.msrb.mxu2 %v5311_v19 }
 0x226   :  { %v619_v14 = vpop.f32.mrf.mxu0  ;;  %v639_v57 = vpop.f32.mrf.mxu1 }
 0x227   :  { %v662_v7 = vadd.f32 %v619_v14, %v5324_v8  ;;  %v682_v9 = vadd.f32 %v639_v57, %v5325_v38 }
 0x229   :  { %v2778_v42 = vmul.f32 -1.442695, %v662_v7  ;;  %v2779_v44 = vmul.f32 -1.442695, %v682_v9 }
 0x22b   :  { %2904 = vpow2.f32 %v2778_v42 }
 0x22c   :  { %2906 = vpow2.f32 %v2779_v44 }
 0x22d   :  { %v659_v7 = vpop.f32.mrf.mxu2 }
 0x22e   :  { %v702_v44 = vadd.f32 %v3739_v33, %v659_v7 }
 0x231   :  { %v2905_v52 = vpop.eup %2904 }
 0x232   :  { %v2907_v13 = vpop.eup %2906  ;;  %v666_v45 = vadd.f32 1.0, %v2905_v52 }
 0x233   :  { %v686_v15 = vadd.f32 1.0, %v2907_v13 }
 0x234   :  { %2908 = vrcp.f32 %v666_v45  ;;  %v678_v20 = vand.u32 2147483648, %v666_v45  ;;  %v676_v57 = vand.u32 2147483647, %v666_v45  ;;  %vm672_vm9 = vweird.f32 %v666_v45 }
 0x235   :  { %2910 = vrcp.f32 %v686_v15  ;;  %v698_v61 = vand.u32 2147483648, %v686_v15  ;;  %vm692_vm14 = vweird.f32 %v686_v15  ;;  %v696_v5 = vand.u32 2147483647, %v686_v15 }
 0x236   :  { %v679_v9 = vor.u32 1.1754944e-38, %v678_v20  ;;  %vm677_vm12 = vcmp.eq.f32.partialorder %v676_v57, 8.507059e+37 }
 0x237   :  { %vm697_vm0 = vcmp.eq.f32.partialorder %v696_v5, 8.507059e+37  ;;  %v4004_v5 = vld [vmem:[#allocation9 + $0x140] sm:$0xff] }
 0x23a   :  { %v2909_v10 = vpop.eup %2908 }
 0x23b   :  { %v2911_v53 = vpop.eup %2910  ;;  %v668_v37 = vmul.f32 %v2909_v10, %v666_v45  ;;  %vm673_vm8 = vweird.f32 %v2909_v10  ;;  %v699_v45 = vor.u32 1.1754944e-38, %v698_v61  ;;  %v3999_v61 = vld [vmem:[#allocation9 + $0x158] sm:$0xff] }
 0x23c   :  { %v688_v19 = vmul.f32 %v2911_v53, %v686_v15  ;;  %vm674_vm10 = vmor %vm672_vm9, %vm673_vm8  ;;  %vm693_vm13 = vweird.f32 %v2911_v53 }
 0x23d   :  { %v669_v58 = vsub.f32 1.0, %v668_v37  ;;  %v5326_v37 = vld [vmem:[#allocation38_spill] sm:$0xff]  ;;  %vm694_vm15 = vmor %vm692_vm14, %vm693_vm13 }
 0x23e   :  { %v689_v22 = vsub.f32 1.0, %v688_v19  ;;  %v264_v19 = vadd.f32 %v5326_v37, %v3741_v0  ;;  %v4039_v37 = vld [vmem:[#allocation9 + $0x98] sm:$0xff] }
 0x23f   :  { %v670_v14 = vmul.f32 %v2909_v10, %v669_v58 }
 0x240   :  { %v690_v8 = vmul.f32 %v2911_v53, %v689_v22 }
 0x241   :  { %v671_v38 = vadd.f32 %v2909_v10, %v670_v14 }
 0x242   :  { %v691_v52 = vadd.f32 %v2911_v53, %v690_v8  ;;  %v3979_v8 = vpop.permute.xlu1 %713 }
 0x243   :  { %v675_v42 = vsel %vm674_vm10, %v2909_v10, %v671_v38  ;;  %5327 = vst [vmem:[#allocation27_spill] sm:$0xff] %v3979_v8  ;;  %vm715_vm1 = vcmp.eq.s32.totalorder %v3979_v8, 1 }
 0x244   :  { %v680_v13 = vsel %vm677_vm12, %v679_v9, %v675_v42  ;;  %v695_v14 = vsel %vm694_vm15, %v2911_v53, %v691_v52  ;;  %v4014_v53 = vld [vmem:[#allocation9 + $0x110] sm:$0xff]  ;;  %v4019_v42 = vld [vmem:[#allocation9 + $0xf8] sm:$0xff]  ;;  %v4029_v52 = vld [vmem:[#allocation9 + $0xc8] sm:$0xff] }
 0x245   :  { %v703_v58 = vmul.f32 %v702_v44, %v680_v13  ;;  %v700_v20 = vsel %vm697_vm0, %v699_v45, %v695_v14  ;;  %v4024_v44 = vld [vmem:[#allocation9 + $0xe0] sm:$0xff]  ;;  %v4034_v13 = vld [vmem:[#allocation9 + $0xb0] sm:$0xff] }
 0x246   :  { %v706_v10 = vsub.f32 1.0, %v700_v20  ;;  %v708_v38 = vmul.f32 %v700_v20, %v3863_v60  ;;  %v4056_v14 = vld [vmem:[#allocation9 + $0x50] sm:$0xff]  ;;  %v4059_v45 = vld [vmem:[#allocation9 + $0x40] sm:$0xff]  ;;  %v4063_v20 = vld [vmem:[#allocation9 + $0x38] sm:$0xff] }
 0x247   :  { %v704_v22 = vadd.f32 %v703_v58, %v264_v19  ;;  %v4044_v19 = vld [vmem:[#allocation9 + $0x80] sm:$0xff]  ;;  %v4049_v58 = vld [vmem:[#allocation9 + $0x68] sm:$0xff]  ;;  %5329 = vst [vmem:[#allocation24_spill] sm:$0xff] %v4063_v20 }
 0x249   :  { %2912 = vtanh.f32 %v704_v22  ;;  %v4052_v22 = vld [vmem:[#allocation9 + $0x58] sm:$0xff] }
 0x24f   :  { %v2913_v57 = vpop.eup %2912 }
 0x250   :  { %v707_v7 = vmul.f32 %v2913_v57, %v706_v10  ;;  %v4066_v10 = vld [vmem:[#allocation9 + $0x28] sm:$0xff]  ;;  %v4070_v57 = vld [vmem:[#allocation9 + $0x20] sm:$0xff] }
 0x251   :  { %5330 = vst [vmem:[#allocation35_spill] sm:$0xff] %v4066_v10 }
 0x252   :  { %v3983_v9 = vadd.f32 %v708_v38, %v707_v7  ;;  %5331 = vst [vmem:[#allocation29_spill] sm:$0xff] %v4070_v57  ;;  %v4073_v7 = vld [vmem:[#allocation9 + $0x10] sm:$0xff]  ;;  %v4077_v38 = vld [vmem:[#allocation9 + $0x8] sm:$0xff] }
 0x253   :  { %5332 = vst [vmem:[#allocation37_spill] sm:$0xff] %v4073_v7 }
 0x254   :  { %5328 = vst [vmem:[#allocation34_spill] sm:$0xff] %v3983_v9  ;;  %v3989_v15 = vsel %vm715_vm1, %v3983_v9, %v3863_v60  ;;  %v4009_v60 = vld [vmem:[#allocation9 + $0x128] sm:$0xff] }
 0x255   :  { %740 = vmatmul.f32.vlgmr.msrb.gmra.mxu3 %v3989_v15  ;;  %760 = vmatmul.f32.vlgmr.msra.gmra.mxu0 %v3989_v15  ;;  %5333 = vst [vmem:[#allocation38_spill] sm:$0xff] %v4077_v38 }
 0x256   :  { %780 = vmatmul.f32.vlgmr.msra.gmra.mxu1 %v3989_v15  ;;  %1008 = vmatpush.msrb.mxu3 %v3868_v2 }
 0x257   :  { %1090 = vmatpush.msra.mxu0 %v3871_v17  ;;  %1110 = vmatpush.msra.mxu1 %v3874_v63 }
 0x258   :  { %1009 = vmatpush.msrb.mxu3 %v3877_v24 }
 0x259   :  { %1091 = vmatpush.msra.mxu0 %v3880_v21  ;;  %1111 = vmatpush.msra.mxu1 %v3999_v61 }
 0x25a   :  { %1010 = vmatpush.msrb.mxu3 %v3884_v1 }
 0x25b   :  { %1092 = vmatpush.msra.mxu0 %v3887_v3  ;;  %1112 = vmatpush.msra.mxu1 %v4004_v5 }
 0x25c   :  { %1011 = vmatpush.msrb.mxu3 %v3891_v11 }
 0x25d   :  { %1093 = vmatpush.msra.mxu0 %v3894_v18  ;;  %1113 = vmatpush.msra.mxu1 %v4009_v60 }
 0x25e   :  { %1012 = vmatpush.msrb.mxu3 %v3898_v46 }
 0x25f   :  { %1094 = vmatpush.msra.mxu0 %v3901_v23  ;;  %1114 = vmatpush.msra.mxu1 %v4014_v53 }
 0x260   :  { %1013 = vmatpush.msrb.mxu3 %v3905_v50 }
 0x261   :  { %1095 = vmatpush.msra.mxu0 %v3908_v25  ;;  %1115 = vmatpush.msra.mxu1 %v4019_v42 }
 0x262   :  { %1014 = vmatpush.msrb.mxu3 %v3912_v54 }
 0x263   :  { %1096 = vmatpush.msra.mxu0 %v3915_v26  ;;  %1116 = vmatpush.msra.mxu1 %v4024_v44 }
 0x264   :  { %1015 = vmatpush.msrb.mxu3 %v3919_v59 }
 0x265   :  { %1097 = vmatpush.msra.mxu0 %v3922_v28  ;;  %1117 = vmatpush.msra.mxu1 %v4029_v52 }
 0x266   :  { %1016 = vmatpush.msrb.mxu3 %v3926_v62 }
 0x267   :  { %1098 = vmatpush.msra.mxu0 %v3929_v29  ;;  %1118 = vmatpush.msra.mxu1 %v4034_v13 }
 0x268   :  { %1017 = vmatpush.msrb.mxu3 %v3933_v4 }
 0x269   :  { %1099 = vmatpush.msra.mxu0 %v3936_v31  ;;  %1119 = vmatpush.msra.mxu1 %v4039_v37 }
 0x26a   :  { %1018 = vmatpush.msrb.mxu3 %v3940_v12 }
 0x26b   :  { %1100 = vmatpush.msra.mxu0 %v3943_v32  ;;  %1120 = vmatpush.msra.mxu1 %v4044_v19 }
 0x26c   :  { %1019 = vmatpush.msrb.mxu3 %v3947_v27 }
 0x26d   :  { %1101 = vmatpush.msra.mxu0 %v3950_v34  ;;  %1121 = vmatpush.msra.mxu1 %v4049_v58 }
 0x26e   :  { %1020 = vmatpush.msrb.mxu3 %v4052_v22 }
 0x26f   :  { %1102 = vmatpush.msra.mxu0 %v3955_v36  ;;  %1122 = vmatpush.msra.mxu1 %v4056_v14 }
 0x270   :  { %1021 = vmatpush.msrb.mxu3 %v4059_v45 }
 0x271   :  { %1103 = vmatpush.msra.mxu0 %v3960_v49  ;;  %1123 = vmatpush.msra.mxu1 %v4063_v20 }
 0x272   :  { %1022 = vmatpush.msrb.mxu3 %v4066_v10 }
 0x273   :  { %1104 = vmatpush.msra.mxu0 %v3965_v35  ;;  %1124 = vmatpush.msra.mxu1 %v4070_v57 }
 0x274   :  { %1023 = vmatpush.msrb.mxu3 %v4073_v7 }
 0x275   :  { %1105 = vmatpush.msra.mxu0 %v3970_v6  ;;  %1125 = vmatpush.msra.mxu1 %v4077_v38  ;;  %v3124_v38 = vld [vmem:[%s5179_s0] sm:$0xff] }
 0x276   :  { %vm954_vm2 = vcmp.gt.s32.totalorder %v3124_v38, 4  ;;  %vm1076_vm3 = vcmp.gt.s32.totalorder %v3124_v38, 5 }
 0x2d2   :  { %v761_v0 = vpop.f32.mrf.mxu0 }
 0x2d3   :  { %v804_v8 = vadd.f32 %v761_v0, %v5334_v16  ;;  %v955_v0 = vsel %vm954_vm2, 1, %v5317_v55  ;;  %v781_v57 = vpop.f32.mrf.mxu1 }
 0x2d4   :  { %957 = vperm.xlu2 %2880, %v955_v0   ;;  %v824_v0 = vadd.f32 %v3739_v33, %v781_v57 }
 0x2d5   :  { %v2781_v9 = vmul.f32 -1.442695, %v804_v8 }
 0x2d7   :  { %2914 = vpow2.f32 %v2781_v9 }
 0x2d8   :  { %v741_v51 = vpop.f32.mrf.mxu3 }
 0x2d9   :  { %v784_v40 = vadd.f32 %v741_v51, %v5335_v48 }
 0x2db   :  { %v2780_v47 = vmul.f32 -1.442695, %v784_v40 }
 0x2dd   :  { %v2915_v30 = vpop.eup %2914  ;;  %2916 = vpow2.f32 %v2780_v47 }
 0x2de   :  { %v808_v56 = vadd.f32 1.0, %v2915_v30  ;;  %v1077_v30 = vsel %vm1076_vm3, 1, %v5317_v55 }
 0x2df   :  { %1079 = vperm.xlu2 %2880, %v1077_v30  }
 0x2e0   :  { %2918 = vrcp.f32 %v808_v56  ;;  %vm814_vm10 = vweird.f32 %v808_v56 }
 0x2e3   :  { %v2917_v39 = vpop.eup %2916 }
 0x2e4   :  { %v788_v41 = vadd.f32 1.0, %v2917_v39 }
 0x2e6   :  { %2920 = vrcp.f32 %v788_v41  ;;  %v2919_v6 = vpop.eup %2918  ;;  %v800_v48 = vand.u32 2147483648, %v788_v41  ;;  %v798_v9 = vand.u32 2147483647, %v788_v41  ;;  %vm794_vm5 = vweird.f32 %v788_v41 }
 0x2e7   :  { %v810_v16 = vmul.f32 %v2919_v6, %v808_v56  ;;  %vm815_vm9 = vweird.f32 %v2919_v6 }
 0x2e8   :  { %v801_v10 = vor.u32 1.1754944e-38, %v800_v48  ;;  %vm799_vm8 = vcmp.eq.f32.partialorder %v798_v9, 8.507059e+37  ;;  %vm816_vm12 = vmor %vm814_vm10, %vm815_vm9 }
 0x2e9   :  { %v811_v51 = vsub.f32 1.0, %v810_v16 }
 0x2eb   :  { %v812_v7 = vmul.f32 %v2919_v6, %v811_v51 }
 0x2ec   :  { %v2921_v8 = vpop.eup %2920 }
 0x2ed   :  { %v790_v40 = vmul.f32 %v2921_v8, %v788_v41  ;;  %vm795_vm4 = vweird.f32 %v2921_v8  ;;  %v813_v38 = vadd.f32 %v2919_v6, %v812_v7  ;;  %v4090_v7 = vpop.permute.xlu1 %835 }
 0x2ee   :  { %vm796_vm6 = vmor %vm794_vm5, %vm795_vm4  ;;  %5336 = vst [vmem:[#allocation39_spill] sm:$0xff] %v4090_v7  ;;  %vm837_vm14 = vcmp.eq.s32.totalorder %v4090_v7, 1 }
 0x2ef   :  { %v791_v47 = vsub.f32 1.0, %v790_v40  ;;  %v820_v40 = vand.u32 2147483648, %v808_v56  ;;  %v817_v49 = vsel %vm816_vm12, %v2919_v6, %v813_v38 }
 0x2f1   :  { %v792_v39 = vmul.f32 %v2921_v8, %v791_v47  ;;  %v818_v47 = vand.u32 2147483647, %v808_v56  ;;  %v821_v30 = vor.u32 1.1754944e-38, %v820_v40  ;;  %v5337_v56 = vld [vmem:[#allocation21_spill] sm:$0xff] }
 0x2f3   :  { %v793_v35 = vadd.f32 %v2921_v8, %v792_v39  ;;  %vm819_vm13 = vcmp.eq.f32.partialorder %v818_v47, 8.507059e+37 }
 0x2f4   :  { %v822_v41 = vsel %vm819_vm13, %v821_v30, %v817_v49 }
 0x2f5   :  { %v797_v20 = vsel %vm796_vm6, %v2921_v8, %v793_v35  ;;  %v828_v48 = vsub.f32 1.0, %v822_v41  ;;  %v830_v35 = vmul.f32 %v822_v41, %v3989_v15 }
 0x2f6   :  { %v802_v16 = vsel %vm799_vm8, %v801_v10, %v797_v20 }
 0x2f7   :  { %v825_v55 = vmul.f32 %v824_v0, %v802_v16 }
 0x2f9   :  { %v826_v51 = vadd.f32 %v825_v55, %v3754_v43 }
 0x2fb   :  { %2922 = vtanh.f32 %v826_v51 }
 0x301   :  { %v2923_v39 = vpop.eup %2922 }
 0x302   :  { %v829_v57 = vmul.f32 %v2923_v39, %v828_v48  ;;  %v5348_v48 = vld [vmem:[#allocation42_spill] sm:$0xff] }
 0x304   :  { %v4092_v20 = vadd.f32 %v830_v35, %v829_v57 }
 0x306   :  { %v4099_v43 = vsel %vm837_vm14, %v4092_v20, %v3989_v15 }
 0x307   :  { %862 = vmatmul.f32.vlgmr.msra.gmra.mxu2 %v4099_v43  ;;  %882 = vmatmul.f32.vlgmr.msra.gmra.mxu3 %v4099_v43 }
 0x308   :  { %902 = vmatmul.f32.vlgmr.msrb.gmra.mxu0 %v4099_v43  ;;  %1130 = vmatpush.msra.mxu2 %v3868_v2 }
 0x309   :  { %1212 = vmatpush.msra.mxu3 %v3871_v17  ;;  %1232 = vmatpush.msrb.mxu0 %v3874_v63  ;;  %v5338_v17 = vld [vmem:[#allocation24_spill] sm:$0xff]  ;;  %v5339_v63 = vld [vmem:[#allocation35_spill] sm:$0xff] }
 0x30a   :  { %1131 = vmatpush.msra.mxu2 %v3877_v24 }
 0x30b   :  { %1213 = vmatpush.msra.mxu3 %v3880_v21  ;;  %1233 = vmatpush.msrb.mxu0 %v3999_v61  ;;  %v5340_v21 = vld [vmem:[#allocation18_spill] sm:$0xff] }
 0x30c   :  { %1132 = vmatpush.msra.mxu2 %v3884_v1 }
 0x30d   :  { %1214 = vmatpush.msra.mxu3 %v3887_v3  ;;  %1234 = vmatpush.msrb.mxu0 %v4004_v5  ;;  %v5341_v3 = vld [vmem:[#allocation29_spill] sm:$0xff] }
 0x30e   :  { %1133 = vmatpush.msra.mxu2 %v3891_v11 }
 0x30f   :  { %1215 = vmatpush.msra.mxu3 %v3894_v18  ;;  %1235 = vmatpush.msrb.mxu0 %v4009_v60  ;;  %v5342_v18 = vld [vmem:[#allocation37_spill] sm:$0xff] }
 0x310   :  { %1134 = vmatpush.msra.mxu2 %v3898_v46 }
 0x311   :  { %1216 = vmatpush.msra.mxu3 %v3901_v23  ;;  %1236 = vmatpush.msrb.mxu0 %v4014_v53  ;;  %v5343_v23 = vld [vmem:[#allocation26_spill] sm:$0xff] }
 0x312   :  { %1135 = vmatpush.msra.mxu2 %v3905_v50 }
 0x313   :  { %1217 = vmatpush.msra.mxu3 %v3908_v25  ;;  %1237 = vmatpush.msrb.mxu0 %v4019_v42  ;;  %v5344_v25 = vld [vmem:[#allocation38_spill] sm:$0xff] }
 0x314   :  { %1136 = vmatpush.msra.mxu2 %v3912_v54 }
 0x315   :  { %1218 = vmatpush.msra.mxu3 %v3915_v26  ;;  %1238 = vmatpush.msrb.mxu0 %v4024_v44  ;;  %v5345_v26 = vld [vmem:[#allocation19_spill] sm:$0xff] }
 0x316   :  { %1137 = vmatpush.msra.mxu2 %v3919_v59 }
 0x317   :  { %1219 = vmatpush.msra.mxu3 %v3922_v28  ;;  %1239 = vmatpush.msrb.mxu0 %v4029_v52  ;;  %v5346_v28 = vld [vmem:[#allocation22_spill] sm:$0xff] }
 0x318   :  { %1138 = vmatpush.msra.mxu2 %v3926_v62 }
 0x319   :  { %1220 = vmatpush.msra.mxu3 %v3929_v29  ;;  %1240 = vmatpush.msrb.mxu0 %v4034_v13  ;;  %v188_v29 = vadd.f32 %v5346_v28, %v5345_v26 }
 0x31a   :  { %1139 = vmatpush.msra.mxu2 %v3933_v4 }
 0x31b   :  { %1221 = vmatpush.msra.mxu3 %v3936_v31  ;;  %1241 = vmatpush.msrb.mxu0 %v4039_v37 }
 0x31c   :  { %1140 = vmatpush.msra.mxu2 %v3940_v12 }
 0x31d   :  { %1222 = vmatpush.msra.mxu3 %v3943_v32  ;;  %1242 = vmatpush.msrb.mxu0 %v4044_v19 }
 0x31e   :  { %1141 = vmatpush.msra.mxu2 %v3947_v27 }
 0x31f   :  { %1223 = vmatpush.msra.mxu3 %v3950_v34  ;;  %1243 = vmatpush.msrb.mxu0 %v4049_v58 }
 0x320   :  { %1142 = vmatpush.msra.mxu2 %v4052_v22 }
 0x321   :  { %1224 = vmatpush.msra.mxu3 %v3955_v36  ;;  %1244 = vmatpush.msrb.mxu0 %v4056_v14  ;;  %v5347_v36 = vld [vmem:[#allocation40_spill] sm:$0xff] }
 0x322   :  { %1143 = vmatpush.msra.mxu2 %v4059_v45 }
 0x323   :  { %1225 = vmatpush.msra.mxu3 %v5337_v56  ;;  %1245 = vmatpush.msrb.mxu0 %v5338_v17 }
 0x324   :  { %1144 = vmatpush.msra.mxu2 %v5339_v63 }
 0x325   :  { %1226 = vmatpush.msra.mxu3 %v5340_v21  ;;  %1246 = vmatpush.msrb.mxu0 %v5341_v3 }
 0x326   :  { %1145 = vmatpush.msra.mxu2 %v5342_v18 }
 0x327   :  { %1227 = vmatpush.msra.mxu3 %v5343_v23  ;;  %1247 = vmatpush.msrb.mxu0 %v5344_v25 }
 0x385   :  { %v903_v8 = vpop.f32.mrf.mxu0 }
 0x386   :  { %v946_v16 = vadd.f32 %v3739_v33, %v903_v8  ;;  %v4157_v33 = vpop.permute.xlu2 %957 }
 0x387   :  { %5349 = vst [vmem:[#allocation31_spill] sm:$0xff] %v4157_v33  ;;  %vm959_vm9 = vcmp.eq.s32.totalorder %v4157_v33, 1 }
 0x38a   :  { %v863_v31 = vpop.f32.mrf.mxu2  ;;  %v883_v32 = vpop.f32.mrf.mxu3 }
 0x38b   :  { %v906_v34 = vadd.f32 %v863_v31, %v188_v29  ;;  %v926_v49 = vadd.f32 %v883_v32, %v5347_v36  ;;  %v1356_v31 = vld [vmem:[#allocation7 + $0x210] sm:$0xff]  ;;  %v1353_v32 = vld [vmem:[#allocation7 + $0x1f8] sm:$0xff] }
 0x38d   :  { %v2782_v6 = vmul.f32 -1.442695, %v906_v34  ;;  %v2783_v15 = vmul.f32 -1.442695, %v926_v49  ;;  %v1350_v49 = vld [vmem:[#allocation7 + $0x1e0] sm:$0xff] }
 0x38f   :  { %2924 = vpow2.f32 %v2782_v6  ;;  %v1347_v6 = vld [vmem:[#allocation7 + $0x1c8] sm:$0xff] }
 0x390   :  { %2926 = vpow2.f32 %v2783_v15  ;;  %v1344_v15 = vld [vmem:[#allocation7 + $0x1b0] sm:$0xff] }
 0x395   :  { %v2925_v61 = vpop.eup %2924 }
 0x396   :  { %v2927_v5 = vpop.eup %2926  ;;  %v910_v60 = vadd.f32 1.0, %v2925_v61 }
 0x397   :  { %v930_v53 = vadd.f32 1.0, %v2927_v5 }
 0x398   :  { %2928 = vrcp.f32 %v910_v60  ;;  %v922_v19 = vand.u32 2147483648, %v910_v60  ;;  %v920_v10 = vand.u32 2147483647, %v910_v60  ;;  %vm916_vm0 = vweird.f32 %v910_v60 }
 0x399   :  { %2930 = vrcp.f32 %v930_v53  ;;  %v942_v30 = vand.u32 2147483648, %v930_v53  ;;  %vm936_vm5 = vweird.f32 %v930_v53  ;;  %v940_v41 = vand.u32 2147483647, %v930_v53 }
 0x39a   :  { %v923_v38 = vor.u32 1.1754944e-38, %v922_v19  ;;  %vm921_vm3 = vcmp.eq.f32.partialorder %v920_v10, 8.507059e+37 }
 0x39b   :  { %v943_v35 = vor.u32 1.1754944e-38, %v942_v30  ;;  %vm941_vm8 = vcmp.eq.f32.partialorder %v940_v41, 8.507059e+37 }
 0x39e   :  { %v2929_v42 = vpop.eup %2928 }
 0x39f   :  { %v2931_v44 = vpop.eup %2930  ;;  %v912_v52 = vmul.f32 %v2929_v42, %v910_v60  ;;  %vm917_vm15 = vweird.f32 %v2929_v42  ;;  %v1341_v60 = vld [vmem:[#allocation7 + $0x198] sm:$0xff] }
 0x3a0   :  { %v932_v13 = vmul.f32 %v2931_v44, %v930_v53  ;;  %vm918_vm2 = vmor %vm916_vm0, %vm917_vm15  ;;  %vm937_vm4 = vweird.f32 %v2931_v44 }
 0x3a1   :  { %v913_v37 = vsub.f32 1.0, %v912_v52  ;;  %vm938_vm6 = vmor %vm936_vm5, %vm937_vm4 }
 0x3a2   :  { %v933_v58 = vsub.f32 1.0, %v932_v13 }
 0x3a3   :  { %v914_v14 = vmul.f32 %v2929_v42, %v913_v37 }
 0x3a4   :  { %v934_v9 = vmul.f32 %v2931_v44, %v933_v58 }
 0x3a5   :  { %v915_v0 = vadd.f32 %v2929_v42, %v914_v14 }
 0x3a6   :  { %v935_v47 = vadd.f32 %v2931_v44, %v934_v9 }
 0x3a7   :  { %v919_v40 = vsel %vm918_vm2, %v2929_v42, %v915_v0  ;;  %v1338_v42 = vld [vmem:[#allocation7 + $0x180] sm:$0xff] }
 0x3a8   :  { %v924_v55 = vsel %vm921_vm3, %v923_v38, %v919_v40  ;;  %v939_v57 = vsel %vm938_vm6, %v2931_v44, %v935_v47 }
 0x3a9   :  { %v947_v51 = vmul.f32 %v946_v16, %v924_v55  ;;  %v944_v56 = vsel %vm941_vm8, %v943_v35, %v939_v57  ;;  %v4194_v16 = vld [vmem:[%s5184_s5] ss:$0 sm:$0xff] }
 0x3aa   :  { %v950_v17 = vsub.f32 1.0, %v944_v56  ;;  %v952_v23 = vmul.f32 %v944_v56, %v4099_v43 }
 0x3ab   :  { %v948_v39 = vadd.f32 %v947_v51, %v5348_v48 }
 0x3ad   :  { %2932 = vtanh.f32 %v948_v39  ;;  %v5352_v39 = vld [vmem:[#allocation45_spill] sm:$0xff] }
 0x3b3   :  { %v2933_v21 = vpop.eup %2932 }
 0x3b4   :  { %v951_v3 = vmul.f32 %v2933_v21, %v950_v17 }
 0x3b6   :  { %v4161_v25 = vadd.f32 %v952_v23, %v951_v3  ;;  %v4198_v23 = vpop.permute.xlu2 %1079 }
 0x3b7   :  { %5353 = vst [vmem:[#allocation21_spill] sm:$0xff] %v4198_v23  ;;  %vm1081_vm5 = vcmp.eq.s32.totalorder %v4198_v23, 1 }
 0x3b8   :  { %v4167_v28 = vsel %vm959_vm9, %v4161_v25, %v4099_v43  ;;  %v5351_v43 = vld [vmem:[#allocation44_spill] sm:$0xff] }
 0x3b9   :  { %984 = vmatmul.f32.vlgmr.msrb.gmra.mxu1 %v4167_v28  ;;  %1004 = vmatmul.f32.vlgmr.msrb.gmra.mxu2 %v4167_v28 }
 0x3ba   :  { %1024 = vmatmul.f32.vlgmr.msrb.gmra.mxu3 %v4167_v28  ;;  %1252 = vmatpush.msrb.mxu1 %v3868_v2  ;;  %v1383_v2 = vld [vmem:[#allocation7 + $0x2e8] sm:$0xff] }
 0x3bb   :  { %1395 = vmatpush.msrb.mxu2 %v1383_v2 }
 0x3bc   :  { %1253 = vmatpush.msrb.mxu1 %v3877_v24  ;;  %v1380_v24 = vld [vmem:[#allocation7 + $0x2d0] sm:$0xff] }
 0x3bd   :  { %1396 = vmatpush.msrb.mxu2 %v1380_v24 }
 0x3be   :  { %1254 = vmatpush.msrb.mxu1 %v3884_v1  ;;  %v1377_v1 = vld [vmem:[#allocation7 + $0x2b8] sm:$0xff] }
 0x3bf   :  { %1397 = vmatpush.msrb.mxu2 %v1377_v1 }
 0x3c0   :  { %1255 = vmatpush.msrb.mxu1 %v3891_v11  ;;  %v1374_v11 = vld [vmem:[#allocation7 + $0x2a0] sm:$0xff] }
 0x3c1   :  { %1398 = vmatpush.msrb.mxu2 %v1374_v11 }
 0x3c2   :  { %1256 = vmatpush.msrb.mxu1 %v3898_v46  ;;  %v5350_v46 = vld [vmem:[#allocation28_spill] sm:$0xff] }
 0x3c4   :  { %1257 = vmatpush.msrb.mxu1 %v3905_v50  ;;  %v191_v50 = vadd.f32 %v5350_v46, %v5345_v26  ;;  %v5354_v46 = vld [vmem:[#allocation43_spill] sm:$0xff] }
 0x3c6   :  { %1258 = vmatpush.msrb.mxu1 %v3912_v54 }
 0x3c8   :  { %1259 = vmatpush.msrb.mxu1 %v3919_v59  ;;  %v1371_v59 = vld [vmem:[#allocation7 + $0x288] sm:$0xff] }
 0x3c9   :  { %1399 = vmatpush.msrb.mxu2 %v1371_v59 }
 0x3ca   :  { %1260 = vmatpush.msrb.mxu1 %v3926_v62 }
 0x3cc   :  { %1261 = vmatpush.msrb.mxu1 %v3933_v4  ;;  %v1368_v4 = vld [vmem:[#allocation7 + $0x270] sm:$0xff] }
 0x3cd   :  { %1400 = vmatpush.msrb.mxu2 %v1368_v4 }
 0x3ce   :  { %1262 = vmatpush.msrb.mxu1 %v3940_v12 }
 0x3d0   :  { %1263 = vmatpush.msrb.mxu1 %v3947_v27  ;;  %v1365_v27 = vld [vmem:[#allocation7 + $0x258] sm:$0xff] }
 0x3d1   :  { %1401 = vmatpush.msrb.mxu2 %v1365_v27  ;;  %v4237_v27 = vld [vmem:[#allocation9 + $0x2b8] sm:$0xff] }
 0x3d2   :  { %1264 = vmatpush.msrb.mxu1 %v4052_v22 }
 0x3d4   :  { %1265 = vmatpush.msrb.mxu1 %v4059_v45  ;;  %v1362_v45 = vld [vmem:[#allocation7 + $0x240] sm:$0xff] }
 0x3d5   :  { %1402 = vmatpush.msrb.mxu2 %v1362_v45  ;;  %v1384_v45 = vld [vmem:[#allocation7 + $0x2f0] sm:$0xff] }
 0x3d6   :  { %1266 = vmatpush.msrb.mxu1 %v5339_v63  ;;  %1436 = vmatpush.msrb.mxu3 %v1384_v45 }
 0x3d8   :  { %1267 = vmatpush.msrb.mxu1 %v5342_v18  ;;  %v1359_v18 = vld [vmem:[#allocation7 + $0x228] sm:$0xff] }
 0x3d9   :  { %1403 = vmatpush.msrb.mxu2 %v1359_v18  ;;  %v1381_v18 = vld [vmem:[#allocation7 + $0x2d8] sm:$0xff] }
 0x3da   :  { %1437 = vmatpush.msrb.mxu3 %v1381_v18  ;;  %v1352_v18 = vld [vmem:[#allocation7 + $0x1f0] sm:$0xff] }
 0x3db   :  { %1404 = vmatpush.msrb.mxu2 %v1356_v31  ;;  %v4246_v31 = vld [vmem:[#allocation9 + $0x270] sm:$0xff] }
 0x3dd   :  { %1405 = vmatpush.msrb.mxu2 %v1353_v32  ;;  %v1378_v32 = vld [vmem:[#allocation7 + $0x2c0] sm:$0xff] }
 0x3de   :  { %1438 = vmatpush.msrb.mxu3 %v1378_v32  ;;  %v1348_v32 = vld [vmem:[#allocation7 + $0x1d0] sm:$0xff] }
 0x3df   :  { %1406 = vmatpush.msrb.mxu2 %v1350_v49  ;;  %v1375_v49 = vld [vmem:[#allocation7 + $0x2a8] sm:$0xff] }
 0x3e0   :  { %1439 = vmatpush.msrb.mxu3 %v1375_v49  ;;  %v1345_v49 = vld [vmem:[#allocation7 + $0x1b8] sm:$0xff] }
 0x3e1   :  { %1407 = vmatpush.msrb.mxu2 %v1347_v6  ;;  %v1376_v6 = vld [vmem:[#allocation7 + $0x2b0] sm:$0xff] }
 0x3e3   :  { %1408 = vmatpush.msrb.mxu2 %v1344_v15  ;;  %v4252_v15 = vld [vmem:[#allocation9 + $0x240] sm:$0xff] }
 0x3e5   :  { %1409 = vmatpush.msrb.mxu2 %v1341_v60 }
 0x3e7   :  { %1410 = vmatpush.msrb.mxu2 %v1338_v42  ;;  %v1372_v42 = vld [vmem:[#allocation7 + $0x290] sm:$0xff] }
 0x3e8   :  { %1440 = vmatpush.msrb.mxu3 %v1372_v42  ;;  %v1343_v42 = vld [vmem:[#allocation7 + $0x1a8] sm:$0xff] }
 0x436   :  { %v985_v54 = vpop.f32.mrf.mxu1 }
 0x437   :  { %v1028_v62 = vadd.f32 %v985_v54, %v191_v50  ;;  %v5356_v54 = vld [vmem:[#allocation25_spill] sm:$0xff] }
 0x439   :  { %v2784_v12 = vmul.f32 -1.442695, %v1028_v62  ;;  %v5358_v62 = vld [vmem:[#allocation34_spill] sm:$0xff] }
 0x43b   :  { %2934 = vpow2.f32 %v2784_v12  ;;  %v4234_v12 = vld [vmem:[#allocation9 + $0x2d0] sm:$0xff] }
 0x43c   :  { %v1005_v22 = vpop.f32.mrf.mxu2 }
 0x43d   :  { %v1048_v63 = vadd.f32 %v1005_v22, %v5351_v43  ;;  %v1025_v14 = vpop.f32.mrf.mxu3  ;;  %v4240_v22 = vld [vmem:[#allocation9 + $0x2a0] sm:$0xff]  ;;  %v1385_v43 = vld [vmem:[#allocation7 + $0x2f8] sm:$0xff] }
 0x43e   :  { %v1068_v40 = vadd.f32 %v4194_v16, %v1025_v14  ;;  %v1370_v14 = vld [vmem:[#allocation7 + $0x280] sm:$0xff] }
 0x43f   :  { %v2785_v29 = vmul.f32 -1.442695, %v1048_v63  ;;  %v4243_v63 = vld [vmem:[#allocation9 + $0x288] sm:$0xff] }
 0x441   :  { %v2935_v34 = vpop.eup %2934  ;;  %2936 = vpow2.f32 %v2785_v29  ;;  %v1382_v29 = vld [vmem:[#allocation7 + $0x2e0] sm:$0xff] }
 0x442   :  { %v1032_v36 = vadd.f32 1.0, %v2935_v34  ;;  %v1379_v34 = vld [vmem:[#allocation7 + $0x2c8] sm:$0xff] }
 0x444   :  { %2938 = vrcp.f32 %v1032_v36  ;;  %v1044_v13 = vand.u32 2147483648, %v1032_v36  ;;  %v1042_v19 = vand.u32 2147483647, %v1032_v36  ;;  %vm1038_vm12 = vweird.f32 %v1032_v36 }
 0x446   :  { %v1045_v9 = vor.u32 1.1754944e-38, %v1044_v13  ;;  %vm1043_vm15 = vcmp.eq.f32.partialorder %v1042_v19, 8.507059e+37 }
 0x447   :  { %v2937_v61 = vpop.eup %2936 }
 0x448   :  { %v1052_v5 = vadd.f32 1.0, %v2937_v61  ;;  %v5360_v61 = vld [vmem:[#allocation30_spill] sm:$0xff] }
 0x44a   :  { %v2939_v53 = vpop.eup %2938  ;;  %2940 = vrcp.f32 %v1052_v5  ;;  %v1064_v51 = vand.u32 2147483648, %v1052_v5  ;;  %v1062_v41 = vand.u32 2147483647, %v1052_v5  ;;  %vm1058_vm2 = vweird.f32 %v1052_v5 }
 0x44b   :  { %v1034_v44 = vmul.f32 %v2939_v53, %v1032_v36  ;;  %vm1039_vm10 = vweird.f32 %v2939_v53  ;;  %v4249_v36 = vld [vmem:[#allocation9 + $0x258] sm:$0xff] }
 0x44c   :  { %vm1040_vm13 = vmor %vm1038_vm12, %vm1039_vm10  ;;  %v1065_v35 = vor.u32 1.1754944e-38, %v1064_v51  ;;  %vm1063_vm4 = vcmp.eq.f32.partialorder %v1062_v41, 8.507059e+37  ;;  %v4267_v51 = vld [vmem:[#allocation9 + $0x1e0] sm:$0xff]  ;;  %v1361_v41 = vld [vmem:[#allocation7 + $0x238] sm:$0xff] }
 0x44d   :  { %v1035_v52 = vsub.f32 1.0, %v1034_v44  ;;  %v1373_v44 = vld [vmem:[#allocation7 + $0x298] sm:$0xff] }
 0x44f   :  { %v1036_v37 = vmul.f32 %v2939_v53, %v1035_v52  ;;  %v4257_v52 = vld [vmem:[#allocation9 + $0x228] sm:$0xff] }
 0x450   :  { %v2941_v58 = vpop.eup %2940 }
 0x451   :  { %v1054_v10 = vmul.f32 %v2941_v58, %v1052_v5  ;;  %v1037_v8 = vadd.f32 %v2939_v53, %v1036_v37  ;;  %vm1059_vm0 = vweird.f32 %v2941_v58  ;;  %v194_v5 = vadd.f32 %v5360_v61, %v5345_v26  ;;  %v5361_v37 = vld [vmem:[#allocation46_spill] sm:$0xff] }
 0x452   :  { %vm1060_vm3 = vmor %vm1058_vm2, %vm1059_vm0 }
 0x453   :  { %v1055_v0 = vsub.f32 1.0, %v1054_v10  ;;  %v1041_v38 = vsel %vm1040_vm13, %v2939_v53, %v1037_v8  ;;  %v4261_v10 = vld [vmem:[#allocation9 + $0x210] sm:$0xff] }
 0x454   :  { %v1046_v55 = vsel %vm1043_vm15, %v1045_v9, %v1041_v38  ;;  %v1367_v38 = vld [vmem:[#allocation7 + $0x268] sm:$0xff] }
 0x455   :  { %v1056_v47 = vmul.f32 %v2941_v58, %v1055_v0  ;;  %v1069_v30 = vmul.f32 %v1068_v40, %v1046_v55  ;;  %v1366_v0 = vld [vmem:[#allocation7 + $0x260] sm:$0xff]  ;;  %v4264_v40 = vld [vmem:[#allocation9 + $0x1f8] sm:$0xff]  ;;  %v1363_v55 = vld [vmem:[#allocation7 + $0x248] sm:$0xff] }
 0x457   :  { %v1057_v48 = vadd.f32 %v2941_v58, %v1056_v47  ;;  %v1070_v57 = vadd.f32 %v1069_v30, %v5352_v39  ;;  %v1364_v47 = vld [vmem:[#allocation7 + $0x250] sm:$0xff]  ;;  %v1357_v39 = vld [vmem:[#allocation7 + $0x218] sm:$0xff] }
 0x458   :  { %v1360_v30 = vld [vmem:[#allocation7 + $0x230] sm:$0xff] }
 0x459   :  { %v1061_v56 = vsel %vm1060_vm3, %v2941_v58, %v1057_v48  ;;  %2942 = vtanh.f32 %v1070_v57  ;;  %v1369_v58 = vld [vmem:[#allocation7 + $0x278] sm:$0xff]  ;;  %v4270_v48 = vld [vmem:[#allocation9 + $0x1c8] sm:$0xff]  ;;  %v1358_v57 = vld [vmem:[#allocation7 + $0x220] sm:$0xff] }
 0x45a   :  { %v1066_v17 = vsel %vm1063_vm4, %v1065_v35, %v1061_v56  ;;  %1441 = vmatpush.msrb.mxu3 %v1369_v58  ;;  %v4272_v35 = vld [vmem:[#allocation9 + $0x1b0] sm:$0xff]  ;;  %v1354_v56 = vld [vmem:[#allocation7 + $0x200] sm:$0xff] }
 0x45b   :  { %v1072_v21 = vsub.f32 1.0, %v1066_v17  ;;  %v1074_v24 = vmul.f32 %v1066_v17, %v4167_v28  ;;  %v1355_v17 = vld [vmem:[#allocation7 + $0x208] sm:$0xff] }
 0x45c   :  { %1442 = vmatpush.msrb.mxu3 %v1366_v0 }
 0x45e   :  { %1443 = vmatpush.msrb.mxu3 %v1363_v55 }
 0x45f   :  { %v2943_v3 = vpop.eup %2942 }
 0x460   :  { %v1073_v2 = vmul.f32 %v2943_v3, %v1072_v21  ;;  %1444 = vmatpush.msrb.mxu3 %v1360_v30  ;;  %v4275_v3 = vld [vmem:[#allocation9 + $0x198] sm:$0xff] }
 0x462   :  { %v4201_v1 = vadd.f32 %v1074_v24, %v1073_v2  ;;  %1445 = vmatpush.msrb.mxu3 %v1357_v39 }
 0x464   :  { %v4208_v11 = vsel %vm1081_vm5, %v4201_v1, %v4167_v28  ;;  %v4231_v28 = vld [vmem:[#allocation9 + $0x2e8] sm:$0xff]  ;;  %1446 = vmatpush.msrb.mxu3 %v1354_v56 }
 0x465   :  { %1106 = vmatmul.f32.vlgmr.msra.gmra.mxu0 %v4208_v11  ;;  %1126 = vmatmul.f32.vlgmr.msra.gmra.mxu1 %v4208_v11 }
 0x466   :  { %1146 = vmatmul.f32.vlgmr.msra.gmra.mxu2 %v4208_v11  ;;  %1599 = vmatpush.msra.mxu1 %v4231_v28 }
 0x467   :  { %1477 = vmatpush.msra.mxu0 %v1385_v43  ;;  %v1351_v43 = vld [vmem:[#allocation7 + $0x1e8] sm:$0xff] }
 0x468   :  { %1600 = vmatpush.msra.mxu1 %v4234_v12  ;;  %1447 = vmatpush.msrb.mxu3 %v1351_v43 }
 0x469   :  { %1478 = vmatpush.msra.mxu0 %v1382_v29  ;;  %v4279_v29 = vld [vmem:[#allocation9 + $0x180] sm:$0xff] }
 0x46a   :  { %1601 = vmatpush.msra.mxu1 %v4237_v27  ;;  %5362 = vst [vmem:[#allocation24_spill] sm:$0xff] %v4279_v29  ;;  %1448 = vmatpush.msrb.mxu3 %v1348_v32 }
 0x46b   :  { %1479 = vmatpush.msra.mxu0 %v1379_v34  ;;  %v1349_v34 = vld [vmem:[#allocation7 + $0x1d8] sm:$0xff] }
 0x46c   :  { %1602 = vmatpush.msra.mxu1 %v4240_v22  ;;  %1449 = vmatpush.msrb.mxu3 %v1345_v49 }
 0x46d   :  { %1480 = vmatpush.msra.mxu0 %v1376_v6  ;;  %v1346_v6 = vld [vmem:[#allocation7 + $0x1c0] sm:$0xff] }
 0x46e   :  { %2827 = vmatmul.msk.f32.vlgmr.msrb.gmra.mxu2 %vm473_vm11, %v5354_v46  ;;  %1603 = vmatpush.msra.mxu1 %v4243_v63 }
 0x46f   :  { %1481 = vmatpush.msra.mxu0 %v1373_v44 }
 0x470   :  { %1604 = vmatpush.msra.mxu1 %v4246_v31 }
 0x471   :  { %1482 = vmatpush.msra.mxu0 %v1370_v14 }
 0x472   :  { %1605 = vmatpush.msra.mxu1 %v4249_v36 }
 0x473   :  { %1483 = vmatpush.msra.mxu0 %v1367_v38 }
 0x474   :  { %1606 = vmatpush.msra.mxu1 %v4252_v15 }
 0x475   :  { %1484 = vmatpush.msra.mxu0 %v1364_v47 }
 0x476   :  { %2828 = vmatmul.msk.f32.gmra.mxu2 %vm593_vm7, %v5356_v54  ;;  %1607 = vmatpush.msra.mxu1 %v4257_v52 }
 0x477   :  { %1485 = vmatpush.msra.mxu0 %v1361_v41 }
 0x478   :  { %1608 = vmatpush.msra.mxu1 %v4261_v10 }
 0x479   :  { %1486 = vmatpush.msra.mxu0 %v1358_v57 }
 0x47a   :  { %1609 = vmatpush.msra.mxu1 %v4264_v40 }
 0x47b   :  { %1487 = vmatpush.msra.mxu0 %v1355_v17 }
 0x47c   :  { %1610 = vmatpush.msra.mxu1 %v4267_v51 }
 0x47d   :  { %1488 = vmatpush.msra.mxu0 %v1352_v18 }
 0x47e   :  { %2829 = vmatmul.msk.f32.gmra.mxu2 %vm715_vm1, %v5358_v62  ;;  %1611 = vmatpush.msra.mxu1 %v4270_v48 }
 0x47f   :  { %1489 = vmatpush.msra.mxu0 %v1349_v34 }
 0x480   :  { %1612 = vmatpush.msra.mxu1 %v4272_v35 }
 0x481   :  { %1490 = vmatpush.msra.mxu0 %v1346_v6  ;;  %v4284_v6 = vpop.permute.xlu0 %1201 }
 0x482   :  { %1613 = vmatpush.msra.mxu1 %v4275_v3  ;;  %5364 = vst [vmem:[#allocation35_spill] sm:$0xff] %v4284_v6  ;;  %vm1203_vm3 = vcmp.eq.s32.totalorder %v4284_v6, 1  ;;  %v4527_v6 = vld [vmem:[#allocation9 + $0x190] sm:$0xff] }
 0x483   :  { %1491 = vmatpush.msra.mxu0 %v1343_v42  ;;  %v4304_v42 = vld [vmem:[#allocation9 + $0x2d8] sm:$0xff]  ;;  %5375 = vst [vmem:[#allocation22_spill] sm:$0xff] %v4527_v6 }
 0x484   :  { %1614 = vmatpush.msra.mxu1 %v4279_v29 }
 0x486   :  { %2830 = vmatmul.msk.f32.gmra.mxu2 %vm837_vm14, %v4092_v20 }
 0x48e   :  { %2831 = vmatmul.msk.f32.gmra.mxu2 %vm959_vm9, %v4161_v25 }
 0x496   :  { %2832 = vmatmul.msk.f32.gmra.mxu2 %vm1081_vm5, %v4201_v1 }
 0x4e2   :  { %v1107_v60 = vpop.f32.mrf.mxu0  ;;  %v1127_v53 = vpop.f32.mrf.mxu1 }
 0x4e3   :  { %v1150_v13 = vadd.f32 %v1107_v60, %v194_v5  ;;  %v1170_v19 = vadd.f32 %v1127_v53, %v5361_v37  ;;  %v1342_v53 = vld [vmem:[#allocation7 + $0x1a0] sm:$0xff]  ;;  %v1339_v37 = vld [vmem:[#allocation7 + $0x188] sm:$0xff] }
 0x4e4   :  { %1450 = vmatpush.msrb.mxu3 %v1342_v53 }
 0x4e5   :  { %v2786_v8 = vmul.f32 -1.442695, %v1150_v13  ;;  %v2787_v9 = vmul.f32 -1.442695, %v1170_v19  ;;  %v1340_v19 = vld [vmem:[#allocation7 + $0x190] sm:$0xff] }
 0x4e6   :  { %1451 = vmatpush.msrb.mxu3 %v1339_v37  ;;  %1492 = vmatpush.msra.mxu0 %v1340_v19  ;;  %v5365_v37 = vmov 0.0   ;;  %v4330_v19 = vld [vmem:[#allocation9 + $0x278] sm:$0xff] }
 0x4e7   :  { %2944 = vpow2.f32 %v2786_v8 }
 0x4e8   :  { %2946 = vpow2.f32 %v2787_v9 }
 0x4e9   :  { %v1147_v38 = vpop.f32.mrf.mxu2 }
 0x4ea   :  { %v1190_v41 = vadd.f32 %v4194_v16, %v1147_v38  ;;  %v4379_v38 = vld [vmem:[#allocation9 + $0x1b8] sm:$0xff] }
 0x4ed   :  { %v2945_v21 = vpop.eup %2944 }
 0x4ee   :  { %v2947_v2 = vpop.eup %2946  ;;  %v1154_v24 = vadd.f32 1.0, %v2945_v21 }
 0x4ef   :  { %v1174_v45 = vadd.f32 1.0, %v2947_v2  ;;  %v5363_v2 = vld [vmem:[#allocation47_spill] sm:$0xff] }
 0x4f0   :  { %2948 = vrcp.f32 %v1154_v24  ;;  %v1166_v14 = vand.u32 2147483648, %v1154_v24  ;;  %v1164_v9 = vand.u32 2147483647, %v1154_v24  ;;  %vm1160_vm8 = vweird.f32 %v1154_v24 }
 0x4f1   :  { %2950 = vrcp.f32 %v1174_v45  ;;  %v1186_v17 = vand.u32 2147483648, %v1174_v45  ;;  %vm1180_vm15 = vweird.f32 %v1174_v45  ;;  %v1184_v21 = vand.u32 2147483647, %v1174_v45 }
 0x4f2   :  { %v1167_v47 = vor.u32 1.1754944e-38, %v1166_v14  ;;  %vm1165_vm12 = vcmp.eq.f32.partialorder %v1164_v9, 8.507059e+37  ;;  %v4339_v14 = vld [vmem:[#allocation9 + $0x248] sm:$0xff]  ;;  %v4359_v9 = vld [vmem:[#allocation9 + $0x200] sm:$0xff] }
 0x4f3   :  { %v1187_v32 = vor.u32 1.1754944e-38, %v1186_v17  ;;  %vm1185_vm2 = vcmp.eq.f32.partialorder %v1184_v21, 8.507059e+37  ;;  %v4459_v17 = vld [vmem:[#allocation9 + $0x2b0] sm:$0xff]  ;;  %v4461_v21 = vld [vmem:[#allocation9 + $0x298] sm:$0xff] }
 0x4f6   :  { %v2949_v61 = vpop.eup %2948 }
 0x4f7   :  { %v2951_v5 = vpop.eup %2950  ;;  %v1156_v60 = vmul.f32 %v2949_v61, %v1154_v24  ;;  %vm1161_vm6 = vweird.f32 %v2949_v61 }
 0x4f8   :  { %v1176_v44 = vmul.f32 %v2951_v5, %v1174_v45  ;;  %vm1162_vm10 = vmor %vm1160_vm8, %vm1161_vm6  ;;  %vm1181_vm13 = vweird.f32 %v2951_v5 }
 0x4f9   :  { %v1157_v13 = vsub.f32 1.0, %v1156_v60  ;;  %vm1182_vm0 = vmor %vm1180_vm15, %vm1181_vm13 }
 0x4fa   :  { %v1177_v58 = vsub.f32 1.0, %v1176_v44  ;;  %v4309_v44 = vld [vmem:[#allocation9 + $0x2c0] sm:$0xff] }
 0x4fb   :  { %v1158_v8 = vmul.f32 %v2949_v61, %v1157_v13  ;;  %v4319_v13 = vld [vmem:[#allocation9 + $0x290] sm:$0xff] }
 0x4fc   :  { %v1178_v0 = vmul.f32 %v2951_v5, %v1177_v58  ;;  %v4334_v58 = vld [vmem:[#allocation9 + $0x260] sm:$0xff] }
 0x4fd   :  { %v1159_v55 = vadd.f32 %v2949_v61, %v1158_v8  ;;  %v4354_v8 = vld [vmem:[#allocation9 + $0x218] sm:$0xff] }
 0x4fe   :  { %v1179_v57 = vadd.f32 %v2951_v5, %v1178_v0  ;;  %v4364_v0 = vld [vmem:[#allocation9 + $0x1e8] sm:$0xff] }
 0x4ff   :  { %v1163_v30 = vsel %vm1162_vm10, %v2949_v61, %v1159_v55  ;;  %v4381_v55 = vld [vmem:[#allocation9 + $0x2f8] sm:$0xff] }
 0x500   :  { %v1168_v39 = vsel %vm1165_vm12, %v1167_v47, %v1163_v30  ;;  %v1183_v18 = vsel %vm1182_vm0, %v2951_v5, %v1179_v57  ;;  %v4299_v5 = vld [vmem:[#allocation9 + $0x2f0] sm:$0xff]  ;;  %1639 = vmatpush.msra.mxu2 %v4381_v55  ;;  %v4386_v47 = vld [vmem:[#allocation9 + $0x1a0] sm:$0xff]  ;;  %v4391_v30 = vld [vmem:[#allocation9 + $0x188] sm:$0xff] }
 0x501   :  { %v1191_v56 = vmul.f32 %v1190_v41, %v1168_v39  ;;  %v1188_v24 = vsel %vm1185_vm2, %v1187_v32, %v1183_v18  ;;  %5366 = vst [vmem:[#allocation18_spill] sm:$0xff] %v4386_v47  ;;  %v4467_v32 = vld [vmem:[#allocation9 + $0x280] sm:$0xff] }
 0x502   :  { %v1194_v34 = vsub.f32 1.0, %v1188_v24  ;;  %v1196_v60 = vmul.f32 %v1188_v24, %v4208_v11  ;;  %5367 = vst [vmem:[#allocation29_spill] sm:$0xff] %v4391_v30 }
 0x503   :  { %v1192_v43 = vadd.f32 %v1191_v56, %v5363_v2  ;;  %v5370_v2 = vld [vmem:[#allocation32_spill] sm:$0xff] }
 0x505   :  { %2952 = vtanh.f32 %v1192_v43  ;;  %v197_v43 = vadd.f32 %v5370_v2, %v5345_v26  ;;  %v4510_v2 = vld [vmem:[#allocation9 + $0x1d8] sm:$0xff] }
 0x506   :  { %5372 = vst [vmem:[#allocation26_spill] sm:$0xff] %v4510_v2 }
 0x50b   :  { %v2953_v49 = vpop.eup %2952 }
 0x50c   :  { %v1195_v61 = vmul.f32 %v2953_v49, %v1194_v34  ;;  %v4472_v34 = vld [vmem:[#allocation9 + $0x268] sm:$0xff]  ;;  %v4477_v49 = vld [vmem:[#allocation9 + $0x250] sm:$0xff] }
 0x50e   :  { %v4287_v53 = vadd.f32 %v1196_v60, %v1195_v61 }
 0x510   :  { %2833 = vmatmul.msk.f32.gmra.mxu2 %vm1203_vm3, %v4287_v53  ;;  %v4297_v45 = vsel %vm1203_vm3, %v4287_v53, %v4208_v11  ;;  %v4314_v11 = vld [vmem:[#allocation9 + $0x2a8] sm:$0xff] }
 0x511   :  { %1228 = vmatmul.f32.vlgmr.msra.gmra.mxu3 %v4297_v45  ;;  %1248 = vmatmul.f32.vlgmr.msrb.gmra.mxu0 %v4297_v45 }
 0x512   :  { %1268 = vmatmul.f32.vlgmr.msrb.gmra.mxu1 %v4297_v45  ;;  %1712 = vmatpush.msra.mxu3 %v4231_v28 }
 0x513   :  { %1619 = vmatpush.msrb.mxu1 %v4299_v5  ;;  %1732 = vmatpush.msrb.mxu0 %v4299_v5 }
 0x514   :  { %1713 = vmatpush.msra.mxu3 %v4234_v12 }
 0x515   :  { %1620 = vmatpush.msrb.mxu1 %v4304_v42  ;;  %1733 = vmatpush.msrb.mxu0 %v4304_v42 }
 0x516   :  { %1714 = vmatpush.msra.mxu3 %v4237_v27 }
 0x517   :  { %1621 = vmatpush.msrb.mxu1 %v4309_v44  ;;  %1734 = vmatpush.msrb.mxu0 %v4309_v44 }
 0x518   :  { %1715 = vmatpush.msra.mxu3 %v4240_v22 }
 0x519   :  { %1622 = vmatpush.msrb.mxu1 %v4314_v11  ;;  %2835 = vmatmul.msk.f32.vlgmr.msrb.gmra.mxu3 %vm473_vm11, %v5354_v46 }
 0x51a   :  { %2843 = vmatmul.msk.f32.vlgmr.msra.gmra.mxu0 %vm473_vm11, %v5354_v46  ;;  %1615 = vmatmul.f32.vlgmr.msra.gmra.mxu1 %v5365_v37  ;;  %v4344_v46 = vld [vmem:[#allocation9 + $0x230] sm:$0xff] }
 0x51b   :  { %1623 = vmatpush.msrb.mxu1 %v4319_v13  ;;  %1716 = vmatpush.msra.mxu3 %v4243_v63 }
 0x51c   :  { %1735 = vmatpush.msrb.mxu0 %v4314_v11 }
 0x51d   :  { %1624 = vmatpush.msrb.mxu1 %v4330_v19  ;;  %1717 = vmatpush.msra.mxu3 %v4246_v31 }
 0x51e   :  { %1736 = vmatpush.msrb.mxu0 %v4319_v13 }
 0x51f   :  { %1625 = vmatpush.msrb.mxu1 %v4334_v58  ;;  %1718 = vmatpush.msra.mxu3 %v4249_v36 }
 0x520   :  { %1737 = vmatpush.msrb.mxu0 %v4330_v19 }
 0x521   :  { %1626 = vmatpush.msrb.mxu1 %v4339_v14  ;;  %2836 = vmatmul.msk.f32.gmra.mxu3 %vm593_vm7, %v5356_v54 }
 0x522   :  { %2844 = vmatmul.msk.f32.gmra.mxu0 %vm593_vm7, %v5356_v54  ;;  %1719 = vmatpush.msra.mxu3 %v4252_v15  ;;  %v4369_v54 = vld [vmem:[#allocation9 + $0x1d0] sm:$0xff] }
 0x523   :  { %1627 = vmatpush.msrb.mxu1 %v4344_v46  ;;  %1738 = vmatpush.msrb.mxu0 %v4334_v58 }
 0x524   :  { %1720 = vmatpush.msra.mxu3 %v4257_v52 }
 0x525   :  { %1628 = vmatpush.msrb.mxu1 %v4354_v8  ;;  %1739 = vmatpush.msrb.mxu0 %v4339_v14 }
 0x526   :  { %1721 = vmatpush.msra.mxu3 %v4261_v10 }
 0x527   :  { %1629 = vmatpush.msrb.mxu1 %v4359_v9  ;;  %1740 = vmatpush.msrb.mxu0 %v4344_v46 }
 0x528   :  { %1722 = vmatpush.msra.mxu3 %v4264_v40 }
 0x529   :  { %1630 = vmatpush.msrb.mxu1 %v4364_v0  ;;  %2837 = vmatmul.msk.f32.gmra.mxu3 %vm715_vm1, %v5358_v62 }
 0x52a   :  { %2845 = vmatmul.msk.f32.gmra.mxu0 %vm715_vm1, %v5358_v62  ;;  %1723 = vmatpush.msra.mxu3 %v4267_v51  ;;  %v5369_v62 = vld [vmem:[#allocation23_spill] sm:$0xff] }
 0x52b   :  { %1631 = vmatpush.msrb.mxu1 %v4369_v54  ;;  %1741 = vmatpush.msrb.mxu0 %v4354_v8 }
 0x52c   :  { %1724 = vmatpush.msra.mxu3 %v4270_v48 }
 0x52d   :  { %1632 = vmatpush.msrb.mxu1 %v4379_v38  ;;  %1742 = vmatpush.msrb.mxu0 %v4359_v9 }
 0x52e   :  { %1725 = vmatpush.msra.mxu3 %v4272_v35 }
 0x52f   :  { %1633 = vmatpush.msrb.mxu1 %v4386_v47  ;;  %1743 = vmatpush.msrb.mxu0 %v4364_v0 }
 0x530   :  { %1726 = vmatpush.msra.mxu3 %v4275_v3 }
 0x531   :  { %1634 = vmatpush.msrb.mxu1 %v4391_v30  ;;  %2838 = vmatmul.msk.f32.gmra.mxu3 %vm837_vm14, %v4092_v20 }
 0x532   :  { %1635 = vmatmul.f32.vlgmr.msrb.gmra.mxu1 %v5365_v37  ;;  %2846 = vmatmul.msk.f32.gmra.mxu0 %vm837_vm14, %v4092_v20  ;;  %v4447_v20 = vld [vmem:[#allocation9 + $0x2e0] sm:$0xff] }
 0x533   :  { %1752 = vmatpush.msra.mxu1 %v4381_v55  ;;  %1744 = vmatpush.msrb.mxu0 %v4369_v54 }
 0x534   :  { %1727 = vmatpush.msra.mxu3 %v4279_v29  ;;  %1640 = vmatpush.msra.mxu2 %v4447_v20 }
 0x535   :  { %1745 = vmatpush.msrb.mxu0 %v4379_v38  ;;  %1753 = vmatpush.msra.mxu1 %v4447_v20 }
 0x536   :  { %1847 = vmatpush.msrb.mxu3 %v4299_v5 }
 0x537   :  { %1746 = vmatpush.msrb.mxu0 %v4386_v47 }
 0x538   :  { %1848 = vmatpush.msrb.mxu3 %v4304_v42 }
 0x539   :  { %2839 = vmatmul.msk.f32.gmra.mxu3 %vm959_vm9, %v4161_v25  ;;  %1747 = vmatpush.msrb.mxu0 %v4391_v30 }
 0x53a   :  { %2847 = vmatmul.msk.f32.gmra.mxu0 %vm959_vm9, %v4161_v25  ;;  %1849 = vmatpush.msrb.mxu3 %v4309_v44  ;;  %v4449_v25 = vld [vmem:[#allocation9 + $0x2c8] sm:$0xff] }
 0x53b   :  { %1867 = vmatpush.msra.mxu0 %v4381_v55  ;;  %1641 = vmatpush.msra.mxu2 %v4449_v25 }
 0x53c   :  { %1850 = vmatpush.msrb.mxu3 %v4314_v11  ;;  %1754 = vmatpush.msra.mxu1 %v4449_v25 }
 0x53d   :  { %1868 = vmatpush.msra.mxu0 %v4447_v20  ;;  %1642 = vmatpush.msra.mxu2 %v4459_v17 }
 0x53e   :  { %1851 = vmatpush.msrb.mxu3 %v4319_v13  ;;  %1755 = vmatpush.msra.mxu1 %v4459_v17 }
 0x53f   :  { %1869 = vmatpush.msra.mxu0 %v4449_v25  ;;  %1643 = vmatpush.msra.mxu2 %v4461_v21 }
 0x540   :  { %1852 = vmatpush.msrb.mxu3 %v4330_v19  ;;  %1756 = vmatpush.msra.mxu1 %v4461_v21 }
 0x541   :  { %2840 = vmatmul.msk.f32.gmra.mxu3 %vm1081_vm5, %v4201_v1  ;;  %1870 = vmatpush.msra.mxu0 %v4459_v17 }
 0x542   :  { %2848 = vmatmul.msk.f32.gmra.mxu0 %vm1081_vm5, %v4201_v1  ;;  %1853 = vmatpush.msrb.mxu3 %v4334_v58  ;;  %v5368_v1 = vld [vmem:[#allocation33_spill] sm:$0xff] }
 0x543   :  { %v238_v41 = vadd.f32 %v5369_v62, %v5368_v1  ;;  %1871 = vmatpush.msra.mxu0 %v4461_v21  ;;  %1644 = vmatpush.msra.mxu2 %v4467_v32  ;;  %v4493_v1 = vld [vmem:[#allocation9 + $0x220] sm:$0xff] }
 0x544   :  { %1854 = vmatpush.msrb.mxu3 %v4339_v14  ;;  %1757 = vmatpush.msra.mxu1 %v4467_v32 }
 0x545   :  { %1872 = vmatpush.msra.mxu0 %v4467_v32  ;;  %1645 = vmatpush.msra.mxu2 %v4472_v34 }
 0x546   :  { %1855 = vmatpush.msrb.mxu3 %v4344_v46  ;;  %1758 = vmatpush.msra.mxu1 %v4472_v34 }
 0x547   :  { %1873 = vmatpush.msra.mxu0 %v4472_v34  ;;  %1646 = vmatpush.msra.mxu2 %v4477_v49 }
 0x548   :  { %1856 = vmatpush.msrb.mxu3 %v4354_v8  ;;  %1759 = vmatpush.msra.mxu1 %v4477_v49 }
 0x549   :  { %2841 = vmatmul.msk.f32.gmra.mxu3 %vm1203_vm3, %v4287_v53  ;;  %1874 = vmatpush.msra.mxu0 %v4477_v49 }
 0x54a   :  { %2849 = vmatmul.msk.f32.gmra.mxu0 %vm1203_vm3, %v4287_v53  ;;  %1857 = vmatpush.msrb.mxu3 %v4359_v9  ;;  %v4484_v53 = vld [vmem:[#allocation9 + $0x238] sm:$0xff] }
 0x54b   :  { %1647 = vmatpush.msra.mxu2 %v4484_v53  ;;  %1760 = vmatpush.msra.mxu1 %v4484_v53 }
 0x54c   :  { %1858 = vmatpush.msrb.mxu3 %v4364_v0  ;;  %1875 = vmatpush.msra.mxu0 %v4484_v53 }
 0x54d   :  { %1648 = vmatpush.msra.mxu2 %v4493_v1  ;;  %1761 = vmatpush.msra.mxu1 %v4493_v1 }
 0x54e   :  { %1859 = vmatpush.msrb.mxu3 %v4369_v54  ;;  %1876 = vmatpush.msra.mxu0 %v4493_v1 }
 0x550   :  { %1860 = vmatpush.msrb.mxu3 %v4379_v38 }
 0x552   :  { %1861 = vmatpush.msrb.mxu3 %v4386_v47 }
 0x554   :  { %1862 = vmatpush.msrb.mxu3 %v4391_v30 }
 0x58e   :  { %v1249_v39 = vpop.f32.mrf.mxu0 }
 0x58f   :  { %v1292_v57 = vadd.f32 %v1249_v39, %v238_v41  ;;  %v4498_v39 = vld [vmem:[#allocation9 + $0x208] sm:$0xff]  ;;  %v1269_v59 = vpop.f32.mrf.mxu1 }
 0x590   :  { %1649 = vmatpush.msra.mxu2 %v4498_v39  ;;  %1762 = vmatpush.msra.mxu1 %v4498_v39 }
 0x591   :  { %v2789_v56 = vmul.f32 -1.442695, %v1292_v57  ;;  %v4503_v57 = vld [vmem:[#allocation9 + $0x1f0] sm:$0xff]  ;;  %1877 = vmatpush.msra.mxu0 %v4498_v39 }
 0x592   :  { %5371 = vst [vmem:[#allocation37_spill] sm:$0xff] %v4503_v57  ;;  %1650 = vmatpush.msra.mxu2 %v4503_v57  ;;  %1763 = vmatpush.msra.mxu1 %v4503_v57 }
 0x593   :  { %2954 = vpow2.f32 %v2789_v56  ;;  %1878 = vmatpush.msra.mxu0 %v4503_v57 }
 0x594   :  { %v1229_v18 = vpop.f32.mrf.mxu3  ;;  %1651 = vmatpush.msra.mxu2 %v4510_v2  ;;  %1764 = vmatpush.msra.mxu1 %v4510_v2 }
 0x595   :  { %v1272_v24 = vadd.f32 %v1229_v18, %v197_v43  ;;  %v4517_v18 = vld [vmem:[#allocation9 + $0x1c0] sm:$0xff]  ;;  %1879 = vmatpush.msra.mxu0 %v4510_v2 }
 0x596   :  { %5373 = vst [vmem:[#allocation38_spill] sm:$0xff] %v4517_v18  ;;  %1652 = vmatpush.msra.mxu2 %v4517_v18  ;;  %1765 = vmatpush.msra.mxu1 %v4517_v18 }
 0x597   :  { %v2788_v26 = vmul.f32 -1.442695, %v1272_v24  ;;  %1880 = vmatpush.msra.mxu0 %v4517_v18 }
 0x599   :  { %v2955_v61 = vpop.eup %2954  ;;  %2956 = vpow2.f32 %v2788_v26  ;;  %v4522_v26 = vld [vmem:[#allocation9 + $0x1a8] sm:$0xff] }
 0x59a   :  { %v4482_v60 = vadd.f32 1.0, %v2955_v61  ;;  %5374 = vst [vmem:[#allocation19_spill] sm:$0xff] %v4522_v26  ;;  %1653 = vmatpush.msra.mxu2 %v4522_v26  ;;  %1766 = vmatpush.msra.mxu1 %v4522_v26 }
 0x59b   :  { %1881 = vmatpush.msra.mxu0 %v4522_v26 }
 0x59c   :  { %2958 = vrcp.f32 %v4482_v60  ;;  %1654 = vmatpush.msra.mxu2 %v4527_v6  ;;  %1767 = vmatpush.msra.mxu1 %v4527_v6  ;;  %vm1302_vm13 = vweird.f32 %v4482_v60 }
 0x59d   :  { %1882 = vmatpush.msra.mxu0 %v4527_v6  ;;  %v1312_v6 = vadd.f32 %v4194_v16, %v1269_v59  ;;  %v1306_v16 = vand.u32 2147483647, %v4482_v60 }
 0x59e   :  { %1827 = vmatpush.msrb.mxu2 %v4231_v28  ;;  %1942 = vmatpush.msrb.mxu1 %v4231_v28 }
 0x59f   :  { %v2957_v62 = vpop.eup %2956  ;;  %vm1307_vm0 = vcmp.eq.f32.partialorder %v1306_v16, 8.507059e+37  ;;  %v1453_v16 = vpop.f32.mrf.mxu3 }
 0x5a0   :  { %v1276_v41 = vadd.f32 1.0, %v2957_v62  ;;  %1828 = vmatpush.msrb.mxu2 %v4234_v12  ;;  %1943 = vmatpush.msrb.mxu1 %v4234_v12 }
 0x5a2   :  { %2960 = vrcp.f32 %v1276_v41  ;;  %v4506_v56 = vpop.eup %2958  ;;  %v1288_v33 = vand.u32 2147483648, %v1276_v41  ;;  %v1286_v4 = vand.u32 2147483647, %v1276_v41  ;;  %vm1282_vm6 = vweird.f32 %v1276_v41  ;;  %1829 = vmatpush.msrb.mxu2 %v4237_v27  ;;  %1944 = vmatpush.msrb.mxu1 %v4237_v27 }
 0x5a3   :  { %v1298_v43 = vmul.f32 %v4506_v56, %v4482_v60  ;;  %vm1303_vm12 = vweird.f32 %v4506_v56 }
 0x5a4   :  { %v1289_v26 = vor.u32 1.1754944e-38, %v1288_v33  ;;  %vm1287_vm10 = vcmp.eq.f32.partialorder %v1286_v4, 8.507059e+37  ;;  %1830 = vmatpush.msrb.mxu2 %v4240_v22  ;;  %v1308_v33 = vand.u32 2147483648, %v4482_v60  ;;  %1945 = vmatpush.msrb.mxu1 %v4240_v22  ;;  %vm1304_vm15 = vmor %vm1302_vm13, %vm1303_vm12 }
 0x5a5   :  { %v1299_v62 = vsub.f32 1.0, %v1298_v43 }
 0x5a6   :  { %1831 = vmatpush.msrb.mxu2 %v4243_v63  ;;  %1946 = vmatpush.msrb.mxu1 %v4243_v63 }
 0x5a7   :  { %v1300_v43 = vmul.f32 %v4506_v56, %v1299_v62 }
 0x5a8   :  { %v2961_v24 = vpop.eup %2960  ;;  %1832 = vmatpush.msrb.mxu2 %v4246_v31  ;;  %1947 = vmatpush.msrb.mxu1 %v4246_v31 }
 0x5a9   :  { %v1278_v61 = vmul.f32 %v2961_v24, %v1276_v41  ;;  %vm1283_vm4 = vweird.f32 %v2961_v24  ;;  %v1301_v62 = vadd.f32 %v4506_v56, %v1300_v43  ;;  %v5377_v41 = vld [vmem:[#allocation20_spill] sm:$0xff]  ;;  %v2790_v43 = vld [vmem:[%s5183_s4 + $0x3] sm:$0x7] }
 0x5aa   :  { %vm1284_vm8 = vmor %vm1282_vm6, %vm1283_vm4  ;;  %1833 = vmatpush.msrb.mxu2 %v4249_v36  ;;  %1948 = vmatpush.msrb.mxu1 %v4249_v36 }
 0x5ab   :  { %v1279_v23 = vsub.f32 1.0, %v1278_v61  ;;  %v1305_v4 = vsel %vm1304_vm15, %v4506_v56, %v1301_v62  ;;  %v4561_v56 = vpop.permute.xlu1 %1323  ;;  %v1616_v62 = vpop.f32.mrf.mxu1 }
 0x5ac   :  { %1834 = vmatpush.msrb.mxu2 %v4252_v15  ;;  %1949 = vmatpush.msrb.mxu1 %v4252_v15  ;;  %5378 = vst [vmem:[#allocation40_spill] sm:$0xff] %v4561_v56  ;;  %vm1325_vm2 = vcmp.eq.s32.totalorder %v4561_v56, 1 }
 0x5ad   :  { %v1280_v7 = vmul.f32 %v2961_v24, %v1279_v23 }
 0x5ae   :  { %1835 = vmatpush.msrb.mxu2 %v4257_v52  ;;  %1950 = vmatpush.msrb.mxu1 %v4257_v52 }
 0x5af   :  { %v1281_v61 = vadd.f32 %v2961_v24, %v1280_v7  ;;  %v5376_v7 = vld [vmem:[#allocation36_spill] sm:$0xff] }
 0x5b0   :  { %v279_v2 = vadd.f32 %v5377_v41, %v5376_v7  ;;  %1836 = vmatpush.msrb.mxu2 %v4261_v10  ;;  %1951 = vmatpush.msrb.mxu1 %v4261_v10 }
 0x5b1   :  { %v1285_v23 = vsel %vm1284_vm8, %v2961_v24, %v1281_v61  ;;  %v1309_v24 = vor.u32 1.1754944e-38, %v1308_v33  ;;  %v4612_v33 = vperm.slane %v2790_v43, 1 }
 0x5b2   :  { %v1290_v18 = vsel %vm1287_vm10, %v1289_v26, %v1285_v23  ;;  %1837 = vmatpush.msrb.mxu2 %v4264_v40  ;;  %1952 = vmatpush.msrb.mxu1 %v4264_v40  ;;  %v4609_v23 = vperm.slane %v2790_v43, 0 }
 0x5b3   :  { %v1313_v57 = vmul.f32 %v1312_v6, %v1290_v18  ;;  %v1310_v6 = vsel %vm1307_vm0, %v1309_v24, %v1305_v4  ;;  %5382 = vst [vmem:[#allocation45_spill] sm:$0xff] %v4612_v33  ;;  %v1636_v24 = vpop.f32.mrf.mxu1 }
 0x5b4   :  { %v1316_v60 = vsub.f32 1.0, %v1310_v6  ;;  %v1318_v18 = vmul.f32 %v1310_v6, %v4297_v45  ;;  %1838 = vmatpush.msrb.mxu2 %v4267_v51  ;;  %1953 = vmatpush.msrb.mxu1 %v4267_v51  ;;  %v1412_v45 = vpop.f32.mrf.mxu2  ;;  %5381 = vst [vmem:[#allocation44_spill] sm:$0xff] %v4609_v23  ;;  %v1454_v6 = vadd.f32 %v1453_v16, %v4612_v33 }
 0x5b5   :  { %v1314_v59 = vadd.f32 %v1313_v57, %v279_v2  ;;  %v1413_v7 = vadd.f32 %v1412_v45, %v4609_v23 }
 0x5b6   :  { %1839 = vmatpush.msrb.mxu2 %v4270_v48  ;;  %1954 = vmatpush.msrb.mxu1 %v4270_v48 }
 0x5b7   :  { %2962 = vtanh.f32 %v1314_v59  ;;  %v1659_v41 = vadd.f32 %v1616_v62, %v1413_v7 }
 0x5b8   :  { %1840 = vmatpush.msrb.mxu2 %v4272_v35  ;;  %1955 = vmatpush.msrb.mxu1 %v4272_v35 }
 0x5b9   :  { %v2792_v4 = vmul.f32 -1.442695, %v1659_v41 }
 0x5ba   :  { %1841 = vmatpush.msrb.mxu2 %v4275_v3  ;;  %1956 = vmatpush.msrb.mxu1 %v4275_v3 }
 0x5bb   :  { %2964 = vpow2.f32 %v2792_v4 }
 0x5bc   :  { %1842 = vmatpush.msrb.mxu2 %v4279_v29  ;;  %1957 = vmatpush.msrb.mxu1 %v4279_v29 }
 0x5bd   :  { %v2963_v57 = vpop.eup %2962 }
 0x5be   :  { %v1317_v2 = vmul.f32 %v2963_v57, %v1316_v60  ;;  %v1679_v60 = vadd.f32 %v1636_v24, %v1454_v6 }
 0x5c0   :  { %v1319_v26 = vadd.f32 %v1318_v18, %v1317_v2  ;;  %v2793_v57 = vmul.f32 -1.442695, %v1679_v60 }
 0x5c1   :  { %v2965_v18 = vpop.eup %2964 }
 0x5c2   :  { %2834 = vmatmul.msk.f32.gmra.mxu2 %vm1325_vm2, %v1319_v26  ;;  %2842 = vmatmul.msk.f32.gmra.mxu3 %vm1325_vm2, %v1319_v26  ;;  %2966 = vpow2.f32 %v2793_v57 }
 0x5c3   :  { %2850 = vmatmul.msk.f32.gmra.mxu0 %vm1325_vm2, %v1319_v26  ;;  %v1663_v26 = vadd.f32 1.0, %v2965_v18  ;;  %v4628_v18 = vld [vmem:[%s5184_s5 + $0x1] ss:$0 sm:$0xff] }
 0x5c5   :  { %2968 = vrcp.f32 %v1663_v26  ;;  %v1675_v57 = vand.u32 2147483648, %v1663_v26  ;;  %vm1669_vm6 = vweird.f32 %v1663_v26 }
 0x5c7   :  { %v1676_v23 = vor.u32 1.1754944e-38, %v1675_v57 }
 0x5c8   :  { %v2967_v56 = vpop.eup %2966 }
 0x5c9   :  { %v1683_v62 = vadd.f32 1.0, %v2967_v56  ;;  %v1673_v56 = vand.u32 2147483647, %v1663_v26 }
 0x5ca   :  { %1655 = vmatmul.f32.vlgmr.msra.gmra.mxu2 %v5365_v37  ;;  %v4602_v37 = vpop.f32.mrf.mxu2 }
 0x5cb   :  { %1962 = vmatpush.msra.mxu2 %v4299_v5  ;;  %5379 = vst [vmem:[#allocation42_spill] sm:$0xff] %v4602_v37  ;;  %v2969_v7 = vpop.eup %2968  ;;  %2970 = vrcp.f32 %v1683_v62  ;;  %v1494_v37 = vpop.f32.mrf.mxu0  ;;  %vm1674_vm10 = vcmp.eq.f32.partialorder %v1673_v56, 8.507059e+37  ;;  %vm1689_vm13 = vweird.f32 %v1683_v62 }
 0x5cc   :  { %vm1670_vm4 = vweird.f32 %v2969_v7 }
 0x5cd   :  { %1963 = vmatpush.msra.mxu2 %v4304_v42  ;;  %vm1671_vm8 = vmor %vm1669_vm6, %vm1670_vm4 }
 0x5cf   :  { %1964 = vmatpush.msra.mxu2 %v4309_v44 }
 0x5d1   :  { %1965 = vmatpush.msra.mxu2 %v4314_v11 }
 0x5d2   :  { %v4607_v61 = vpop.f32.mrf.mxu2 }
 0x5d3   :  { %1966 = vmatpush.msra.mxu2 %v4319_v13  ;;  %5380 = vst [vmem:[#allocation28_spill] sm:$0xff] %v4607_v61  ;;  %v2971_v61 = vpop.eup %2970 }
 0x5d4   :  { %v1685_v24 = vmul.f32 %v2971_v61, %v1683_v62  ;;  %vm1690_vm12 = vweird.f32 %v2971_v61 }
 0x5d5   :  { %1967 = vmatpush.msra.mxu2 %v4330_v19  ;;  %vm1691_vm15 = vmor %vm1689_vm13, %vm1690_vm12 }
 0x5d6   :  { %v1686_v60 = vsub.f32 1.0, %v1685_v24 }
 0x5d7   :  { %1968 = vmatpush.msra.mxu2 %v4334_v58 }
 0x5d9   :  { %1969 = vmatpush.msra.mxu2 %v4339_v14 }
 0x5da   :  { %v4614_v59 = vpop.f32.mrf.mxu2 }
 0x5db   :  { %1970 = vmatpush.msra.mxu2 %v4344_v46  ;;  %5383 = vst [vmem:[#allocation43_spill] sm:$0xff] %v4614_v59  ;;  %v1665_v59 = vmul.f32 %v2969_v7, %v1663_v26  ;;  %v1693_v26 = vand.u32 2147483647, %v1683_v62 }
 0x5dd   :  { %1971 = vmatpush.msra.mxu2 %v4354_v8  ;;  %v1666_v16 = vsub.f32 1.0, %v1665_v59  ;;  %vm1694_vm0 = vcmp.eq.f32.partialorder %v1693_v26, 8.507059e+37  ;;  %v5405_v26 = vld [vmem:[#allocation44_spill] sm:$0xff] }
 0x5df   :  { %1972 = vmatpush.msra.mxu2 %v4359_v9  ;;  %v1667_v4 = vmul.f32 %v2969_v7, %v1666_v16 }
 0x5e1   :  { %1973 = vmatpush.msra.mxu2 %v4364_v0 }
 0x5e2   :  { %v4617_v2 = vpop.f32.mrf.mxu2 }
 0x5e3   :  { %1974 = vmatpush.msra.mxu2 %v4369_v54  ;;  %5384 = vst [vmem:[#allocation41_spill] sm:$0xff] %v4617_v2  ;;  %v1668_v2 = vadd.f32 %v2969_v7, %v1667_v4 }
 0x5e5   :  { %1975 = vmatpush.msra.mxu2 %v4379_v38  ;;  %v1672_v59 = vsel %vm1671_vm8, %v2969_v7, %v1668_v2 }
 0x5e7   :  { %1976 = vmatpush.msra.mxu2 %v4386_v47 }
 0x5e9   :  { %1977 = vmatpush.msra.mxu2 %v4391_v30  ;;  %v1695_v30 = vand.u32 2147483648, %v1683_v62  ;;  %v5404_v62 = vld [vmem:[#allocation45_spill] sm:$0xff] }
 0x5ea   :  { %v4619_v45 = vpop.f32.mrf.mxu2 }
 0x5eb   :  { %5385 = vst [vmem:[#allocation25_spill] sm:$0xff] %v4619_v45  ;;  %v1687_v45 = vmul.f32 %v2971_v61, %v1686_v60  ;;  %v1696_v47 = vor.u32 1.1754944e-38, %v1695_v30 }
 0x5ed   :  { %v1688_v4 = vadd.f32 %v2971_v61, %v1687_v45 }
 0x5f2   :  { %v4621_v41 = vpop.f32.mrf.mxu2 }
 0x5f3   :  { %5386 = vst [vmem:[#allocation34_spill] sm:$0xff] %v4621_v41  ;;  %v4630_v41 = vperm.slane %v2790_v43, 2  ;;  %v1692_v43 = vsel %vm1691_vm15, %v2971_v61, %v1688_v4 }
 0x5f4   :  { %v1697_v2 = vsel %vm1694_vm0, %v1696_v47, %v1692_v43 }
 0x5f5   :  { %v1495_v33 = vadd.f32 %v1494_v37, %v4630_v41  ;;  %v1703_v7 = vsub.f32 1.0, %v1697_v2 }
 0x645   :  { %v4623_v6 = vpop.f32.mrf.mxu2 }
 0x646   :  { %5387 = vst [vmem:[#allocation30_spill] sm:$0xff] %v4623_v6  ;;  %v1677_v6 = vsel %vm1674_vm10, %v1676_v23, %v1672_v59 }
 0x64d   :  { %v1656_v16 = vpop.f32.mrf.mxu2 }
 0x64e   :  { %v1699_v24 = vadd.f32 %v4628_v18, %v1656_v16  ;;  %v1705_v16 = vmul.f32 0.0, %v1697_v2 }
 0x650   :  { %v1700_v29 = vmul.f32 %v1699_v24, %v1677_v6 }
 0x652   :  { %v1701_v60 = vadd.f32 %v1700_v29, %v1495_v33 }
 0x654   :  { %2972 = vtanh.f32 %v1701_v60  ;;  %v5406_v60 = vld [vmem:[#allocation42_spill] sm:$0xff] }
 0x655   :  { %v1416_v43 = vadd.f32 %v5406_v60, %v5405_v26 }
 0x65a   :  { %v2973_v57 = vpop.eup %2972 }
 0x65b   :  { %v1704_v56 = vmul.f32 %v2973_v57, %v1703_v7 }
 0x65d   :  { %v4634_v45 = vadd.f32 %v1705_v16, %v1704_v56 }
 0x65f   :  { %2794 = vmatmul.msk.f32.vlgmr.msra.gmra.mxu3 %vm473_vm11, %v4634_v45  ;;  %2795 = vmatmul.msk.f32.vlgmr.msrb.gmra.mxu0 %vm473_vm11, %v4634_v45 }
 0x660   :  { %2796 = vmatmul.msk.f32.vlgmr.msra.gmra.mxu1 %vm473_vm11, %v4634_v45  ;;  %1982 = vmatpush.msra.mxu3 %v4381_v55 }
 0x661   :  { %2057 = vmatpush.msrb.mxu0 %v4231_v28  ;;  %2077 = vmatpush.msra.mxu1 %v4299_v5  ;;  %v5388_v28 = vld [vmem:[#allocation37_spill] sm:$0xff] }
 0x662   :  { %1983 = vmatpush.msra.mxu3 %v4447_v20 }
 0x663   :  { %2058 = vmatpush.msrb.mxu0 %v4234_v12  ;;  %2078 = vmatpush.msra.mxu1 %v4304_v42  ;;  %v5389_v12 = vld [vmem:[#allocation26_spill] sm:$0xff] }
 0x664   :  { %1984 = vmatpush.msra.mxu3 %v4449_v25 }
 0x665   :  { %2059 = vmatpush.msrb.mxu0 %v4237_v27  ;;  %2079 = vmatpush.msra.mxu1 %v4309_v44  ;;  %v5390_v27 = vld [vmem:[#allocation38_spill] sm:$0xff] }
 0x666   :  { %1985 = vmatpush.msra.mxu3 %v4459_v17 }
 0x667   :  { %2060 = vmatpush.msrb.mxu0 %v4240_v22  ;;  %2080 = vmatpush.msra.mxu1 %v4314_v11  ;;  %v5391_v22 = vld [vmem:[#allocation19_spill] sm:$0xff] }
 0x668   :  { %1986 = vmatpush.msra.mxu3 %v4461_v21 }
 0x669   :  { %2061 = vmatpush.msrb.mxu0 %v4243_v63  ;;  %2081 = vmatpush.msra.mxu1 %v4319_v13  ;;  %v5392_v63 = vld [vmem:[#allocation18_spill] sm:$0xff] }
 0x66a   :  { %1987 = vmatpush.msra.mxu3 %v4467_v32 }
 0x66b   :  { %2062 = vmatpush.msrb.mxu0 %v4246_v31  ;;  %2082 = vmatpush.msra.mxu1 %v4330_v19  ;;  %v5393_v31 = vld [vmem:[#allocation22_spill] sm:$0xff] }
 0x66c   :  { %1988 = vmatpush.msra.mxu3 %v4472_v34 }
 0x66d   :  { %2063 = vmatpush.msrb.mxu0 %v4249_v36  ;;  %2083 = vmatpush.msra.mxu1 %v4334_v58  ;;  %v5394_v36 = vld [vmem:[#allocation24_spill] sm:$0xff] }
 0x66e   :  { %1989 = vmatpush.msra.mxu3 %v4477_v49 }
 0x66f   :  { %2064 = vmatpush.msrb.mxu0 %v4252_v15  ;;  %2084 = vmatpush.msra.mxu1 %v4339_v14  ;;  %v5395_v15 = vld [vmem:[#allocation29_spill] sm:$0xff] }
 0x670   :  { %1990 = vmatpush.msra.mxu3 %v4484_v53 }
 0x671   :  { %2065 = vmatpush.msrb.mxu0 %v4257_v52  ;;  %2085 = vmatpush.msra.mxu1 %v4344_v46  ;;  %v1497_v52 = vpop.f32.mrf.mxu0 }
 0x672   :  { %1991 = vmatpush.msra.mxu3 %v4493_v1 }
 0x673   :  { %2066 = vmatpush.msrb.mxu0 %v4261_v10  ;;  %2086 = vmatpush.msra.mxu1 %v4354_v8  ;;  %v1456_v10 = vpop.f32.mrf.mxu3 }
 0x674   :  { %1992 = vmatpush.msra.mxu3 %v4498_v39  ;;  %v1457_v6 = vadd.f32 %v1456_v10, %v5404_v62 }
 0x675   :  { %2067 = vmatpush.msrb.mxu0 %v4264_v40  ;;  %2087 = vmatpush.msra.mxu1 %v4359_v9 }
 0x676   :  { %1993 = vmatpush.msra.mxu3 %v5388_v28 }
 0x677   :  { %2068 = vmatpush.msrb.mxu0 %v4267_v51  ;;  %2088 = vmatpush.msra.mxu1 %v4364_v0 }
 0x678   :  { %1994 = vmatpush.msra.mxu3 %v5389_v12 }
 0x679   :  { %2069 = vmatpush.msrb.mxu0 %v4270_v48  ;;  %2089 = vmatpush.msra.mxu1 %v4369_v54  ;;  %v4693_v40 = vpop.f32.mrf.mxu0 }
 0x67a   :  { %1995 = vmatpush.msra.mxu3 %v5390_v27 }
 0x67b   :  { %2070 = vmatpush.msrb.mxu0 %v4272_v35  ;;  %2090 = vmatpush.msra.mxu1 %v4379_v38  ;;  %v4695_v51 = vpop.f32.mrf.mxu3 }
 0x67c   :  { %1996 = vmatpush.msra.mxu3 %v5391_v22 }
 0x67d   :  { %2071 = vmatpush.msrb.mxu0 %v4275_v3  ;;  %2091 = vmatpush.msra.mxu1 %v5392_v63 }
 0x67e   :  { %1997 = vmatpush.msra.mxu3 %v5393_v31 }
 0x67f   :  { %2072 = vmatpush.msrb.mxu0 %v5394_v36  ;;  %2092 = vmatpush.msra.mxu1 %v5395_v15 }
 0x681   :  { %v4697_v48 = vpop.f32.mrf.mxu0 }
 0x683   :  { %v4699_v35 = vpop.f32.mrf.mxu3 }
 0x689   :  { %v4701_v29 = vpop.f32.mrf.mxu0 }
 0x68a   :  { %5396 = vst [vmem:[#allocation46_spill] sm:$0xff] %v4701_v29 }
 0x68b   :  { %v4703_v3 = vpop.f32.mrf.mxu3 }
 0x68c   :  { %5397 = vst [vmem:[#allocation47_spill] sm:$0xff] %v4703_v3 }
 0x691   :  { %v4705_v47 = vpop.f32.mrf.mxu0 }
 0x692   :  { %5398 = vst [vmem:[#allocation33_spill] sm:$0xff] %v4705_v47 }
 0x693   :  { %v4707_v30 = vpop.f32.mrf.mxu3 }
 0x694   :  { %5399 = vst [vmem:[#allocation23_spill] sm:$0xff] %v4707_v30 }
 0x699   :  { %v4709_v37 = vpop.f32.mrf.mxu0 }
 0x69a   :  { %5400 = vst [vmem:[#allocation32_spill] sm:$0xff] %v4709_v37 }
 0x69b   :  { %v4711_v61 = vpop.f32.mrf.mxu3 }
 0x69c   :  { %5401 = vst [vmem:[#allocation36_spill] sm:$0xff] %v4711_v61 }
 0x6a1   :  { %v4713_v23 = vpop.f32.mrf.mxu0 }
 0x6a2   :  { %5402 = vst [vmem:[#allocation20_spill] sm:$0xff] %v4713_v23 }
 0x6a3   :  { %v4715_v33 = vpop.f32.mrf.mxu3 }
 0x6a4   :  { %5403 = vst [vmem:[#allocation37_spill] sm:$0xff] %v4715_v33 }
 0x6dc   :  { %v1749_v59 = vpop.f32.mrf.mxu0 }
 0x6dd   :  { %v1792_v24 = vadd.f32 %v1749_v59, %v1457_v6 }
 0x6df   :  { %v2798_v4 = vmul.f32 -1.442695, %v1792_v24 }
 0x6e1   :  { %2974 = vpow2.f32 %v2798_v4 }
 0x6e2   :  { %v1729_v2 = vpop.f32.mrf.mxu3 }
 0x6e3   :  { %v1772_v7 = vadd.f32 %v1729_v2, %v1416_v43  ;;  %v1769_v43 = vpop.f32.mrf.mxu1 }
 0x6e5   :  { %v2797_v57 = vmul.f32 -1.442695, %v1772_v7 }
 0x6e7   :  { %v2975_v56 = vpop.eup %2974  ;;  %2976 = vpow2.f32 %v2797_v57  ;;  %v1812_v57 = vadd.f32 %v4628_v18, %v1769_v43 }
 0x6e8   :  { %v1796_v16 = vadd.f32 1.0, %v2975_v56 }
 0x6ea   :  { %2978 = vrcp.f32 %v1796_v16  ;;  %vm1802_vm13 = vweird.f32 %v1796_v16 }
 0x6ed   :  { %v2977_v36 = vpop.eup %2976 }
 0x6ee   :  { %v1776_v23 = vadd.f32 1.0, %v2977_v36 }
 0x6f0   :  { %2980 = vrcp.f32 %v1776_v23  ;;  %v2979_v33 = vpop.eup %2978  ;;  %v1788_v24 = vand.u32 2147483648, %v1776_v23  ;;  %v1786_v4 = vand.u32 2147483647, %v1776_v23  ;;  %vm1782_vm6 = vweird.f32 %v1776_v23 }
 0x6f1   :  { %v1798_v37 = vmul.f32 %v2979_v33, %v1796_v16  ;;  %vm1803_vm12 = vweird.f32 %v2979_v33 }
 0x6f2   :  { %v1789_v7 = vor.u32 1.1754944e-38, %v1788_v24  ;;  %vm1787_vm10 = vcmp.eq.f32.partialorder %v1786_v4, 8.507059e+37  ;;  %vm1804_vm15 = vmor %vm1802_vm13, %vm1803_vm12 }
 0x6f3   :  { %v1799_v6 = vsub.f32 1.0, %v1798_v37  ;;  %v1498_v37 = vadd.f32 %v1497_v52, %v4630_v41 }
 0x6f5   :  { %v1800_v60 = vmul.f32 %v2979_v33, %v1799_v6 }
 0x6f6   :  { %v2981_v10 = vpop.eup %2980 }
 0x6f7   :  { %v1778_v61 = vmul.f32 %v2981_v10, %v1776_v23  ;;  %vm1783_vm4 = vweird.f32 %v2981_v10  ;;  %v1801_v30 = vadd.f32 %v2979_v33, %v1800_v60 }
 0x6f8   :  { %vm1784_vm8 = vmor %vm1782_vm6, %vm1783_vm4 }
 0x6f9   :  { %v1779_v59 = vsub.f32 1.0, %v1778_v61  ;;  %v1808_v61 = vand.u32 2147483648, %v1796_v16  ;;  %v1805_v3 = vsel %vm1804_vm15, %v2979_v33, %v1801_v30  ;;  %v4750_v33 = vld [vmem:[#allocation9 + $0x2b8] sm:$0xff] }
 0x6fb   :  { %v1780_v47 = vmul.f32 %v2981_v10, %v1779_v59  ;;  %v1806_v59 = vand.u32 2147483647, %v1796_v16 }
 0x6fd   :  { %v1781_v2 = vadd.f32 %v2981_v10, %v1780_v47  ;;  %v1809_v47 = vor.u32 1.1754944e-38, %v1808_v61  ;;  %vm1807_vm0 = vcmp.eq.f32.partialorder %v1806_v59, 8.507059e+37 }
 0x6ff   :  { %v1785_v56 = vsel %vm1784_vm8, %v2981_v10, %v1781_v2  ;;  %v1810_v23 = vsel %vm1807_vm0, %v1809_v47, %v1805_v3  ;;  %v4725_v10 = vsel %vm473_vm11, %v4634_v45, 0.0  ;;  %v4740_v45 = vld [vmem:[#allocation9 + $0x2e8] sm:$0xff]  ;;  %v4745_v3 = vld [vmem:[#allocation9 + $0x2d0] sm:$0xff] }
 0x700   :  { %v1790_v36 = vsel %vm1787_vm10, %v1789_v7, %v1785_v56  ;;  %v1816_v24 = vsub.f32 1.0, %v1810_v23  ;;  %v1818_v52 = vmul.f32 %v1810_v23, %v4725_v10 }
 0x701   :  { %v1813_v29 = vmul.f32 %v1812_v57, %v1790_v36 }
 0x703   :  { %v1814_v6 = vadd.f32 %v1813_v29, %v1498_v37  ;;  %v5423_v29 = vld [vmem:[#allocation34_spill] sm:$0xff] }
 0x705   :  { %2982 = vtanh.f32 %v1814_v6 }
 0x70b   :  { %v2983_v43 = vpop.eup %2982 }
 0x70c   :  { %v1817_v4 = vmul.f32 %v2983_v43, %v1816_v24 }
 0x70e   :  { %v4728_v60 = vadd.f32 %v1818_v52, %v1817_v4 }
 0x710   :  { %v4734_v30 = vsel %vm593_vm7, %v4728_v60, %v4725_v10 }
 0x711   :  { %1843 = vmatmul.f32.vlgmr.msrb.gmra.mxu2 %v4734_v30  ;;  %1863 = vmatmul.f32.vlgmr.msrb.gmra.mxu3 %v4734_v30 }
 0x712   :  { %1883 = vmatmul.f32.vlgmr.msra.gmra.mxu0 %v4734_v30  ;;  %2097 = vmatpush.msrb.mxu2 %v4381_v55  ;;  %v4755_v55 = vld [vmem:[#allocation9 + $0x2a0] sm:$0xff] }
 0x713   :  { %2172 = vmatpush.msrb.mxu3 %v4740_v45  ;;  %2192 = vmatpush.msra.mxu0 %v4299_v5  ;;  %v4760_v5 = vld [vmem:[#allocation9 + $0x288] sm:$0xff] }
 0x714   :  { %2098 = vmatpush.msrb.mxu2 %v4447_v20 }
 0x715   :  { %2173 = vmatpush.msrb.mxu3 %v4745_v3  ;;  %2193 = vmatpush.msra.mxu0 %v4304_v42  ;;  %v4765_v42 = vld [vmem:[#allocation9 + $0x270] sm:$0xff] }
 0x716   :  { %2099 = vmatpush.msrb.mxu2 %v4449_v25 }
 0x717   :  { %2174 = vmatpush.msrb.mxu3 %v4750_v33  ;;  %2194 = vmatpush.msra.mxu0 %v4309_v44  ;;  %v4770_v44 = vld [vmem:[#allocation9 + $0x258] sm:$0xff] }
 0x718   :  { %2100 = vmatpush.msrb.mxu2 %v4459_v17 }
 0x719   :  { %2175 = vmatpush.msrb.mxu3 %v4755_v55  ;;  %2195 = vmatpush.msra.mxu0 %v4314_v11  ;;  %v4775_v11 = vld [vmem:[#allocation9 + $0x240] sm:$0xff] }
 0x71a   :  { %2101 = vmatpush.msrb.mxu2 %v4461_v21 }
 0x71b   :  { %2176 = vmatpush.msrb.mxu3 %v4760_v5  ;;  %2196 = vmatpush.msra.mxu0 %v4319_v13  ;;  %v4780_v13 = vld [vmem:[#allocation9 + $0x228] sm:$0xff] }
 0x71c   :  { %2102 = vmatpush.msrb.mxu2 %v4467_v32 }
 0x71d   :  { %2177 = vmatpush.msrb.mxu3 %v4765_v42  ;;  %2197 = vmatpush.msra.mxu0 %v4330_v19  ;;  %v4785_v19 = vld [vmem:[#allocation9 + $0x210] sm:$0xff] }
 0x71e   :  { %2103 = vmatpush.msrb.mxu2 %v4472_v34 }
 0x71f   :  { %2178 = vmatpush.msrb.mxu3 %v4770_v44  ;;  %2198 = vmatpush.msra.mxu0 %v4334_v58  ;;  %v4790_v58 = vld [vmem:[#allocation9 + $0x1f8] sm:$0xff] }
 0x720   :  { %2104 = vmatpush.msrb.mxu2 %v4477_v49 }
 0x721   :  { %2179 = vmatpush.msrb.mxu3 %v4775_v11  ;;  %2199 = vmatpush.msra.mxu0 %v4339_v14  ;;  %v4795_v14 = vld [vmem:[#allocation9 + $0x1e0] sm:$0xff] }
 0x722   :  { %2105 = vmatpush.msrb.mxu2 %v4484_v53 }
 0x723   :  { %2180 = vmatpush.msrb.mxu3 %v4780_v13  ;;  %2200 = vmatpush.msra.mxu0 %v4344_v46  ;;  %v4800_v46 = vld [vmem:[#allocation9 + $0x1c8] sm:$0xff] }
 0x724   :  { %2106 = vmatpush.msrb.mxu2 %v4493_v1 }
 0x725   :  { %2181 = vmatpush.msrb.mxu3 %v4785_v19  ;;  %2201 = vmatpush.msra.mxu0 %v4354_v8  ;;  %v4805_v8 = vld [vmem:[#allocation9 + $0x1b0] sm:$0xff] }
 0x726   :  { %2107 = vmatpush.msrb.mxu2 %v4498_v39 }
 0x727   :  { %2182 = vmatpush.msrb.mxu3 %v4790_v58  ;;  %2202 = vmatpush.msra.mxu0 %v4359_v9  ;;  %v4810_v9 = vld [vmem:[#allocation9 + $0x198] sm:$0xff] }
 0x728   :  { %2108 = vmatpush.msrb.mxu2 %v5388_v28 }
 0x729   :  { %2183 = vmatpush.msrb.mxu3 %v4795_v14  ;;  %2203 = vmatpush.msra.mxu0 %v4364_v0  ;;  %v4815_v0 = vld [vmem:[#allocation9 + $0x180] sm:$0xff] }
 0x72a   :  { %2109 = vmatpush.msrb.mxu2 %v5389_v12 }
 0x72b   :  { %2184 = vmatpush.msrb.mxu3 %v4800_v46  ;;  %2204 = vmatpush.msra.mxu0 %v4369_v54  ;;  %v5408_v54 = vld [vmem:[#allocation28_spill] sm:$0xff] }
 0x72c   :  { %2110 = vmatpush.msrb.mxu2 %v5390_v27  ;;  %v1419_v16 = vadd.f32 %v5408_v54, %v5405_v26 }
 0x72d   :  { %2185 = vmatpush.msrb.mxu3 %v4805_v8  ;;  %2205 = vmatpush.msra.mxu0 %v4379_v38  ;;  %v1460_v38 = vadd.f32 %v4695_v51, %v5404_v62 }
 0x72e   :  { %2111 = vmatpush.msrb.mxu2 %v5391_v22 }
 0x72f   :  { %2186 = vmatpush.msrb.mxu3 %v4810_v9  ;;  %2206 = vmatpush.msra.mxu0 %v5392_v63 }
 0x730   :  { %2112 = vmatpush.msrb.mxu2 %v5393_v31 }
 0x731   :  { %2187 = vmatpush.msrb.mxu3 %v4815_v0  ;;  %2207 = vmatpush.msra.mxu0 %v5395_v15 }
 0x794   :  { %v1844_v2 = vpop.f32.mrf.mxu2  ;;  %v1864_v7 = vpop.f32.mrf.mxu3 }
 0x795   :  { %v1887_v57 = vadd.f32 %v1844_v2, %v1419_v16  ;;  %v1907_v56 = vadd.f32 %v1864_v7, %v1460_v38  ;;  %v1884_v16 = vpop.f32.mrf.mxu0 }
 0x797   :  { %v2799_v36 = vmul.f32 -1.442695, %v1887_v57  ;;  %v2800_v63 = vmul.f32 -1.442695, %v1907_v56  ;;  %v1927_v57 = vadd.f32 %v4628_v18, %v1884_v16 }
 0x799   :  { %2984 = vpow2.f32 %v2799_v36 }
 0x79a   :  { %2986 = vpow2.f32 %v2800_v63 }
 0x79f   :  { %v2985_v37 = vpop.eup %2984 }
 0x7a0   :  { %v2987_v61 = vpop.eup %2986  ;;  %v1891_v59 = vadd.f32 1.0, %v2985_v37  ;;  %v1501_v37 = vadd.f32 %v4693_v40, %v4630_v41 }
 0x7a1   :  { %v1911_v6 = vadd.f32 1.0, %v2987_v61 }
 0x7a2   :  { %2988 = vrcp.f32 %v1891_v59  ;;  %v1903_v51 = vand.u32 2147483648, %v1891_v59  ;;  %v1901_v54 = vand.u32 2147483647, %v1891_v59  ;;  %vm1897_vm6 = vweird.f32 %v1891_v59 }
 0x7a3   :  { %2990 = vrcp.f32 %v1911_v6  ;;  %vm1917_vm13 = vweird.f32 %v1911_v6 }
 0x7a4   :  { %v1904_v7 = vor.u32 1.1754944e-38, %v1903_v51  ;;  %vm1902_vm10 = vcmp.eq.f32.partialorder %v1901_v54, 8.507059e+37 }
 0x7a8   :  { %v2989_v15 = vpop.eup %2988 }
 0x7a9   :  { %v2991_v47 = vpop.eup %2990  ;;  %v1893_v23 = vmul.f32 %v2989_v15, %v1891_v59  ;;  %vm1898_vm4 = vweird.f32 %v2989_v15 }
 0x7aa   :  { %v1913_v24 = vmul.f32 %v2991_v47, %v1911_v6  ;;  %vm1899_vm8 = vmor %vm1897_vm6, %vm1898_vm4  ;;  %vm1918_vm12 = vweird.f32 %v2991_v47 }
 0x7ab   :  { %v1894_v43 = vsub.f32 1.0, %v1893_v23  ;;  %v1923_v23 = vand.u32 2147483648, %v1911_v6  ;;  %vm1919_vm15 = vmor %vm1917_vm13, %vm1918_vm12 }
 0x7ac   :  { %v1914_v4 = vsub.f32 1.0, %v1913_v24  ;;  %v1921_v24 = vand.u32 2147483647, %v1911_v6  ;;  %v4838_v6 = vld [vmem:[#allocation9 + $0x2f8] sm:$0xff] }
 0x7ad   :  { %v1895_v52 = vmul.f32 %v2989_v15, %v1894_v43  ;;  %v1924_v59 = vor.u32 1.1754944e-38, %v1923_v23 }
 0x7ae   :  { %v1915_v38 = vmul.f32 %v2991_v47, %v1914_v4  ;;  %vm1922_vm0 = vcmp.eq.f32.partialorder %v1921_v24, 8.507059e+37 }
 0x7af   :  { %v1896_v2 = vadd.f32 %v2989_v15, %v1895_v52 }
 0x7b0   :  { %v1916_v63 = vadd.f32 %v2991_v47, %v1915_v38 }
 0x7b1   :  { %v1900_v56 = vsel %vm1899_vm8, %v2989_v15, %v1896_v2 }
 0x7b2   :  { %v1905_v36 = vsel %vm1902_vm10, %v1904_v7, %v1900_v56  ;;  %v1920_v4 = vsel %vm1919_vm15, %v2991_v47, %v1916_v63  ;;  %v4842_v47 = vld [vmem:[#allocation9 + $0x2f0] sm:$0xff]  ;;  %v4852_v7 = vld [vmem:[#allocation9 + $0x2c0] sm:$0xff] }
 0x7b3   :  { %v1928_v61 = vmul.f32 %v1927_v57, %v1905_v36  ;;  %v1925_v51 = vsel %vm1922_vm0, %v1924_v59, %v1920_v4  ;;  %v4857_v57 = vld [vmem:[#allocation9 + $0x2a8] sm:$0xff] }
 0x7b4   :  { %v1931_v52 = vsub.f32 1.0, %v1925_v51  ;;  %v1933_v16 = vmul.f32 %v1925_v51, %v4734_v30 }
 0x7b5   :  { %v1929_v43 = vadd.f32 %v1928_v61, %v1501_v37  ;;  %v1463_v37 = vadd.f32 %v4699_v35, %v5404_v62 }
 0x7b7   :  { %2992 = vtanh.f32 %v1929_v43 }
 0x7bd   :  { %v2993_v15 = vpop.eup %2992 }
 0x7be   :  { %v1932_v54 = vmul.f32 %v2993_v15, %v1931_v52 }
 0x7c0   :  { %v4827_v38 = vadd.f32 %v1933_v16, %v1932_v54 }
 0x7c2   :  { %5409 = vst [vmem:[#allocation26_spill] sm:$0xff] %v4827_v38  ;;  %v4833_v2 = vsel %vm715_vm1, %v4827_v38, %v4734_v30  ;;  %v4847_v30 = vld [vmem:[#allocation9 + $0x2d8] sm:$0xff] }
 0x7c3   :  { %1958 = vmatmul.f32.vlgmr.msrb.gmra.mxu1 %v4833_v2  ;;  %1978 = vmatmul.f32.vlgmr.msra.gmra.mxu2 %v4833_v2 }
 0x7c4   :  { %1998 = vmatmul.f32.vlgmr.msra.gmra.mxu3 %v4833_v2  ;;  %2212 = vmatpush.msrb.mxu1 %v4838_v6 }
 0x7c5   :  { %2287 = vmatpush.msra.mxu2 %v4740_v45  ;;  %2307 = vmatpush.msra.mxu3 %v4842_v47 }
 0x7c6   :  { %2213 = vmatpush.msrb.mxu1 %v4447_v20  ;;  %v4862_v20 = vld [vmem:[#allocation9 + $0x290] sm:$0xff] }
 0x7c7   :  { %2288 = vmatpush.msra.mxu2 %v4745_v3  ;;  %2308 = vmatpush.msra.mxu3 %v4847_v30 }
 0x7c8   :  { %2214 = vmatpush.msrb.mxu1 %v4449_v25  ;;  %v4867_v25 = vld [vmem:[#allocation9 + $0x278] sm:$0xff] }
 0x7c9   :  { %2289 = vmatpush.msra.mxu2 %v4750_v33  ;;  %2309 = vmatpush.msra.mxu3 %v4852_v7 }
 0x7ca   :  { %2215 = vmatpush.msrb.mxu1 %v4459_v17  ;;  %v4872_v17 = vld [vmem:[#allocation9 + $0x260] sm:$0xff] }
 0x7cb   :  { %2290 = vmatpush.msra.mxu2 %v4755_v55  ;;  %2310 = vmatpush.msra.mxu3 %v4857_v57 }
 0x7cc   :  { %2216 = vmatpush.msrb.mxu1 %v4461_v21  ;;  %v4877_v21 = vld [vmem:[#allocation9 + $0x248] sm:$0xff] }
 0x7cd   :  { %2291 = vmatpush.msra.mxu2 %v4760_v5  ;;  %2311 = vmatpush.msra.mxu3 %v4862_v20 }
 0x7ce   :  { %2217 = vmatpush.msrb.mxu1 %v4467_v32  ;;  %v4882_v32 = vld [vmem:[#allocation9 + $0x230] sm:$0xff] }
 0x7cf   :  { %2292 = vmatpush.msra.mxu2 %v4765_v42  ;;  %2312 = vmatpush.msra.mxu3 %v4867_v25 }
 0x7d0   :  { %2218 = vmatpush.msrb.mxu1 %v4472_v34  ;;  %v4887_v34 = vld [vmem:[#allocation9 + $0x218] sm:$0xff] }
 0x7d1   :  { %2293 = vmatpush.msra.mxu2 %v4770_v44  ;;  %2313 = vmatpush.msra.mxu3 %v4872_v17 }
 0x7d2   :  { %2219 = vmatpush.msrb.mxu1 %v4477_v49  ;;  %v4892_v49 = vld [vmem:[#allocation9 + $0x200] sm:$0xff] }
 0x7d3   :  { %2294 = vmatpush.msra.mxu2 %v4775_v11  ;;  %2314 = vmatpush.msra.mxu3 %v4877_v21 }
 0x7d4   :  { %2220 = vmatpush.msrb.mxu1 %v4484_v53  ;;  %v4897_v53 = vld [vmem:[#allocation9 + $0x1e8] sm:$0xff] }
 0x7d5   :  { %2295 = vmatpush.msra.mxu2 %v4780_v13  ;;  %2315 = vmatpush.msra.mxu3 %v4882_v32 }
 0x7d6   :  { %2221 = vmatpush.msrb.mxu1 %v4493_v1  ;;  %v4902_v1 = vld [vmem:[#allocation9 + $0x1d0] sm:$0xff] }
 0x7d7   :  { %2296 = vmatpush.msra.mxu2 %v4785_v19  ;;  %2316 = vmatpush.msra.mxu3 %v4887_v34 }
 0x7d8   :  { %2222 = vmatpush.msrb.mxu1 %v4498_v39  ;;  %v4907_v39 = vld [vmem:[#allocation9 + $0x1b8] sm:$0xff] }
 0x7d9   :  { %2297 = vmatpush.msra.mxu2 %v4790_v58  ;;  %2317 = vmatpush.msra.mxu3 %v4892_v49 }
 0x7da   :  { %2223 = vmatpush.msrb.mxu1 %v5388_v28  ;;  %v4912_v28 = vld [vmem:[#allocation9 + $0x1a0] sm:$0xff] }
 0x7db   :  { %2298 = vmatpush.msra.mxu2 %v4795_v14  ;;  %2318 = vmatpush.msra.mxu3 %v4897_v53 }
 0x7dc   :  { %2224 = vmatpush.msrb.mxu1 %v5389_v12  ;;  %v4917_v12 = vld [vmem:[#allocation9 + $0x188] sm:$0xff] }
 0x7dd   :  { %2299 = vmatpush.msra.mxu2 %v4800_v46  ;;  %2319 = vmatpush.msra.mxu3 %v4902_v1 }
 0x7de   :  { %2225 = vmatpush.msrb.mxu1 %v5390_v27  ;;  %v5411_v27 = vld [vmem:[#allocation43_spill] sm:$0xff] }
 0x7df   :  { %2300 = vmatpush.msra.mxu2 %v4805_v8  ;;  %2320 = vmatpush.msra.mxu3 %v4907_v39  ;;  %v1422_v56 = vadd.f32 %v5411_v27, %v5405_v26 }
 0x7e0   :  { %2226 = vmatpush.msrb.mxu1 %v5391_v22 }
 0x7e1   :  { %2301 = vmatpush.msra.mxu2 %v4810_v9  ;;  %2321 = vmatpush.msra.mxu3 %v4912_v28 }
 0x7e2   :  { %2227 = vmatpush.msrb.mxu1 %v5393_v31 }
 0x7e3   :  { %2302 = vmatpush.msra.mxu2 %v4815_v0  ;;  %2322 = vmatpush.msra.mxu3 %v4917_v12 }
 0x840   :  { %v1959_v36 = vpop.f32.mrf.mxu1 }
 0x841   :  { %v2002_v63 = vadd.f32 %v1959_v36, %v1422_v56 }
 0x843   :  { %v2801_v22 = vmul.f32 -1.442695, %v2002_v63 }
 0x845   :  { %2994 = vpow2.f32 %v2801_v22 }
 0x846   :  { %v1979_v61 = vpop.f32.mrf.mxu2 }
 0x847   :  { %v2022_v23 = vadd.f32 %v1979_v61, %v1463_v37  ;;  %v1999_v35 = vpop.f32.mrf.mxu3 }
 0x849   :  { %v2802_v24 = vmul.f32 -1.442695, %v2022_v23  ;;  %v2042_v23 = vadd.f32 %v4628_v18, %v1999_v35 }
 0x84b   :  { %v2995_v31 = vpop.eup %2994  ;;  %2996 = vpow2.f32 %v2802_v24  ;;  %v1504_v24 = vadd.f32 %v4697_v48, %v4630_v41 }
 0x84c   :  { %v2006_v43 = vadd.f32 1.0, %v2995_v31 }
 0x84e   :  { %2998 = vrcp.f32 %v2006_v43  ;;  %v2018_v54 = vand.u32 2147483648, %v2006_v43  ;;  %v2016_v27 = vand.u32 2147483647, %v2006_v43  ;;  %vm2012_vm6 = vweird.f32 %v2006_v43 }
 0x850   :  { %v2019_v22 = vor.u32 1.1754944e-38, %v2018_v54  ;;  %vm2017_vm10 = vcmp.eq.f32.partialorder %v2016_v27, 8.507059e+37 }
 0x851   :  { %v2997_v4 = vpop.eup %2996 }
 0x852   :  { %v2026_v59 = vadd.f32 1.0, %v2997_v4 }
 0x854   :  { %v2999_v51 = vpop.eup %2998  ;;  %3000 = vrcp.f32 %v2026_v59  ;;  %v2036_v40 = vand.u32 2147483647, %v2026_v59  ;;  %vm2032_vm13 = vweird.f32 %v2026_v59 }
 0x855   :  { %v2008_v52 = vmul.f32 %v2999_v51, %v2006_v43  ;;  %vm2013_vm4 = vweird.f32 %v2999_v51 }
 0x856   :  { %vm2014_vm8 = vmor %vm2012_vm6, %vm2013_vm4  ;;  %vm2037_vm0 = vcmp.eq.f32.partialorder %v2036_v40, 8.507059e+37  ;;  %v4947_v40 = vld [vmem:[#allocation9 + $0x2c8] sm:$0xff] }
 0x857   :  { %v2009_v15 = vsub.f32 1.0, %v2008_v52  ;;  %v2038_v52 = vand.u32 2147483648, %v2026_v59 }
 0x859   :  { %v2010_v16 = vmul.f32 %v2999_v51, %v2009_v15  ;;  %v2039_v43 = vor.u32 1.1754944e-38, %v2038_v52 }
 0x85a   :  { %v3001_v56 = vpop.eup %3000 }
 0x85b   :  { %v2028_v36 = vmul.f32 %v3001_v56, %v2026_v59  ;;  %v2011_v63 = vadd.f32 %v2999_v51, %v2010_v16  ;;  %vm2033_vm12 = vweird.f32 %v3001_v56 }
 0x85c   :  { %vm2034_vm15 = vmor %vm2032_vm13, %vm2033_vm12 }
 0x85d   :  { %v2029_v37 = vsub.f32 1.0, %v2028_v36  ;;  %v2015_v61 = vsel %vm2014_vm8, %v2999_v51, %v2011_v63 }
 0x85e   :  { %v2020_v31 = vsel %vm2017_vm10, %v2019_v22, %v2015_v61  ;;  %v5424_v22 = vld [vmem:[#allocation36_spill] sm:$0xff] }
 0x85f   :  { %v2030_v4 = vmul.f32 %v3001_v56, %v2029_v37  ;;  %v2043_v15 = vmul.f32 %v2042_v23, %v2020_v31 }
 0x861   :  { %v2031_v38 = vadd.f32 %v3001_v56, %v2030_v4  ;;  %v2044_v16 = vadd.f32 %v2043_v15, %v1504_v24 }
 0x863   :  { %v2035_v54 = vsel %vm2034_vm15, %v3001_v56, %v2031_v38  ;;  %3002 = vtanh.f32 %v2044_v16  ;;  %v4942_v38 = vld [vmem:[#allocation9 + $0x2e0] sm:$0xff] }
 0x864   :  { %v2040_v51 = vsel %vm2037_vm0, %v2039_v43, %v2035_v54  ;;  %v5415_v54 = vld [vmem:[#allocation46_spill] sm:$0xff] }
 0x865   :  { %v2046_v27 = vsub.f32 1.0, %v2040_v51  ;;  %v2048_v48 = vmul.f32 %v2040_v51, %v4833_v2  ;;  %v1507_v51 = vadd.f32 %v5415_v54, %v4630_v41 }
 0x869   :  { %v3003_v35 = vpop.eup %3002 }
 0x86a   :  { %v2047_v36 = vmul.f32 %v3003_v35, %v2046_v27 }
 0x86c   :  { %v4928_v63 = vadd.f32 %v2048_v48, %v2047_v36 }
 0x86e   :  { %v4934_v37 = vsel %vm837_vm14, %v4928_v63, %v4833_v2  ;;  %v4952_v2 = vld [vmem:[#allocation9 + $0x2b0] sm:$0xff] }
 0x86f   :  { %2073 = vmatmul.f32.vlgmr.msrb.gmra.mxu0 %v4934_v37  ;;  %2093 = vmatmul.f32.vlgmr.msra.gmra.mxu1 %v4934_v37 }
 0x870   :  { %2113 = vmatmul.f32.vlgmr.msrb.gmra.mxu2 %v4934_v37  ;;  %2327 = vmatpush.msrb.mxu0 %v4838_v6 }
 0x871   :  { %2402 = vmatpush.msra.mxu1 %v4740_v45  ;;  %2422 = vmatpush.msrb.mxu2 %v4842_v47  ;;  %v4957_v45 = vld [vmem:[#allocation9 + $0x298] sm:$0xff]  ;;  %v5414_v47 = vld [vmem:[#allocation47_spill] sm:$0xff] }
 0x872   :  { %2328 = vmatpush.msrb.mxu0 %v4942_v38 }
 0x873   :  { %2403 = vmatpush.msra.mxu1 %v4745_v3  ;;  %2423 = vmatpush.msrb.mxu2 %v4847_v30  ;;  %v4962_v3 = vld [vmem:[#allocation9 + $0x280] sm:$0xff]  ;;  %v1466_v30 = vadd.f32 %v5414_v47, %v5404_v62 }
 0x874   :  { %2329 = vmatpush.msrb.mxu0 %v4947_v40 }
 0x875   :  { %2404 = vmatpush.msra.mxu1 %v4750_v33  ;;  %2424 = vmatpush.msrb.mxu2 %v4852_v7  ;;  %v4967_v33 = vld [vmem:[#allocation9 + $0x268] sm:$0xff] }
 0x876   :  { %2330 = vmatpush.msrb.mxu0 %v4952_v2 }
 0x877   :  { %2405 = vmatpush.msra.mxu1 %v4755_v55  ;;  %2425 = vmatpush.msrb.mxu2 %v4857_v57  ;;  %v4972_v55 = vld [vmem:[#allocation9 + $0x250] sm:$0xff] }
 0x878   :  { %2331 = vmatpush.msrb.mxu0 %v4957_v45 }
 0x879   :  { %2406 = vmatpush.msra.mxu1 %v4760_v5  ;;  %2426 = vmatpush.msrb.mxu2 %v4862_v20  ;;  %v4977_v5 = vld [vmem:[#allocation9 + $0x238] sm:$0xff] }
 0x87a   :  { %2332 = vmatpush.msrb.mxu0 %v4962_v3 }
 0x87b   :  { %2407 = vmatpush.msra.mxu1 %v4765_v42  ;;  %2427 = vmatpush.msrb.mxu2 %v4867_v25  ;;  %v4982_v42 = vld [vmem:[#allocation9 + $0x220] sm:$0xff] }
 0x87c   :  { %2333 = vmatpush.msrb.mxu0 %v4967_v33 }
 0x87d   :  { %2408 = vmatpush.msra.mxu1 %v4770_v44  ;;  %2428 = vmatpush.msrb.mxu2 %v4872_v17  ;;  %v4987_v44 = vld [vmem:[#allocation9 + $0x208] sm:$0xff] }
 0x87e   :  { %2334 = vmatpush.msrb.mxu0 %v4972_v55 }
 0x87f   :  { %2409 = vmatpush.msra.mxu1 %v4775_v11  ;;  %2429 = vmatpush.msrb.mxu2 %v4877_v21  ;;  %v4992_v11 = vld [vmem:[#allocation9 + $0x1f0] sm:$0xff] }
 0x880   :  { %2335 = vmatpush.msrb.mxu0 %v4977_v5 }
 0x881   :  { %2410 = vmatpush.msra.mxu1 %v4780_v13  ;;  %2430 = vmatpush.msrb.mxu2 %v4882_v32  ;;  %v4997_v13 = vld [vmem:[#allocation9 + $0x1d8] sm:$0xff] }
 0x882   :  { %2336 = vmatpush.msrb.mxu0 %v4982_v42 }
 0x883   :  { %2411 = vmatpush.msra.mxu1 %v4785_v19  ;;  %2431 = vmatpush.msrb.mxu2 %v4887_v34  ;;  %v5002_v19 = vld [vmem:[#allocation9 + $0x1c0] sm:$0xff] }
 0x884   :  { %2337 = vmatpush.msrb.mxu0 %v4987_v44 }
 0x885   :  { %2412 = vmatpush.msra.mxu1 %v4790_v58  ;;  %2432 = vmatpush.msrb.mxu2 %v4892_v49  ;;  %v5007_v58 = vld [vmem:[#allocation9 + $0x1a8] sm:$0xff] }
 0x886   :  { %2338 = vmatpush.msrb.mxu0 %v4992_v11 }
 0x887   :  { %2413 = vmatpush.msra.mxu1 %v4795_v14  ;;  %2433 = vmatpush.msrb.mxu2 %v4897_v53  ;;  %v5012_v14 = vld [vmem:[#allocation9 + $0x190] sm:$0xff] }
 0x888   :  { %2339 = vmatpush.msrb.mxu0 %v4997_v13 }
 0x889   :  { %2414 = vmatpush.msra.mxu1 %v4800_v46  ;;  %2434 = vmatpush.msrb.mxu2 %v4902_v1  ;;  %v5413_v46 = vld [vmem:[#allocation41_spill] sm:$0xff] }
 0x88a   :  { %2340 = vmatpush.msrb.mxu0 %v5002_v19 }
 0x88b   :  { %2415 = vmatpush.msra.mxu1 %v4805_v8  ;;  %2435 = vmatpush.msrb.mxu2 %v4907_v39  ;;  %v1425_v8 = vadd.f32 %v5413_v46, %v5405_v26 }
 0x88c   :  { %2341 = vmatpush.msrb.mxu0 %v5007_v58 }
 0x88d   :  { %2416 = vmatpush.msra.mxu1 %v4810_v9  ;;  %2436 = vmatpush.msrb.mxu2 %v4912_v28 }
 0x88e   :  { %2342 = vmatpush.msrb.mxu0 %v5012_v14 }
 0x88f   :  { %2417 = vmatpush.msra.mxu1 %v4815_v0  ;;  %2437 = vmatpush.msrb.mxu2 %v4917_v12 }
 0x8ec   :  { %v2074_v7 = vpop.f32.mrf.mxu0  ;;  %v2094_v57 = vpop.f32.mrf.mxu1 }
 0x8ed   :  { %v2117_v20 = vadd.f32 %v2074_v7, %v1425_v8  ;;  %v2137_v9 = vadd.f32 %v2094_v57, %v1466_v30 }
 0x8ef   :  { %v2803_v25 = vmul.f32 -1.442695, %v2117_v20  ;;  %v2804_v17 = vmul.f32 -1.442695, %v2137_v9 }
 0x8f1   :  { %3004 = vpow2.f32 %v2803_v25 }
 0x8f2   :  { %3006 = vpow2.f32 %v2804_v17 }
 0x8f3   :  { %v2114_v24 = vpop.f32.mrf.mxu2 }
 0x8f4   :  { %v2157_v15 = vadd.f32 %v4628_v18, %v2114_v24 }
 0x8f7   :  { %v3005_v21 = vpop.eup %3004 }
 0x8f8   :  { %v3007_v32 = vpop.eup %3006  ;;  %v2121_v34 = vadd.f32 1.0, %v3005_v21 }
 0x8f9   :  { %v2141_v0 = vadd.f32 1.0, %v3007_v32  ;;  %v2537_v32 = vld [vmem:[#allocation10 + $0x40] sm:$0xff] }
 0x8fa   :  { %3008 = vrcp.f32 %v2121_v34  ;;  %v2133_v59 = vand.u32 2147483648, %v2121_v34  ;;  %v2131_v61 = vand.u32 2147483647, %v2121_v34  ;;  %vm2127_vm6 = vweird.f32 %v2121_v34 }
 0x8fb   :  { %3010 = vrcp.f32 %v2141_v0  ;;  %v2153_v27 = vand.u32 2147483648, %v2141_v0  ;;  %vm2147_vm13 = vweird.f32 %v2141_v0  ;;  %v2151_v36 = vand.u32 2147483647, %v2141_v0 }
 0x8fc   :  { %v2134_v4 = vor.u32 1.1754944e-38, %v2133_v59  ;;  %vm2132_vm10 = vcmp.eq.f32.partialorder %v2131_v61, 8.507059e+37 }
 0x8fd   :  { %v2154_v8 = vor.u32 1.1754944e-38, %v2153_v27  ;;  %vm2152_vm0 = vcmp.eq.f32.partialorder %v2151_v36, 8.507059e+37  ;;  %v5059_v36 = vld [vmem:[%s5184_s5 + $0x1] ss:$0 sm:$0xff] }
 0x900   :  { %v3009_v49 = vpop.eup %3008 }
 0x901   :  { %v3011_v53 = vpop.eup %3010  ;;  %v2123_v1 = vmul.f32 %v3009_v49, %v2121_v34  ;;  %vm2128_vm4 = vweird.f32 %v3009_v49  ;;  %v2536_v34 = vld [vmem:[#allocation10 + $0x38] sm:$0xff] }
 0x902   :  { %v2143_v39 = vmul.f32 %v3011_v53, %v2141_v0  ;;  %vm2129_vm8 = vmor %vm2127_vm6, %vm2128_vm4  ;;  %vm2148_vm12 = vweird.f32 %v3011_v53  ;;  %v2535_v0 = vld [vmem:[#allocation10 + $0x30] sm:$0xff] }
 0x903   :  { %v2124_v28 = vsub.f32 1.0, %v2123_v1  ;;  %vm2149_vm15 = vmor %vm2147_vm13, %vm2148_vm12  ;;  %v2534_v1 = vld [vmem:[#allocation10 + $0x28] sm:$0xff] }
 0x904   :  { %v2144_v12 = vsub.f32 1.0, %v2143_v39  ;;  %v2533_v39 = vld [vmem:[#allocation10 + $0x20] sm:$0xff] }
 0x905   :  { %v2125_v56 = vmul.f32 %v3009_v49, %v2124_v28 }
 0x906   :  { %v2145_v23 = vmul.f32 %v3011_v53, %v2144_v12  ;;  %v2532_v12 = vld [vmem:[#allocation10 + $0x18] sm:$0xff] }
 0x907   :  { %v2126_v31 = vadd.f32 %v3009_v49, %v2125_v56  ;;  %v2531_v56 = vld [vmem:[#allocation10 + $0x10] sm:$0xff] }
 0x908   :  { %v2146_v16 = vadd.f32 %v3011_v53, %v2145_v23  ;;  %v2530_v23 = vld [vmem:[#allocation10 + $0x8] sm:$0xff] }
 0x909   :  { %v2130_v52 = vsel %vm2129_vm8, %v3009_v49, %v2126_v31 }
 0x90a   :  { %v2135_v43 = vsel %vm2132_vm10, %v2134_v4, %v2130_v52  ;;  %v2150_v46 = vsel %vm2149_vm15, %v3011_v53, %v2146_v16  ;;  %v2529_v4 = vld [vmem:[#allocation10] sm:$0xff] }
 0x90b   :  { %v2158_v35 = vmul.f32 %v2157_v15, %v2135_v43  ;;  %v2155_v47 = vsel %vm2152_vm0, %v2154_v8, %v2150_v46 }
 0x90c   :  { %v2161_v30 = vsub.f32 1.0, %v2155_v47  ;;  %v2163_v57 = vmul.f32 %v2155_v47, %v4934_v37 }
 0x90d   :  { %v2159_v48 = vadd.f32 %v2158_v35, %v1507_v51 }
 0x90f   :  { %3012 = vtanh.f32 %v2159_v48 }
 0x915   :  { %v3013_v7 = vpop.eup %3012 }
 0x916   :  { %v2162_v18 = vmul.f32 %v3013_v7, %v2161_v30  ;;  %v5419_v30 = vld [vmem:[#allocation33_spill] sm:$0xff] }
 0x917   :  { %v1510_v7 = vadd.f32 %v5419_v30, %v4630_v41 }
 0x918   :  { %v5025_v20 = vadd.f32 %v2163_v57, %v2162_v18 }
 0x91a   :  { %v5031_v25 = vsel %vm959_vm9, %v5025_v20, %v4934_v37  ;;  %v2165_v50 = vsel %vm959_vm9, %v5025_v20, 0.0  ;;  %v5107_v20 = vld [vmem:[%s5186_s7] ss:$0 sm:$0xff]  ;;  %s3313_s7 = smov [#allocation12]  }
 0x91b   :  { %2188 = vmatmul.f32.vlgmr.msrb.gmra.mxu3 %v5031_v25  ;;  %2208 = vmatmul.f32.vlgmr.msra.gmra.mxu0 %v5031_v25  ;;  %s2754_s19 = sshll.u32 %s3313_s7, 4  ;;  %s2755_s19 = int_to_ptr.vmem [resolvable:$true] %s2754_s19 }
 0x91c   :  { %2228 = vmatmul.f32.vlgmr.msrb.gmra.mxu1 %v5031_v25  ;;  %2442 = vmatpush.msrb.mxu3 %v4838_v6  ;;  %v5417_v6 = vld [vmem:[#allocation23_spill] sm:$0xff] }
 0x91d   :  { %v1469_v37 = vadd.f32 %v5417_v6, %v5404_v62 }
 0x91e   :  { %2443 = vmatpush.msrb.mxu3 %v4942_v38 }
 0x920   :  { %2444 = vmatpush.msrb.mxu3 %v4947_v40  ;;  %v2544_v40 = vld [vmem:[#allocation10 + $0x78] sm:$0xff] }
 0x921   :  { %2549 = vmatpush.msra.mxu0 %v2544_v40 }
 0x922   :  { %2445 = vmatpush.msrb.mxu3 %v4952_v2 }
 0x924   :  { %2446 = vmatpush.msrb.mxu3 %v4957_v45  ;;  %v2543_v45 = vld [vmem:[#allocation10 + $0x70] sm:$0xff] }
 0x925   :  { %2550 = vmatpush.msra.mxu0 %v2543_v45 }
 0x926   :  { %2447 = vmatpush.msrb.mxu3 %v4962_v3 }
 0x928   :  { %2448 = vmatpush.msrb.mxu3 %v4967_v33  ;;  %v2542_v33 = vld [vmem:[#allocation10 + $0x68] sm:$0xff] }
 0x929   :  { %2551 = vmatpush.msra.mxu0 %v2542_v33 }
 0x92a   :  { %2449 = vmatpush.msrb.mxu3 %v4972_v55  ;;  %v5418_v55 = vld [vmem:[#allocation25_spill] sm:$0xff] }
 0x92c   :  { %2450 = vmatpush.msrb.mxu3 %v4977_v5  ;;  %v1428_v5 = vadd.f32 %v5418_v55, %v5405_v26 }
 0x92e   :  { %2451 = vmatpush.msrb.mxu3 %v4982_v42  ;;  %v2541_v42 = vld [vmem:[#allocation10 + $0x60] sm:$0xff] }
 0x92f   :  { %2552 = vmatpush.msra.mxu0 %v2541_v42 }
 0x930   :  { %2452 = vmatpush.msrb.mxu3 %v4987_v44 }
 0x932   :  { %2453 = vmatpush.msrb.mxu3 %v4992_v11  ;;  %v2540_v11 = vld [vmem:[#allocation10 + $0x58] sm:$0xff] }
 0x933   :  { %2553 = vmatpush.msra.mxu0 %v2540_v11  ;;  %v1820_v11 = vsel %vm593_vm7, %v4728_v60, 0.0 }
 0x934   :  { %2454 = vmatpush.msrb.mxu3 %v4997_v13 }
 0x936   :  { %2455 = vmatpush.msrb.mxu3 %v5002_v19  ;;  %v2539_v19 = vld [vmem:[#allocation10 + $0x50] sm:$0xff] }
 0x937   :  { %2554 = vmatpush.msra.mxu0 %v2539_v19 }
 0x938   :  { %2456 = vmatpush.msrb.mxu3 %v5007_v58 }
 0x93a   :  { %2457 = vmatpush.msrb.mxu3 %v5012_v14  ;;  %v2538_v14 = vld [vmem:[#allocation10 + $0x48] sm:$0xff] }
 0x93b   :  { %2555 = vmatpush.msra.mxu0 %v2538_v14  ;;  %v1472_v14 = vadd.f32 %v5424_v22, %v5404_v62 }
 0x93d   :  { %2556 = vmatpush.msra.mxu0 %v2537_v32 }
 0x93f   :  { %2557 = vmatpush.msra.mxu0 %v2536_v34 }
 0x941   :  { %2558 = vmatpush.msra.mxu0 %v2535_v0 }
 0x943   :  { %2559 = vmatpush.msra.mxu0 %v2534_v1 }
 0x945   :  { %2560 = vmatpush.msra.mxu0 %v2533_v39 }
 0x947   :  { %2561 = vmatpush.msra.mxu0 %v2532_v12 }
 0x949   :  { %2562 = vmatpush.msra.mxu0 %v2531_v56 }
 0x94b   :  { %2563 = vmatpush.msra.mxu0 %v2530_v23 }
 0x94d   :  { %2564 = vmatpush.msra.mxu0 %v2529_v4 }
 0x998   :  { %v2209_v38 = vpop.f32.mrf.mxu0 }
 0x999   :  { %v2252_v2 = vadd.f32 %v2209_v38, %v1469_v37  ;;  %v2229_v51 = vpop.f32.mrf.mxu1 }
 0x99a   :  { %v2272_v48 = vadd.f32 %v5059_v36, %v2229_v51 }
 0x99b   :  { %v2806_v3 = vmul.f32 -1.442695, %v2252_v2 }
 0x99d   :  { %3014 = vpow2.f32 %v2806_v3 }
 0x99e   :  { %v2189_v44 = vpop.f32.mrf.mxu3 }
 0x99f   :  { %v2232_v13 = vadd.f32 %v2189_v44, %v1428_v5 }
 0x9a1   :  { %v2805_v58 = vmul.f32 -1.442695, %v2232_v13  ;;  %v5421_v13 = vld [vmem:[#allocation26_spill] sm:$0xff] }
 0x9a2   :  { %v1935_v19 = vsel %vm715_vm1, %v5421_v13, 0.0 }
 0x9a3   :  { %v3015_v17 = vpop.eup %3014  ;;  %3016 = vpow2.f32 %v2805_v58  ;;  %v2050_v58 = vsel %vm837_vm14, %v4928_v63, 0.0  ;;  %v1431_v63 = vadd.f32 %v5423_v29, %v5405_v26 }
 0x9a4   :  { %v2256_v21 = vadd.f32 1.0, %v3015_v17 }
 0x9a6   :  { %3018 = vrcp.f32 %v2256_v21  ;;  %v2268_v18 = vand.u32 2147483648, %v2256_v21  ;;  %vm2262_vm13 = vweird.f32 %v2256_v21  ;;  %v2266_v6 = vand.u32 2147483647, %v2256_v21 }
 0x9a8   :  { %v2269_v40 = vor.u32 1.1754944e-38, %v2268_v18  ;;  %vm2267_vm0 = vcmp.eq.f32.partialorder %v2266_v6, 8.507059e+37 }
 0x9a9   :  { %v3017_v49 = vpop.eup %3016 }
 0x9aa   :  { %v2236_v53 = vadd.f32 1.0, %v3017_v49 }
 0x9ac   :  { %3020 = vrcp.f32 %v2236_v53  ;;  %v3019_v28 = vpop.eup %3018  ;;  %v2248_v15 = vand.u32 2147483648, %v2236_v53  ;;  %v2246_v43 = vand.u32 2147483647, %v2236_v53  ;;  %vm2242_vm6 = vweird.f32 %v2236_v53 }
 0x9ad   :  { %v2258_v59 = vmul.f32 %v3019_v28, %v2256_v21  ;;  %vm2263_vm12 = vweird.f32 %v3019_v28 }
 0x9ae   :  { %v2249_v35 = vor.u32 1.1754944e-38, %v2248_v15  ;;  %vm2247_vm10 = vcmp.eq.f32.partialorder %v2246_v43, 8.507059e+37  ;;  %vm2264_vm15 = vmor %vm2262_vm13, %vm2263_vm12 }
 0x9af   :  { %v2259_v31 = vsub.f32 1.0, %v2258_v59 }
 0x9b1   :  { %v2260_v54 = vmul.f32 %v3019_v28, %v2259_v31 }
 0x9b2   :  { %v3021_v61 = vpop.eup %3020 }
 0x9b3   :  { %v2238_v24 = vmul.f32 %v3021_v61, %v2236_v53  ;;  %vm2243_vm4 = vweird.f32 %v3021_v61  ;;  %v2261_v47 = vadd.f32 %v3019_v28, %v2260_v54 }
 0x9b4   :  { %vm2244_vm8 = vmor %vm2242_vm6, %vm2243_vm4 }
 0x9b5   :  { %v2239_v52 = vsub.f32 1.0, %v2238_v24  ;;  %v2265_v38 = vsel %vm2264_vm15, %v3019_v28, %v2261_v47 }
 0x9b6   :  { %v2270_v2 = vsel %vm2267_vm0, %v2269_v40, %v2265_v38 }
 0x9b7   :  { %v2240_v16 = vmul.f32 %v3021_v61, %v2239_v52  ;;  %v2276_v45 = vsub.f32 1.0, %v2270_v2  ;;  %v2278_v55 = vmul.f32 %v2270_v2, %v5031_v25 }
 0x9b9   :  { %v2241_v27 = vadd.f32 %v3021_v61, %v2240_v16 }
 0x9bb   :  { %v2245_v46 = vsel %vm2244_vm8, %v3021_v61, %v2241_v27 }
 0x9bc   :  { %v2250_v8 = vsel %vm2247_vm10, %v2249_v35, %v2245_v46 }
 0x9bd   :  { %v2273_v57 = vmul.f32 %v2272_v48, %v2250_v8 }
 0x9bf   :  { %v2274_v37 = vadd.f32 %v2273_v57, %v1510_v7 }
 0x9c1   :  { %3022 = vtanh.f32 %v2274_v37 }
 0x9c7   :  { %v3023_v3 = vpop.eup %3022 }
 0x9c8   :  { %v2277_v33 = vmul.f32 %v3023_v3, %v2276_v45 }
 0x9ca   :  { %v2279_v5 = vadd.f32 %v2278_v55, %v2277_v33 }
 0x9cc   :  { %v5068_v44 = vsel %vm1081_vm5, %v2279_v5, %v5031_v25 }
 0x9cd   :  { %2303 = vmatmul.f32.vlgmr.msra.gmra.mxu2 %v5068_v44  ;;  %2323 = vmatmul.f32.vlgmr.msra.gmra.mxu3 %v5068_v44 }
 0x9ce   :  { %2343 = vmatmul.f32.vlgmr.msrb.gmra.mxu0 %v5068_v44 }
 0x9d6   :  { %2811 = vmatmul.msk.f32.vlgmr.msra.gmra.mxu0 %vm473_vm11, %v4725_v10  ;;  %v2280_v10 = vsel %vm1081_vm5, %v2279_v5, 0.0 }
 0x9de   :  { %2812 = vmatmul.msk.f32.gmra.mxu0 %vm593_vm7, %v1820_v11 }
 0x9e6   :  { %2813 = vmatmul.msk.f32.gmra.mxu0 %vm715_vm1, %v1935_v19 }
 0x9ee   :  { %2814 = vmatmul.msk.f32.gmra.mxu0 %vm837_vm14, %v2050_v58 }
 0x9f6   :  { %2815 = vmatmul.msk.f32.gmra.mxu0 %vm959_vm9, %v2165_v50  ;;  %v5425_v50 = vld [vmem:[#allocation32_spill] sm:$0xff] }
 0x9fe   :  { %2816 = vmatmul.msk.f32.gmra.mxu0 %vm1081_vm5, %v2280_v10  ;;  %v1513_v10 = vadd.f32 %v5425_v50, %v4630_v41 }
 0xa4b   :  { %v2344_v60 = vpop.f32.mrf.mxu0 }
 0xa4c   :  { %v2387_v18 = vadd.f32 %v5059_v36, %v2344_v60 }
 0xa50   :  { %v2304_v17 = vpop.f32.mrf.mxu2  ;;  %v2324_v21 = vpop.f32.mrf.mxu3 }
 0xa51   :  { %v2347_v9 = vadd.f32 %v2304_v17, %v1431_v63  ;;  %v2367_v32 = vadd.f32 %v2324_v21, %v1472_v14 }
 0xa53   :  { %v2807_v34 = vmul.f32 -1.442695, %v2347_v9  ;;  %v2808_v0 = vmul.f32 -1.442695, %v2367_v32  ;;  %v2566_v49 = vpop.f32.mrf.mxu0 }
 0xa54   :  { %v2567_v53 = vadd.f32 %v5107_v20, %v2566_v49 }
 0xa55   :  { %3024 = vpow2.f32 %v2807_v34 }
 0xa56   :  { %3026 = vpow2.f32 %v2808_v0  ;;  %v2819_v1 = vmul.f32 -1.442695, %v2567_v53 }
 0xa58   :  { %3028 = vpow2.f32 %v2819_v1 }
 0xa5b   :  { %v3025_v39 = vpop.eup %3024  ;;  %v2569_v28 = vpop.f32.mrf.mxu0 }
 0xa5c   :  { %v3027_v12 = vpop.eup %3026  ;;  %v2351_v59 = vadd.f32 1.0, %v3025_v39  ;;  %v2570_v56 = vadd.f32 %v5107_v20, %v2569_v28 }
 0xa5d   :  { %v5111_v61 = vadd.f32 1.0, %v3027_v12 }
 0xa5e   :  { %v3029_v23 = vpop.eup %3028  ;;  %3030 = vrcp.f32 %v2351_v59  ;;  %v2820_v31 = vmul.f32 -1.442695, %v2570_v56  ;;  %v2361_v35 = vand.u32 2147483647, %v2351_v59  ;;  %v2363_v48 = vand.u32 2147483648, %v2351_v59 }
 0xa5f   :  { %3032 = vrcp.f32 %v5111_v61  ;;  %v2614_v24 = vadd.f32 1.0, %v3029_v23  ;;  %vm2357_vm7 = vweird.f32 %v2351_v59  ;;  %v2383_v14 = vand.u32 2147483648, %v5111_v61 }
 0xa60   :  { %vm2362_vm1 = vcmp.eq.f32.partialorder %v2361_v35, 8.507059e+37  ;;  %v2364_v37 = vor.u32 1.1754944e-38, %v2363_v48  ;;  %vm2377_vm10 = vweird.f32 %v5111_v61  ;;  %v2381_v21 = vand.u32 2147483647, %v5111_v61 }
 0xa61   :  { %3034 = vrcp.f32 %v2614_v24  ;;  %v2631_v2 = vand.u32 2147483647, %v2614_v24  ;;  %v2633_v45 = vand.u32 2147483648, %v2614_v24  ;;  %vm2627_vm5 = vweird.f32 %v2614_v24 }
 0xa62   :  { %3036 = vpow2.f32 %v2820_v31  ;;  %v2384_v39 = vor.u32 1.1754944e-38, %v2383_v14  ;;  %vm2382_vm15 = vcmp.eq.f32.partialorder %v2381_v21, 8.507059e+37 }
 0xa63   :  { %v2572_v4 = vpop.f32.mrf.mxu0  ;;  %vm2632_vm6 = vcmp.eq.f32.partialorder %v2631_v2, 8.507059e+37  ;;  %v2634_v60 = vor.u32 1.1754944e-38, %v2633_v45 }
 0xa64   :  { %v3031_v52 = vpop.eup %3030  ;;  %v2573_v15 = vadd.f32 %v5107_v20, %v2572_v4 }
 0xa65   :  { %v5115_v16 = vpop.eup %3032  ;;  %v2353_v43 = vmul.f32 %v3031_v52, %v2351_v59  ;;  %vm2358_vm11 = vweird.f32 %v3031_v52 }
 0xa66   :  { %v2373_v54 = vmul.f32 %v5115_v16, %v5111_v61  ;;  %v2821_v51 = vmul.f32 -1.442695, %v2573_v15  ;;  %vm2359_vm14 = vmor %vm2357_vm7, %vm2358_vm11  ;;  %vm2378_vm8 = vweird.f32 %v5115_v16 }
 0xa67   :  { %v2354_v27 = vsub.f32 1.0, %v2353_v43  ;;  %v3035_v46 = vpop.eup %3034  ;;  %vm5133_vm12 = vmor %vm2377_vm10, %vm2378_vm8 }
 0xa68   :  { %3038 = vpow2.f32 %v2821_v51  ;;  %v3037_v8 = vpop.eup %3036  ;;  %v2374_v30 = vsub.f32 1.0, %v2373_v54  ;;  %v2623_v7 = vmul.f32 %v3035_v46, %v2614_v24  ;;  %vm2628_vm9 = vweird.f32 %v3035_v46 }
 0xa69   :  { %v2355_v47 = vmul.f32 %v3031_v52, %v2354_v27  ;;  %v2615_v57 = vadd.f32 1.0, %v3037_v8  ;;  %vm2629_vm4 = vmor %vm2627_vm5, %vm2628_vm9 }
 0xa6a   :  { %v2624_v38 = vsub.f32 1.0, %v2623_v7  ;;  %v2375_v33 = vmul.f32 %v5115_v16, %v2374_v30 }
 0xa6b   :  { %v2356_v6 = vadd.f32 %v3031_v52, %v2355_v47  ;;  %v2575_v40 = vpop.f32.mrf.mxu0  ;;  %3040 = vrcp.f32 %v2615_v57  ;;  %v2646_v28 = vand.u32 2147483647, %v2615_v57  ;;  %v2648_v12 = vand.u32 2147483648, %v2615_v57 }
 0xa6c   :  { %v2625_v55 = vmul.f32 %v3035_v46, %v2624_v38  ;;  %v2576_v5 = vadd.f32 %v5107_v20, %v2575_v40  ;;  %v2376_v63 = vadd.f32 %v5115_v16, %v2375_v33  ;;  %vm2642_vm0 = vweird.f32 %v2615_v57 }
 0xa6d   :  { %v2360_v3 = vsel %vm2359_vm14, %v3031_v52, %v2356_v6  ;;  %vm2647_vm7 = vcmp.eq.f32.partialorder %v2646_v28, 8.507059e+37  ;;  %v2649_v15 = vor.u32 1.1754944e-38, %v2648_v12 }
 0xa6e   :  { %v3039_v42 = vpop.eup %3038  ;;  %v2365_v11 = vsel %vm2362_vm1, %v2364_v37, %v2360_v3  ;;  %v2626_v25 = vadd.f32 %v3035_v46, %v2625_v55  ;;  %v2822_v58 = vmul.f32 -1.442695, %v2576_v5  ;;  %v2380_v1 = vsel %vm5133_vm12, %v5115_v16, %v2376_v63 }
 0xa6f   :  { %v2388_v13 = vmul.f32 %v2387_v18, %v2365_v11  ;;  %v5122_v19 = vadd.f32 1.0, %v3039_v42  ;;  %v2385_v31 = vsel %vm2382_vm15, %v2384_v39, %v2380_v1 }
 0xa70   :  { %v2630_v29 = vsel %vm2629_vm4, %v3035_v46, %v2626_v25  ;;  %v2391_v48 = vsub.f32 1.0, %v2385_v31  ;;  %v2393_v7 = vmul.f32 %v2385_v31, %v5068_v44  ;;  %v5429_v31 = vld [vmem:[#allocation30_spill] sm:$0xff] }
 0xa71   :  { %3042 = vrcp.f32 %v5122_v19  ;;  %v3041_v22 = vpop.eup %3040  ;;  %v2635_v17 = vsel %vm2632_vm6, %v2634_v60, %v2630_v29  ;;  %v2389_v34 = vadd.f32 %v2388_v13, %v1513_v10  ;;  %v2661_v43 = vand.u32 2147483647, %v5122_v19 }
 0xa72   :  { %3044 = vpow2.f32 %v2822_v58  ;;  %2742 = vst [vmem:[#allocation12] sm:$0xff] %v2635_v17  ;;  %v2638_v9 = vmul.f32 %v3041_v22, %v2615_v57  ;;  %vm2643_vm13 = vweird.f32 %v3041_v22  ;;  %v2663_v27 = vand.u32 2147483648, %v5122_v19 }
 0xa73   :  { %v2578_v32 = vpop.f32.mrf.mxu0  ;;  %3046 = vtanh.f32 %v2389_v34  ;;  %vm2644_vm11 = vmor %vm2642_vm0, %vm2643_vm13  ;;  %vm2657_vm14 = vweird.f32 %v5122_v19  ;;  %vm2662_vm5 = vcmp.eq.f32.partialorder %v2661_v43, 8.507059e+37 }
 0xa74   :  { %v2579_v49 = vadd.f32 %v5107_v20, %v2578_v32  ;;  %v2639_v53 = vsub.f32 1.0, %v2638_v9  ;;  %v2664_v37 = vor.u32 1.1754944e-38, %v2663_v27  ;;  %v5430_v27 = vld [vmem:[#allocation37_spill] sm:$0xff] }
 0xa76   :  { %v2823_v59 = vmul.f32 -1.442695, %v2579_v49  ;;  %v2640_v61 = vmul.f32 %v3041_v22, %v2639_v53 }
 0xa77   :  { %v3043_v56 = vpop.eup %3042 }
 0xa78   :  { %v3045_v23 = vpop.eup %3044  ;;  %v2653_v24 = vmul.f32 %v3043_v56, %v5122_v19  ;;  %3048 = vpow2.f32 %v2823_v59  ;;  %v2641_v4 = vadd.f32 %v3041_v22, %v2640_v61  ;;  %vm2658_vm1 = vweird.f32 %v3043_v56 }
 0xa79   :  { %v2617_v52 = vadd.f32 1.0, %v3045_v23  ;;  %v3047_v54 = vpop.eup %3046  ;;  %vm2659_vm9 = vmor %vm2657_vm14, %vm2658_vm1 }
 0xa7a   :  { %v2654_v16 = vsub.f32 1.0, %v2653_v24  ;;  %v2645_v51 = vsel %vm2644_vm11, %v3041_v22, %v2641_v4  ;;  %v2392_v30 = vmul.f32 %v3047_v54, %v2391_v48  ;;  %v1434_v4 = vadd.f32 %v5429_v31, %v5405_v26 }
 0xa7b   :  { %3050 = vrcp.f32 %v2617_v52  ;;  %v2581_v35 = vpop.f32.mrf.mxu0  ;;  %v2650_v46 = vsel %vm2647_vm7, %v2649_v15, %v2645_v51  ;;  %v2678_v13 = vand.u32 2147483648, %v2617_v52  ;;  %v2676_v58 = vand.u32 2147483647, %v2617_v52 }
 0xa7c   :  { %v2655_v8 = vmul.f32 %v3043_v56, %v2654_v16  ;;  %v2582_v47 = vadd.f32 %v5107_v20, %v2581_v35  ;;  %2743 = vst [vmem:[#allocation12 + $0x8] sm:$0xff] %v2650_v46  ;;  %v2394_v40 = vadd.f32 %v2393_v7, %v2392_v30  ;;  %vm2672_vm6 = vweird.f32 %v2617_v52 }
 0xa7d   :  { %v2679_v29 = vor.u32 1.1754944e-38, %v2678_v13  ;;  %v1475_v35 = vadd.f32 %v5430_v27, %v5404_v62 }
 0xa7e   :  { %v3049_v18 = vpop.eup %3048  ;;  %v2656_v57 = vadd.f32 %v3043_v56, %v2655_v8  ;;  %v2824_v6 = vmul.f32 -1.442695, %v2582_v47  ;;  %v2395_v5 = vsel %vm1203_vm3, %v2394_v40, 0.0  ;;  %v5152_v42 = vsel %vm1203_vm3, %v2394_v40, %v5068_v44 }
 0xa7f   :  { %v2618_v38 = vadd.f32 1.0, %v3049_v18  ;;  %2817 = vmatmul.msk.f32.gmra.mxu0 %vm1203_vm3, %v2395_v5  ;;  %2418 = vmatmul.f32.vlgmr.msra.gmra.mxu1 %v5152_v42  ;;  %vm2677_vm3 = vcmp.eq.f32.partialorder %v2676_v58, 8.507059e+37 }
 0xa80   :  { %v2660_v2 = vsel %vm2659_vm9, %v3043_v56, %v2656_v57  ;;  %3052 = vpow2.f32 %v2824_v6  ;;  %2438 = vmatmul.f32.vlgmr.msrb.gmra.mxu2 %v5152_v42  ;;  %2458 = vmatmul.f32.vlgmr.msrb.gmra.mxu3 %v5152_v42 }
 0xa81   :  { %v3051_v45 = vpop.eup %3050  ;;  %v2665_v3 = vsel %vm2662_vm5, %v2664_v37, %v2660_v2  ;;  %3054 = vrcp.f32 %v2618_v38  ;;  %v2693_v17 = vand.u32 2147483648, %v2618_v38  ;;  %v2691_v9 = vand.u32 2147483647, %v2618_v38 }
 0xa82   :  { %2744 = vst [vmem:[#allocation12 + $0x10] sm:$0xff] %v2665_v3  ;;  %v2668_v33 = vmul.f32 %v3051_v45, %v2617_v52  ;;  %vm2673_vm4 = vweird.f32 %v3051_v45  ;;  %vm2687_vm12 = vweird.f32 %v2618_v38 }
 0xa83   :  { %vm2674_vm8 = vmor %vm2672_vm6, %vm2673_vm4  ;;  %v2694_v0 = vor.u32 1.1754944e-38, %v2693_v17  ;;  %vm2692_vm15 = vcmp.eq.f32.partialorder %v2691_v9, 8.507059e+37 }
 0xa84   :  { %v2669_v11 = vsub.f32 1.0, %v2668_v33 }
 0xa86   :  { %v3053_v25 = vpop.eup %3052  ;;  %v2670_v19 = vmul.f32 %v3051_v45, %v2669_v11 }
 0xa87   :  { %v3055_v50 = vpop.eup %3054  ;;  %v2619_v10 = vadd.f32 1.0, %v3053_v25 }
 0xa88   :  { %v2671_v60 = vadd.f32 %v3051_v45, %v2670_v19  ;;  %v2683_v44 = vmul.f32 %v3055_v50, %v2618_v38  ;;  %vm2688_vm10 = vweird.f32 %v3055_v50 }
 0xa89   :  { %3056 = vrcp.f32 %v2619_v10  ;;  %vm2689_vm13 = vmor %vm2687_vm12, %vm2688_vm10  ;;  %v2708_v28 = vand.u32 2147483648, %v2619_v10  ;;  %v2706_v59 = vand.u32 2147483647, %v2619_v10  ;;  %vm2702_vm11 = vweird.f32 %v2619_v10 }
 0xa8a   :  { %v2675_v63 = vsel %vm2674_vm8, %v3051_v45, %v2671_v60  ;;  %v2684_v22 = vsub.f32 1.0, %v2683_v44 }
 0xa8b   :  { %v2680_v14 = vsel %vm2677_vm3, %v2679_v29, %v2675_v63  ;;  %v2709_v61 = vor.u32 1.1754944e-38, %v2708_v28  ;;  %vm2707_vm1 = vcmp.eq.f32.partialorder %v2706_v59, 8.507059e+37 }
 0xa8c   :  { %2745 = vst [vmem:[#allocation12 + $0x18] sm:$0xff] %v2680_v14  ;;  %v2685_v21 = vmul.f32 %v3055_v50, %v2684_v22  ;;  %v5431_v14 = vld [vmem:[#allocation20_spill] sm:$0xff] }
 0xa8d   :  { %v1516_v17 = vadd.f32 %v5431_v14, %v4630_v41 }
 0xa8e   :  { %v2686_v32 = vadd.f32 %v3055_v50, %v2685_v21 }
 0xa8f   :  { %v3057_v34 = vpop.eup %3056 }
 0xa90   :  { %v2690_v49 = vsel %vm2689_vm13, %v3055_v50, %v2686_v32  ;;  %v2698_v53 = vmul.f32 %v3057_v34, %v2619_v10  ;;  %vm2703_vm0 = vweird.f32 %v3057_v34 }
 0xa91   :  { %v2695_v1 = vsel %vm2692_vm15, %v2694_v0, %v2690_v49  ;;  %vm2704_vm7 = vmor %vm2702_vm11, %vm2703_vm0 }
 0xa92   :  { %2746 = vst [vmem:[#allocation12 + $0x20] sm:$0xff] %v2695_v1  ;;  %v2699_v39 = vsub.f32 1.0, %v2698_v53 }
 0xa94   :  { %v2700_v12 = vmul.f32 %v3057_v34, %v2699_v39 }
 0xa96   :  { %v2701_v56 = vadd.f32 %v3057_v34, %v2700_v12 }
 0xa98   :  { %v2705_v23 = vsel %vm2704_vm7, %v3057_v34, %v2701_v56 }
 0xa99   :  { %v2710_v24 = vsel %vm2707_vm1, %v2709_v61, %v2705_v23 }
 0xa9a   :  { %2747 = vst [vmem:[#allocation12 + $0x28] sm:$0xff] %v2710_v24 }
 0xafc   :  { %v2584_v52 = vpop.f32.mrf.mxu0  ;;  %v2419_v15 = vpop.f32.mrf.mxu1 }
 0xafd   :  { %v2585_v16 = vadd.f32 %v5107_v20, %v2584_v52  ;;  %v2462_v43 = vadd.f32 %v2419_v15, %v1434_v4 }
 0xaff   :  { %v2825_v54 = vmul.f32 -1.442695, %v2585_v16  ;;  %v2809_v51 = vmul.f32 -1.442695, %v2462_v43 }
 0xb01   :  { %3058 = vpow2.f32 %v2825_v54 }
 0xb02   :  { %3060 = vpow2.f32 %v2809_v51 }
 0xb03   :  { %v2439_v48 = vpop.f32.mrf.mxu2  ;;  %v2459_v55 = vpop.f32.mrf.mxu3 }
 0xb04   :  { %v2482_v46 = vadd.f32 %v2439_v48, %v1475_v35  ;;  %v2502_v60 = vadd.f32 %v5059_v36, %v2459_v55 }
 0xb06   :  { %v2810_v8 = vmul.f32 -1.442695, %v2482_v46 }
 0xb07   :  { %v3059_v47 = vpop.eup %3058 }
 0xb08   :  { %v3061_v30 = vpop.eup %3060  ;;  %3062 = vpow2.f32 %v2810_v8  ;;  %v2620_v7 = vadd.f32 1.0, %v3059_v47 }
 0xb09   :  { %v2466_v26 = vadd.f32 1.0, %v3061_v30 }
 0xb0a   :  { %3064 = vrcp.f32 %v2620_v7  ;;  %v2721_v3 = vand.u32 2147483647, %v2620_v7  ;;  %v2723_v33 = vand.u32 2147483648, %v2620_v7  ;;  %vm2717_vm6 = vweird.f32 %v2620_v7 }
 0xb0b   :  { %3066 = vrcp.f32 %v2466_v26  ;;  %v2478_v45 = vand.u32 2147483648, %v2466_v26  ;;  %v2476_v11 = vand.u32 2147483647, %v2466_v26  ;;  %vm2472_vm5 = vweird.f32 %v2466_v26 }
 0xb0c   :  { %vm2722_vm3 = vcmp.eq.f32.partialorder %v2721_v3, 8.507059e+37  ;;  %v2724_v44 = vor.u32 1.1754944e-38, %v2723_v33 }
 0xb0d   :  { %v2479_v10 = vor.u32 1.1754944e-38, %v2478_v45  ;;  %vm2477_vm10 = vcmp.eq.f32.partialorder %v2476_v11, 8.507059e+37 }
 0xb0e   :  { %v3063_v18 = vpop.eup %3062 }
 0xb0f   :  { %v2486_v57 = vadd.f32 1.0, %v3063_v18 }
 0xb10   :  { %v3065_v6 = vpop.eup %3064 }
 0xb11   :  { %v3067_v37 = vpop.eup %3066  ;;  %3068 = vrcp.f32 %v2486_v57  ;;  %v2713_v40 = vmul.f32 %v3065_v6, %v2620_v7  ;;  %vm2718_vm9 = vweird.f32 %v3065_v6  ;;  %v2498_v34 = vand.u32 2147483648, %v2486_v57 }
 0xb12   :  { %v2468_v38 = vmul.f32 %v3067_v37, %v2466_v26  ;;  %vm2473_vm14 = vweird.f32 %v3067_v37  ;;  %vm2719_vm8 = vmor %vm2717_vm6, %vm2718_vm9  ;;  %v2496_v49 = vand.u32 2147483647, %v2486_v57  ;;  %vm2492_vm13 = vweird.f32 %v2486_v57 }
 0xb13   :  { %v2714_v62 = vsub.f32 1.0, %v2713_v40  ;;  %vm2474_vm4 = vmor %vm2472_vm5, %vm2473_vm14  ;;  %v2499_v1 = vor.u32 1.1754944e-38, %v2498_v34 }
 0xb14   :  { %v2469_v2 = vsub.f32 1.0, %v2468_v38  ;;  %vm2497_vm0 = vcmp.eq.f32.partialorder %v2496_v49, 8.507059e+37 }
 0xb15   :  { %v2715_v13 = vmul.f32 %v3065_v6, %v2714_v62 }
 0xb16   :  { %v2470_v5 = vmul.f32 %v3067_v37, %v2469_v2 }
 0xb17   :  { %v3069_v25 = vpop.eup %3068  ;;  %v2716_v50 = vadd.f32 %v3065_v6, %v2715_v13 }
 0xb18   :  { %v2488_v19 = vmul.f32 %v3069_v25, %v2486_v57  ;;  %v2471_v58 = vadd.f32 %v3067_v37, %v2470_v5  ;;  %vm2493_vm12 = vweird.f32 %v3069_v25 }
 0xb19   :  { %v2720_v22 = vsel %vm2719_vm8, %v3065_v6, %v2716_v50  ;;  %vm2494_vm15 = vmor %vm2492_vm13, %vm2493_vm12 }
 0xb1a   :  { %v2489_v29 = vsub.f32 1.0, %v2488_v19  ;;  %v2475_v63 = vsel %vm2474_vm4, %v3067_v37, %v2471_v58  ;;  %v2725_v9 = vsel %vm2722_vm3, %v2724_v44, %v2720_v22 }
 0xb1b   :  { %v2480_v21 = vsel %vm2477_vm10, %v2479_v10, %v2475_v63  ;;  %2748 = vst [vmem:[#allocation12 + $0x30] sm:$0xff] %v2725_v9 }
 0xb1c   :  { %v2490_v32 = vmul.f32 %v3069_v25, %v2489_v29  ;;  %v2503_v0 = vmul.f32 %v2502_v60, %v2480_v21 }
 0xb1e   :  { %v2491_v53 = vadd.f32 %v3069_v25, %v2490_v32  ;;  %v2504_v36 = vadd.f32 %v2503_v0, %v1516_v17 }
 0xb20   :  { %v2495_v39 = vsel %vm2494_vm15, %v3069_v25, %v2491_v53  ;;  %3070 = vtanh.f32 %v2504_v36 }
 0xb21   :  { %v2500_v28 = vsel %vm2497_vm0, %v2499_v1, %v2495_v39 }
 0xb22   :  { %v2506_v12 = vsub.f32 1.0, %v2500_v28  ;;  %v2508_v56 = vmul.f32 %v2500_v28, %v5152_v42 }
 0xb26   :  { %v3071_v59 = vpop.eup %3070 }
 0xb27   :  { %v2507_v41 = vmul.f32 %v3071_v59, %v2506_v12 }
 0xb29   :  { %v2509_v61 = vadd.f32 %v2508_v56, %v2507_v41 }
 0xb2b   :  { %v2510_v24 = vsel %vm1325_vm2, %v2509_v61, 0.0 }
 0xb2c   :  { %2818 = vmatmul.msk.f32.gmra.mxu0 %vm1325_vm2, %v2510_v24 }
 0xba9   :  { %v2587_v31 = vpop.f32.mrf.mxu0 }
 0xbaa   :  { %v2588_v4 = vadd.f32 %v5107_v20, %v2587_v31 }
 0xbac   :  { %v2826_v52 = vmul.f32 -1.442695, %v2588_v4 }
 0xbae   :  { %3072 = vpow2.f32 %v2826_v52 }
 0xbb4   :  { %v3073_v15 = vpop.eup %3072 }
 0xbb5   :  { %v2621_v16 = vadd.f32 1.0, %v3073_v15 }
 0xbb7   :  { %3074 = vrcp.f32 %v2621_v16  ;;  %v2738_v27 = vand.u32 2147483648, %v2621_v16  ;;  %v2736_v35 = vand.u32 2147483647, %v2621_v16  ;;  %vm2732_vm2 = vweird.f32 %v2621_v16 }
 0xbb9   :  { %v2739_v20 = vor.u32 1.1754944e-38, %v2738_v27  ;;  %vm2737_vm1 = vcmp.eq.f32.partialorder %v2736_v35, 8.507059e+37 }
 0xbbd   :  { %v3075_v43 = vpop.eup %3074 }
 0xbbe   :  { %v2728_v54 = vmul.f32 %v3075_v43, %v2621_v16  ;;  %vm2733_vm11 = vweird.f32 %v3075_v43 }
 0xbbf   :  { %vm2734_vm7 = vmor %vm2732_vm2, %vm2733_vm11 }
 0xbc0   :  { %v2729_v51 = vsub.f32 1.0, %v2728_v54 }
 0xbc2   :  { %v2730_v42 = vmul.f32 %v3075_v43, %v2729_v51 }
 0xbc4   :  { %v2731_v48 = vadd.f32 %v3075_v43, %v2730_v42 }
 0xbc6   :  { %v2735_v46 = vsel %vm2734_vm7, %v3075_v43, %v2731_v48 }
 0xbc7   :  { %v2740_v8 = vsel %vm2737_vm1, %v2739_v20, %v2735_v46 }
 0xbc8   :  { %2749 = vst [vmem:[#allocation12 + $0x38] sm:$0xff] %v2740_v8 }
 0xbc9   :  { %2762 = dma.vmem_to_hbm [thread:$0]  %s2755_s19, 1024, %s2757_s1, [#allocation6], %s3307_s17, %s3307_s17, %s3308_s18  }
 0xbca   :  { %3301 = dma.done.wait [#allocation6], 1024  }
 0xbcb   :  { %3302 = vsyncadd [#allocation6], 4294966272 }
 0xbcc   :  { %2767 = vsyncpa [#allocation5], 1 }
 0xbcd   :  { %2768 = vsyncpa [#allocation8], 1 }
 0xbce   :  { %2769 = vsyncpa [#allocation11], 1 }
 0xbcf   :  { %2770 = vsyncpa [#allocation6], 1 }

</bundles_post_ra>
